<compile_context>
chip_gen: v7x
topology: tpu7x:2x2x1
jax: 0.10.0
libtpu: 0.0.40
codegen_flags: <defaults>
</compile_context>

<pallas_src>
import jax
import jax.numpy as jnp
from jax.experimental import pallas as pl
from jax.experimental.pallas import tpu as pltpu

LATENT_DIM = 100
DIMS = [LATENT_DIM, 128, 256, 512, 1024, 784]
LATENT_PAD = 128          # 100 -> 128 (sublane/lane aligned)
OUT_PAD = 896             # 784 -> 7*128 (lane-dense final store / aligned w5 tiles)
BN_EPS = 1e-5
LRELU_SLOPE = 0.2

# ---- packed (1, VEC_LEN) parameter-vector layout (all widths are multiples of
# 128, so every segment starts on a vreg/lane boundary) -----------------------
SEG_WIDTHS = {
    "b1": 128,
    "b2": 256, "g2": 256, "be2": 256,
    "b3": 512, "g3": 512, "be3": 512,
    "b4": 1024, "g4": 1024, "be4": 1024,
    "b5": OUT_PAD,
    "s1": 128, "s2": 256, "s3": 512, "s4": 1024, "s5": OUT_PAD,
}
SEG_ORDER = list(SEG_WIDTHS.keys())
OFFSETS = {}
_off = 0
for _name in SEG_ORDER:
    OFFSETS[_name] = (_off, _off + SEG_WIDTHS[_name])
    _off += SEG_WIDTHS[_name]
VEC_LEN = _off  # 9216 = 72 * 128


def _leaky_relu(x):
    # 2 VPU ops per element (mul + max) instead of 3 (mul + cmp + select).
    return jnp.maximum(x, LRELU_SLOPE * x)


def _batchnorm_train(x, gamma, beta):
    # nn.BatchNorm1d training-mode math: per-feature batch mean, biased variance.
    # Folded into a single multiply-add per element on the (B, N) activations.
    mean = jnp.mean(x, axis=0, keepdims=True)
    var = jnp.mean(jnp.square(x - mean), axis=0, keepdims=True)
    scale = gamma * jax.lax.rsqrt(var + BN_EPS)
    shift = beta - mean * scale
    return x * scale + shift


def _dot_q(x_f32, wq, scale):
    # int8 weight values are exactly representable in bf16, so the cast is lossless
    # dequant-to-bf16; MXU runs bf16 x bf16 -> f32, per-output-channel scale is
    # applied on the (B, N) accumulator (cheap: B << K).
    acc = jnp.dot(x_f32.astype(jnp.bfloat16), wq.astype(jnp.bfloat16),
                  preferred_element_type=jnp.float32)
    return acc * scale


def generator_kernel(z_ref, w1_ref, w2_ref, w3_ref, w4_hbm, w5_hbm, vec_ref,
                     o_ref, w4_buf, w5_buf, dma_sem):
    # Kick off the big-weight DMAs immediately so they overlap layers 1-3 compute.
    cp4 = pltpu.make_async_copy(w4_hbm, w4_buf, dma_sem.at[0])
    cp5 = pltpu.make_async_copy(w5_hbm, w5_buf, dma_sem.at[1])
    cp4.start()
    cp5.start()

    def seg(name):
        lo, hi = OFFSETS[name]
        return vec_ref[:, lo:hi]          # static, lane-aligned slice of (1, VEC_LEN)

    x = z_ref[...].astype(jnp.float32)

    # Layer 1: Linear(100 -> 128) + LeakyReLU(0.2)
    h = _dot_q(x, w1_ref[...], seg("s1")) + seg("b1")
    h = _leaky_relu(h)
    # TODO(synk): nn.Dropout(0.5) is stochastic in train mode; eval-mode identity used here.

    # Layer 2: Linear(128 -> 256) + BatchNorm1d + LeakyReLU(0.2)
    h = _dot_q(h, w2_ref[...], seg("s2")) + seg("b2")
    h = _leaky_relu(_batchnorm_train(h, seg("g2"), seg("be2")))

    # Layer 3: Linear(256 -> 512) + BatchNorm1d + LeakyReLU(0.2)
    h = _dot_q(h, w3_ref[...], seg("s3")) + seg("b3")
    h = _leaky_relu(_batchnorm_train(h, seg("g3"), seg("be3")))

    # Layer 4: Linear(512 -> 1024) + BatchNorm1d + LeakyReLU(0.2)
    cp4.wait()   # w4 DMA has been overlapping layers 1-3
    h = _dot_q(h, w4_buf[...], seg("s4")) + seg("b4")
    h = _leaky_relu(_batchnorm_train(h, seg("g4"), seg("be4")))

    # Layer 5: Linear(1024 -> 784, padded to 896) + Tanh
    cp5.wait()
    out = _dot_q(h, w5_buf[...], seg("s5")) + seg("b5")
    o_ref[...] = jnp.tanh(out).astype(o_ref.dtype)


def init_params(key):
    """Deterministic parameter init mimicking PyTorch Linear defaults
    (uniform(-1/sqrt(fan_in), 1/sqrt(fan_in))); BatchNorm gamma=1, beta=0.
    Weights are stored (in_features, out_features) so the kernel computes
    x @ W + b (same math as PyTorch's x @ W.T with W stored (out, in))."""
    params = []
    keys = jax.random.split(key, len(DIMS) - 1)
    for li in range(len(DIMS) - 1):
        fan_in, fan_out = DIMS[li], DIMS[li + 1]
        kw, kb = jax.random.split(keys[li])
        bound = 1.0 / (fan_in ** 0.5)
        w = jax.random.uniform(kw, (fan_in, fan_out), jnp.float32, -bound, bound)
        b = jax.random.uniform(kb, (1, fan_out), jnp.float32, -bound, bound)
        params.append(w)
        params.append(b)
        # BatchNorm follows linears 2, 3, 4 (layer indices 1, 2, 3)
        if li in (1, 2, 3):
            params.append(jnp.ones((1, fan_out), jnp.float32))   # gamma
            params.append(jnp.zeros((1, fan_out), jnp.float32))  # beta
    return tuple(params)


def _quantize_int8(w):
    """Per-output-channel symmetric int8 quantization. Returns (int8 weights,
    f32 (1, N) scale such that w ~= q * scale)."""
    amax = jnp.max(jnp.abs(w), axis=0, keepdims=True)
    scale = jnp.maximum(amax, 1e-12) / 127.0
    q = jnp.clip(jnp.round(w / scale), -127, 127).astype(jnp.int8)
    return q, scale.astype(jnp.float32)


def pack_params(params):
    """One-time prep: pad to lane-aligned shapes, quantize weight matrices to
    int8 (per-output-channel scale), and pack all small (1,N) vectors (biases,
    BN gamma/beta, scales) into a single lane-aligned f32 array."""
    (w1, b1,
     w2, b2, g2, be2,
     w3, b3, g3, be3,
     w4, b4, g4, be4,
     w5, b5) = params
    # Zero-pad latent rows of w1 (100 -> 128); padded z columns are zero too.
    w1p = jnp.pad(w1, ((0, LATENT_PAD - LATENT_DIM), (0, 0)))
    # Zero-pad output columns of w5/b5 (784 -> 896); sliced off after the kernel.
    w5p = jnp.pad(w5, ((0, 0), (0, OUT_PAD - DIMS[-1])))
    b5p = jnp.pad(b5, ((0, 0), (0, OUT_PAD - DIMS[-1])))

    w1q, s1 = _quantize_int8(w1p)
    w2q, s2 = _quantize_int8(w2)
    w3q, s3 = _quantize_int8(w3)
    w4q, s4 = _quantize_int8(w4)
    w5q, s5 = _quantize_int8(w5p)

    segs = {"b1": b1,
            "b2": b2, "g2": g2, "be2": be2,
            "b3": b3, "g3": g3, "be3": be3,
            "b4": b4, "g4": g4, "be4": be4,
            "b5": b5p,
            "s1": s1, "s2": s2, "s3": s3, "s4": s4, "s5": s5}
    vec = jnp.concatenate([segs[n].astype(jnp.float32) for n in SEG_ORDER], axis=1)
    assert vec.shape == (1, VEC_LEN)
    return (w1q, w2q, w3q, w4q, w5q, vec)


def generator_forward(z, packed_params):
    B = z.shape[0]
    assert B >= 2, "BatchNorm1d training-mode statistics need batch >= 2"
    w1q, w2q, w3q, w4q, w5q, vec = packed_params

    # Pad the latent dim 100 -> 128 with zeros (matches zero-padded w1 rows).
    z_pad = jnp.pad(z.astype(jnp.float32),
                    ((0, 0), (0, LATENT_PAD - z.shape[1])))

    # Single grid step with full-array blocks: the full batch must stay in one
    # block so BatchNorm batch statistics are exact, and everything (int8
    # weights ~1.6 MB + tiny activations) fits easily in VMEM.  The two big
    # weights stay in HBM (pl.ANY) and are overlapped manually in the kernel.
    in_specs = [
        pl.BlockSpec(z_pad.shape, lambda i: (0, 0)),
        pl.BlockSpec(w1q.shape, lambda i: (0, 0)),
        pl.BlockSpec(w2q.shape, lambda i: (0, 0)),
        pl.BlockSpec(w3q.shape, lambda i: (0, 0)),
        pl.BlockSpec(memory_space=pl.ANY),   # w4: manual DMA, overlapped
        pl.BlockSpec(memory_space=pl.ANY),   # w5: manual DMA, overlapped
        pl.BlockSpec(vec.shape, lambda i: (0, 0)),
    ]
    out_spec = pl.BlockSpec((B, OUT_PAD), lambda i: (0, 0))

    out = pl.pallas_call(
        generator_kernel,
        out_shape=jax.ShapeDtypeStruct((B, OUT_PAD), jnp.float32),
        grid_spec=pltpu.PrefetchScalarGridSpec(
            num_scalar_prefetch=0,
            grid=(1,),
            in_specs=in_specs,
            out_specs=out_spec,
            scratch_shapes=[
                pltpu.VMEM((DIMS[3], DIMS[4]), jnp.int8),   # w4 single buffer
                pltpu.VMEM((DIMS[4], OUT_PAD), jnp.int8),   # w5 single buffer
                pltpu.SemaphoreType.DMA((2,)),
            ],
        ),
        compiler_params=pltpu.CompilerParams(
            dimension_semantics=("arbitrary",),
            # Total footprint ~3 MB; explicit limit keeps it safe on v5e's
            # 16 MiB scoped default and leaves headroom on v7x's 64 MiB VMEM.
            vmem_limit_bytes=32 * 1024 * 1024,
        ),
    )(z_pad, w1q, w2q, w3q, w4q, w5q, vec)

    # Drop the padded output columns (784..895 are exactly tanh(0)=0 anyway).
    return out[:, :DIMS[-1]]


if __name__ == "__main__":
    key = jax.random.PRNGKey(0)
    k_param, k_z = jax.random.split(key)

    params = init_params(k_param)
    packed = pack_params(params)

    batch = 16  # small demo batch (>1 so BatchNorm batch statistics are well-defined)
    z = jax.random.normal(k_z, (batch, LATENT_DIM), dtype=jnp.float32)

    out = generator_forward(z, packed)
    out = jax.block_until_ready(out)

    assert out.shape == (batch, 784)
    assert bool(jnp.all(jnp.isfinite(out)))
    assert bool(jnp.all(jnp.abs(out) <= 1.0))  # tanh output range

    print("KERNEL_OK")
</pallas_src>

<mosaic_0001>
module attributes {stable_mosaic.version = 11 : i64} {
  func.func @generator_kernel(%arg0: i32, %arg1: memref<16x128xf32, #tpu.memory_space<vmem>>, %arg2: memref<128x128xi8, #tpu.memory_space<vmem>>, %arg3: memref<128x256xi8, #tpu.memory_space<vmem>>, %arg4: memref<256x512xi8, #tpu.memory_space<vmem>>, %arg5: memref<512x1024xi8, #tpu.memory_space<any>>, %arg6: memref<1024x896xi8, #tpu.memory_space<any>>, %arg7: memref<1x9216xf32, #tpu.memory_space<vmem>>, %arg8: memref<16x896xf32, #tpu.memory_space<vmem>>, %arg9: memref<512x1024xi8, #tpu.memory_space<vmem>>, %arg10: memref<1024x896xi8, #tpu.memory_space<vmem>>, %arg11: memref<2x!tpu.dma_semaphore, #tpu.memory_space<semaphore_mem>>) attributes {dimension_semantics = [#tpu.dimension_semantics<arbitrary>], iteration_bounds = array<i64: 1>, scalar_prefetch = 0 : i64, scratch_operands = 3 : i64, tpu.core_type = #tpu.core_type<tc>, window_params = [{pipeline_mode = #tpu.pipeline_mode<synchronous>, transform_indices = @transform_0, window_bounds = array<i64: 16, 128>}, {pipeline_mode = #tpu.pipeline_mode<synchronous>, transform_indices = @transform_1, window_bounds = array<i64: 128, 128>}, {pipeline_mode = #tpu.pipeline_mode<synchronous>, transform_indices = @transform_2, window_bounds = array<i64: 128, 256>}, {pipeline_mode = #tpu.pipeline_mode<synchronous>, transform_indices = @transform_3, window_bounds = array<i64: 256, 512>}, {}, {}, {pipeline_mode = #tpu.pipeline_mode<synchronous>, transform_indices = @transform_6, window_bounds = array<i64: 1, 9216>}, {pipeline_mode = #tpu.pipeline_mode<synchronous>, transform_indices = @transform_7, window_bounds = array<i64: 16, 896>}]} {
    %c0_i32 = arith.constant 0 : i32
    %0 = tpu.memref_slice %arg11[%c0_i32] : memref<2x!tpu.dma_semaphore, #tpu.memory_space<semaphore_mem>> -> memref<1x!tpu.dma_semaphore, #tpu.memory_space<semaphore_mem>>
    %1 = tpu.memref_squeeze %0 : memref<1x!tpu.dma_semaphore, #tpu.memory_space<semaphore_mem>> -> memref<!tpu.dma_semaphore, #tpu.memory_space<semaphore_mem>>
    tpu.enqueue_dma source(%arg5 : memref<512x1024xi8, #tpu.memory_space<any>>) target(%arg9 : memref<512x1024xi8, #tpu.memory_space<vmem>>) target_semaphore(%1 : memref<!tpu.dma_semaphore, #tpu.memory_space<semaphore_mem>>)
    %c1_i32 = arith.constant 1 : i32
    %2 = tpu.memref_slice %arg11[%c1_i32] : memref<2x!tpu.dma_semaphore, #tpu.memory_space<semaphore_mem>> -> memref<1x!tpu.dma_semaphore, #tpu.memory_space<semaphore_mem>>
    %3 = tpu.memref_squeeze %2 : memref<1x!tpu.dma_semaphore, #tpu.memory_space<semaphore_mem>> -> memref<!tpu.dma_semaphore, #tpu.memory_space<semaphore_mem>>
    tpu.enqueue_dma source(%arg6 : memref<1024x896xi8, #tpu.memory_space<any>>) target(%arg10 : memref<1024x896xi8, #tpu.memory_space<vmem>>) target_semaphore(%3 : memref<!tpu.dma_semaphore, #tpu.memory_space<semaphore_mem>>)
    %c0 = arith.constant 0 : index
    %c0_0 = arith.constant 0 : index
    %4 = vector.load %arg1[%c0, %c0_0] : memref<16x128xf32, #tpu.memory_space<vmem>>, vector<16x128xf32>
    %c0_1 = arith.constant 0 : index
    %c0_2 = arith.constant 0 : index
    %5 = vector.load %arg2[%c0_1, %c0_2] : memref<128x128xi8, #tpu.memory_space<vmem>>, vector<128x128xi8>
    %c0_3 = arith.constant 0 : index
    %c6400 = arith.constant 6400 : index
    %6 = vector.load %arg7[%c0_3, %c6400] : memref<1x9216xf32, #tpu.memory_space<vmem>>, vector<1x128xf32>
    %7 = arith.truncf %4 : vector<16x128xf32> to vector<16x128xbf16>
    %8 = arith.sitofp %5 : vector<128x128xi8> to vector<128x128xbf16>
    %cst = arith.constant dense<0.000000e+00> : vector<16x128xf32>
    %9 = tpu.matmul %7, %8, %cst {dimension_numbers = #tpu.dot_dimension_numbers<[1], [0], [0], [1], [0, 0, 1, 1], [], []>} : vector<16x128xbf16>, vector<128x128xbf16>, vector<16x128xf32> -> vector<16x128xf32>
    %10 = vector.broadcast %6 : vector<1x128xf32> to vector<16x128xf32>
    %11 = arith.mulf %9, %10 : vector<16x128xf32>
    %c0_4 = arith.constant 0 : index
    %c0_5 = arith.constant 0 : index
    %12 = vector.load %arg7[%c0_4, %c0_5] : memref<1x9216xf32, #tpu.memory_space<vmem>>, vector<1x128xf32>
    %13 = vector.broadcast %12 : vector<1x128xf32> to vector<16x128xf32>
    %14 = arith.addf %11, %13 : vector<16x128xf32>
    %cst_6 = arith.constant 2.000000e-01 : f32
    %15 = vector.broadcast %cst_6 : f32 to vector<16x128xf32>
    %16 = arith.mulf %15, %14 : vector<16x128xf32>
    %17 = arith.maximumf %14, %16 : vector<16x128xf32>
    %c0_7 = arith.constant 0 : index
    %c0_8 = arith.constant 0 : index
    %18 = vector.load %arg3[%c0_7, %c0_8] : memref<128x256xi8, #tpu.memory_space<vmem>>, vector<128x256xi8>
    %c0_9 = arith.constant 0 : index
    %c6528 = arith.constant 6528 : index
    %19 = vector.load %arg7[%c0_9, %c6528] : memref<1x9216xf32, #tpu.memory_space<vmem>>, vector<1x256xf32>
    %20 = arith.truncf %17 : vector<16x128xf32> to vector<16x128xbf16>
    %21 = arith.sitofp %18 : vector<128x256xi8> to vector<128x256xbf16>
    %cst_10 = arith.constant dense<0.000000e+00> : vector<16x256xf32>
    %22 = tpu.matmul %20, %21, %cst_10 {dimension_numbers = #tpu.dot_dimension_numbers<[1], [0], [0], [1], [0, 0, 1, 1], [], []>} : vector<16x128xbf16>, vector<128x256xbf16>, vector<16x256xf32> -> vector<16x256xf32>
    %23 = vector.broadcast %19 : vector<1x256xf32> to vector<16x256xf32>
    %24 = arith.mulf %22, %23 : vector<16x256xf32>
    %c0_11 = arith.constant 0 : index
    %c128 = arith.constant 128 : index
    %25 = vector.load %arg7[%c0_11, %c128] : memref<1x9216xf32, #tpu.memory_space<vmem>>, vector<1x256xf32>
    %26 = vector.broadcast %25 : vector<1x256xf32> to vector<16x256xf32>
    %27 = arith.addf %24, %26 : vector<16x256xf32>
    %c0_12 = arith.constant 0 : index
    %c384 = arith.constant 384 : index
    %28 = vector.load %arg7[%c0_12, %c384] : memref<1x9216xf32, #tpu.memory_space<vmem>>, vector<1x256xf32>
    %c0_13 = arith.constant 0 : index
    %c640 = arith.constant 640 : index
    %29 = vector.load %arg7[%c0_13, %c640] : memref<1x9216xf32, #tpu.memory_space<vmem>>, vector<1x256xf32>
    %cst_14 = arith.constant dense<0.000000e+00> : vector<256xf32>
    %30 = vector.multi_reduction <add>, %27, %cst_14 [0] : vector<16x256xf32> to vector<256xf32>
    %31 = vector.shape_cast %30 : vector<256xf32> to vector<1x256xf32>
    %cst_15 = arith.constant 1.600000e+01 : f32
    %32 = vector.broadcast %cst_15 : f32 to vector<1x256xf32>
    %33 = arith.divf %31, %32 : vector<1x256xf32>
    %34 = vector.broadcast %33 : vector<1x256xf32> to vector<16x256xf32>
    %35 = arith.subf %27, %34 : vector<16x256xf32>
    %36 = arith.mulf %35, %35 : vector<16x256xf32>
    %cst_16 = arith.constant dense<0.000000e+00> : vector<256xf32>
    %37 = vector.multi_reduction <add>, %36, %cst_16 [0] : vector<16x256xf32> to vector<256xf32>
    %38 = vector.shape_cast %37 : vector<256xf32> to vector<1x256xf32>
    %cst_17 = arith.constant 1.600000e+01 : f32
    %39 = vector.broadcast %cst_17 : f32 to vector<1x256xf32>
    %40 = arith.divf %38, %39 : vector<1x256xf32>
    %cst_18 = arith.constant 9.99999974E-6 : f32
    %41 = vector.broadcast %cst_18 : f32 to vector<1x256xf32>
    %42 = arith.addf %40, %41 : vector<1x256xf32>
    %43 = math.rsqrt %42 : vector<1x256xf32>
    %44 = arith.mulf %28, %43 : vector<1x256xf32>
    %45 = arith.mulf %33, %44 : vector<1x256xf32>
    %46 = arith.subf %29, %45 : vector<1x256xf32>
    %47 = vector.broadcast %44 : vector<1x256xf32> to vector<16x256xf32>
    %48 = arith.mulf %27, %47 : vector<16x256xf32>
    %49 = vector.broadcast %46 : vector<1x256xf32> to vector<16x256xf32>
    %50 = arith.addf %48, %49 : vector<16x256xf32>
    %cst_19 = arith.constant 2.000000e-01 : f32
    %51 = vector.broadcast %cst_19 : f32 to vector<16x256xf32>
    %52 = arith.mulf %51, %50 : vector<16x256xf32>
    %53 = arith.maximumf %50, %52 : vector<16x256xf32>
    %c0_20 = arith.constant 0 : index
    %c0_21 = arith.constant 0 : index
    %54 = vector.load %arg4[%c0_20, %c0_21] : memref<256x512xi8, #tpu.memory_space<vmem>>, vector<256x512xi8>
    %c0_22 = arith.constant 0 : index
    %c6784 = arith.constant 6784 : index
    %55 = vector.load %arg7[%c0_22, %c6784] : memref<1x9216xf32, #tpu.memory_space<vmem>>, vector<1x512xf32>
    %56 = arith.truncf %53 : vector<16x256xf32> to vector<16x256xbf16>
    %57 = arith.sitofp %54 : vector<256x512xi8> to vector<256x512xbf16>
    %cst_23 = arith.constant dense<0.000000e+00> : vector<16x512xf32>
    %58 = tpu.matmul %56, %57, %cst_23 {dimension_numbers = #tpu.dot_dimension_numbers<[1], [0], [0], [1], [0, 0, 1, 1], [], []>} : vector<16x256xbf16>, vector<256x512xbf16>, vector<16x512xf32> -> vector<16x512xf32>
    %59 = vector.broadcast %55 : vector<1x512xf32> to vector<16x512xf32>
    %60 = arith.mulf %58, %59 : vector<16x512xf32>
    %c0_24 = arith.constant 0 : index
    %c896 = arith.constant 896 : index
    %61 = vector.load %arg7[%c0_24, %c896] : memref<1x9216xf32, #tpu.memory_space<vmem>>, vector<1x512xf32>
    %62 = vector.broadcast %61 : vector<1x512xf32> to vector<16x512xf32>
    %63 = arith.addf %60, %62 : vector<16x512xf32>
    %c0_25 = arith.constant 0 : index
    %c1408 = arith.constant 1408 : index
    %64 = vector.load %arg7[%c0_25, %c1408] : memref<1x9216xf32, #tpu.memory_space<vmem>>, vector<1x512xf32>
    %c0_26 = arith.constant 0 : index
    %c1920 = arith.constant 1920 : index
    %65 = vector.load %arg7[%c0_26, %c1920] : memref<1x9216xf32, #tpu.memory_space<vmem>>, vector<1x512xf32>
    %cst_27 = arith.constant dense<0.000000e+00> : vector<512xf32>
    %66 = vector.multi_reduction <add>, %63, %cst_27 [0] : vector<16x512xf32> to vector<512xf32>
    %67 = vector.shape_cast %66 : vector<512xf32> to vector<1x512xf32>
    %cst_28 = arith.constant 1.600000e+01 : f32
    %68 = vector.broadcast %cst_28 : f32 to vector<1x512xf32>
    %69 = arith.divf %67, %68 : vector<1x512xf32>
    %70 = vector.broadcast %69 : vector<1x512xf32> to vector<16x512xf32>
    %71 = arith.subf %63, %70 : vector<16x512xf32>
    %72 = arith.mulf %71, %71 : vector<16x512xf32>
    %cst_29 = arith.constant dense<0.000000e+00> : vector<512xf32>
    %73 = vector.multi_reduction <add>, %72, %cst_29 [0] : vector<16x512xf32> to vector<512xf32>
    %74 = vector.shape_cast %73 : vector<512xf32> to vector<1x512xf32>
    %cst_30 = arith.constant 1.600000e+01 : f32
    %75 = vector.broadcast %cst_30 : f32 to vector<1x512xf32>
    %76 = arith.divf %74, %75 : vector<1x512xf32>
    %cst_31 = arith.constant 9.99999974E-6 : f32
    %77 = vector.broadcast %cst_31 : f32 to vector<1x512xf32>
    %78 = arith.addf %76, %77 : vector<1x512xf32>
    %79 = math.rsqrt %78 : vector<1x512xf32>
    %80 = arith.mulf %64, %79 : vector<1x512xf32>
    %81 = arith.mulf %69, %80 : vector<1x512xf32>
    %82 = arith.subf %65, %81 : vector<1x512xf32>
    %83 = vector.broadcast %80 : vector<1x512xf32> to vector<16x512xf32>
    %84 = arith.mulf %63, %83 : vector<16x512xf32>
    %85 = vector.broadcast %82 : vector<1x512xf32> to vector<16x512xf32>
    %86 = arith.addf %84, %85 : vector<16x512xf32>
    %cst_32 = arith.constant 2.000000e-01 : f32
    %87 = vector.broadcast %cst_32 : f32 to vector<16x512xf32>
    %88 = arith.mulf %87, %86 : vector<16x512xf32>
    %89 = arith.maximumf %86, %88 : vector<16x512xf32>
    %c0_i32_33 = arith.constant 0 : i32
    %90 = tpu.memref_slice %arg11[%c0_i32_33] : memref<2x!tpu.dma_semaphore, #tpu.memory_space<semaphore_mem>> -> memref<1x!tpu.dma_semaphore, #tpu.memory_space<semaphore_mem>>
    %91 = tpu.memref_squeeze %90 : memref<1x!tpu.dma_semaphore, #tpu.memory_space<semaphore_mem>> -> memref<!tpu.dma_semaphore, #tpu.memory_space<semaphore_mem>>
    tpu.wait_dma2 semaphore(%91 : memref<!tpu.dma_semaphore, #tpu.memory_space<semaphore_mem>>) src(%arg5 : memref<512x1024xi8, #tpu.memory_space<any>>) dst(%arg9 : memref<512x1024xi8, #tpu.memory_space<vmem>>)
    %c0_34 = arith.constant 0 : index
    %c0_35 = arith.constant 0 : index
    %92 = vector.load %arg9[%c0_34, %c0_35] : memref<512x1024xi8, #tpu.memory_space<vmem>>, vector<512x1024xi8>
    %c0_36 = arith.constant 0 : index
    %c7296 = arith.constant 7296 : index
    %93 = vector.load %arg7[%c0_36, %c7296] : memref<1x9216xf32, #tpu.memory_space<vmem>>, vector<1x1024xf32>
    %94 = arith.truncf %89 : vector<16x512xf32> to vector<16x512xbf16>
    %95 = arith.sitofp %92 : vector<512x1024xi8> to vector<512x1024xbf16>
    %cst_37 = arith.constant dense<0.000000e+00> : vector<16x1024xf32>
    %96 = tpu.matmul %94, %95, %cst_37 {dimension_numbers = #tpu.dot_dimension_numbers<[1], [0], [0], [1], [0, 0, 1, 1], [], []>} : vector<16x512xbf16>, vector<512x1024xbf16>, vector<16x1024xf32> -> vector<16x1024xf32>
    %97 = vector.broadcast %93 : vector<1x1024xf32> to vector<16x1024xf32>
    %98 = arith.mulf %96, %97 : vector<16x1024xf32>
    %c0_38 = arith.constant 0 : index
    %c2432 = arith.constant 2432 : index
    %99 = vector.load %arg7[%c0_38, %c2432] : memref<1x9216xf32, #tpu.memory_space<vmem>>, vector<1x1024xf32>
    %100 = vector.broadcast %99 : vector<1x1024xf32> to vector<16x1024xf32>
    %101 = arith.addf %98, %100 : vector<16x1024xf32>
    %c0_39 = arith.constant 0 : index
    %c3456 = arith.constant 3456 : index
    %102 = vector.load %arg7[%c0_39, %c3456] : memref<1x9216xf32, #tpu.memory_space<vmem>>, vector<1x1024xf32>
    %c0_40 = arith.constant 0 : index
    %c4480 = arith.constant 4480 : index
    %103 = vector.load %arg7[%c0_40, %c4480] : memref<1x9216xf32, #tpu.memory_space<vmem>>, vector<1x1024xf32>
    %cst_41 = arith.constant dense<0.000000e+00> : vector<1024xf32>
    %104 = vector.multi_reduction <add>, %101, %cst_41 [0] : vector<16x1024xf32> to vector<1024xf32>
    %105 = vector.shape_cast %104 : vector<1024xf32> to vector<1x1024xf32>
    %cst_42 = arith.constant 1.600000e+01 : f32
    %106 = vector.broadcast %cst_42 : f32 to vector<1x1024xf32>
    %107 = arith.divf %105, %106 : vector<1x1024xf32>
    %108 = vector.broadcast %107 : vector<1x1024xf32> to vector<16x1024xf32>
    %109 = arith.subf %101, %108 : vector<16x1024xf32>
    %110 = arith.mulf %109, %109 : vector<16x1024xf32>
    %cst_43 = arith.constant dense<0.000000e+00> : vector<1024xf32>
    %111 = vector.multi_reduction <add>, %110, %cst_43 [0] : vector<16x1024xf32> to vector<1024xf32>
    %112 = vector.shape_cast %111 : vector<1024xf32> to vector<1x1024xf32>
    %cst_44 = arith.constant 1.600000e+01 : f32
    %113 = vector.broadcast %cst_44 : f32 to vector<1x1024xf32>
    %114 = arith.divf %112, %113 : vector<1x1024xf32>
    %cst_45 = arith.constant 9.99999974E-6 : f32
    %115 = vector.broadcast %cst_45 : f32 to vector<1x1024xf32>
    %116 = arith.addf %114, %115 : vector<1x1024xf32>
    %117 = math.rsqrt %116 : vector<1x1024xf32>
    %118 = arith.mulf %102, %117 : vector<1x1024xf32>
    %119 = arith.mulf %107, %118 : vector<1x1024xf32>
    %120 = arith.subf %103, %119 : vector<1x1024xf32>
    %121 = vector.broadcast %118 : vector<1x1024xf32> to vector<16x1024xf32>
    %122 = arith.mulf %101, %121 : vector<16x1024xf32>
    %123 = vector.broadcast %120 : vector<1x1024xf32> to vector<16x1024xf32>
    %124 = arith.addf %122, %123 : vector<16x1024xf32>
    %cst_46 = arith.constant 2.000000e-01 : f32
    %125 = vector.broadcast %cst_46 : f32 to vector<16x1024xf32>
    %126 = arith.mulf %125, %124 : vector<16x1024xf32>
    %127 = arith.maximumf %124, %126 : vector<16x1024xf32>
    %c1_i32_47 = arith.constant 1 : i32
    %128 = tpu.memref_slice %arg11[%c1_i32_47] : memref<2x!tpu.dma_semaphore, #tpu.memory_space<semaphore_mem>> -> memref<1x!tpu.dma_semaphore, #tpu.memory_space<semaphore_mem>>
    %129 = tpu.memref_squeeze %128 : memref<1x!tpu.dma_semaphore, #tpu.memory_space<semaphore_mem>> -> memref<!tpu.dma_semaphore, #tpu.memory_space<semaphore_mem>>
    tpu.wait_dma2 semaphore(%129 : memref<!tpu.dma_semaphore, #tpu.memory_space<semaphore_mem>>) src(%arg6 : memref<1024x896xi8, #tpu.memory_space<any>>) dst(%arg10 : memref<1024x896xi8, #tpu.memory_space<vmem>>)
    %c0_48 = arith.constant 0 : index
    %c0_49 = arith.constant 0 : index
    %130 = vector.load %arg10[%c0_48, %c0_49] : memref<1024x896xi8, #tpu.memory_space<vmem>>, vector<1024x896xi8>
    %c0_50 = arith.constant 0 : index
    %c8320 = arith.constant 8320 : index
    %131 = vector.load %arg7[%c0_50, %c8320] : memref<1x9216xf32, #tpu.memory_space<vmem>>, vector<1x896xf32>
    %132 = arith.truncf %127 : vector<16x1024xf32> to vector<16x1024xbf16>
    %133 = arith.sitofp %130 : vector<1024x896xi8> to vector<1024x896xbf16>
    %cst_51 = arith.constant dense<0.000000e+00> : vector<16x896xf32>
    %134 = tpu.matmul %132, %133, %cst_51 {dimension_numbers = #tpu.dot_dimension_numbers<[1], [0], [0], [1], [0, 0, 1, 1], [], []>} : vector<16x1024xbf16>, vector<1024x896xbf16>, vector<16x896xf32> -> vector<16x896xf32>
    %135 = vector.broadcast %131 : vector<1x896xf32> to vector<16x896xf32>
    %136 = arith.mulf %134, %135 : vector<16x896xf32>
    %c0_52 = arith.constant 0 : index
    %c5504 = arith.constant 5504 : index
    %137 = vector.load %arg7[%c0_52, %c5504] : memref<1x9216xf32, #tpu.memory_space<vmem>>, vector<1x896xf32>
    %138 = vector.broadcast %137 : vector<1x896xf32> to vector<16x896xf32>
    %139 = arith.addf %136, %138 : vector<16x896xf32>
    %140 = math.tanh %139 : vector<16x896xf32>
    %c0_53 = arith.constant 0 : index
    %c0_54 = arith.constant 0 : index
    %141 = vector.load %arg8[%c0_53, %c0_54] : memref<16x896xf32, #tpu.memory_space<vmem>>, vector<16x896xf32>
    tpu.vector_store %arg8[%c0_53, %c0_54], %140 {strides = array<i32>} : memref<16x896xf32, #tpu.memory_space<vmem>>, vector<16x896xf32>,
    return
  }
  func.func @transform_0(%arg0: i32) -> (i32, i32) {
    %c0_i32 = arith.constant 0 : i32
    %c0_i32_0 = arith.constant 0 : i32
    %c0_i32_1 = arith.constant 0 : i32
    return %c0_i32, %c0_i32_0 : i32, i32
  }
  func.func @transform_1(%arg0: i32) -> (i32, i32) {
    %c0_i32 = arith.constant 0 : i32
    %c0_i32_0 = arith.constant 0 : i32
    %c0_i32_1 = arith.constant 0 : i32
    return %c0_i32, %c0_i32_0 : i32, i32
  }
  func.func @transform_2(%arg0: i32) -> (i32, i32) {
    %c0_i32 = arith.constant 0 : i32
    %c0_i32_0 = arith.constant 0 : i32
    %c0_i32_1 = arith.constant 0 : i32
    return %c0_i32, %c0_i32_0 : i32, i32
  }
  func.func @transform_3(%arg0: i32) -> (i32, i32) {
    %c0_i32 = arith.constant 0 : i32
    %c0_i32_0 = arith.constant 0 : i32
    %c0_i32_1 = arith.constant 0 : i32
    return %c0_i32, %c0_i32_0 : i32, i32
  }
  func.func @transform_6(%arg0: i32) -> (i32, i32) {
    %c0_i32 = arith.constant 0 : i32
    %c0_i32_0 = arith.constant 0 : i32
    %c0_i32_1 = arith.constant 0 : i32
    return %c0_i32, %c0_i32_0 : i32, i32
  }
  func.func @transform_7(%arg0: i32) -> (i32, i32) {
    %c0_i32 = arith.constant 0 : i32
    %c0_i32_0 = arith.constant 0 : i32
    %c0_i32_1 = arith.constant 0 : i32
    return %c0_i32, %c0_i32_0 : i32, i32
  }
}

</mosaic_0001>

<bundles_post_ra>
// kernel: tpu_custom_call.1
= control target key start
LH: loop header
LB: loop body
LE: loop exit
PB: predicated region body
PF: predicated region fallthrough
CT: control target
= control target key end

     0   :  { %12 = vsyncpa [#allocation6], 0  ;;  %s4960_s0 = inlined_call_operand.hbm [shape: f32[16,128], index: 0, kind: input, shape index: {}]   ;;  %s4961_s1 = inlined_call_operand.hbm [shape: s8[128,128], index: 1, kind: input, shape index: {}]   ;;  %s4962_s2 = inlined_call_operand.hbm [shape: s8[128,256], index: 2, kind: input, shape index: {}]   ;;  %s4963_s3 = inlined_call_operand.hbm [shape: s8[256,512], index: 3, kind: input, shape index: {}]   ;;  %s4964_s4 = inlined_call_operand.hbm [shape: s8[512,1024], index: 4, kind: input, shape index: {}]   ;;  %s4965_s5 = inlined_call_operand.hbm [shape: s8[1024,896], index: 5, kind: input, shape index: {}]   ;;  %s4966_s6 = inlined_call_operand.hbm [shape: f32[1,9216], index: 6, kind: input, shape index: {}]   ;;  %s4967_s7 = inlined_call_operand.hbm [shape: f32[16,896], index: 7, kind: output, shape index: {}]  }
   0x1   :  { %13 = vsyncpa [#allocation9], 0 }
   0x2   :  { %14 = vsyncpa [#allocation12], 0 }
   0x3   :  { %15 = vsyncpa [#allocation7], 0  ;;  %s4153_s24 = smov [#allocation8]   ;;  %s4154_s26 = smov [#allocation11]  }
   0x4   :  { %s33_s25 = sshll.u32 %s4153_s24, 4  ;;  %s57_s27 = sshll.u32 %s4154_s26, 4  ;;  %s34_s25 = int_to_ptr.vmem [resolvable:$true] %s33_s25  ;;  %s4213_s27 = int_to_ptr.vmem [resolvable:$true] %s57_s27 }
   0x5   :  { %s3965_s30 = scalar_lea.hbm %s4961_s1, 512 }
   0x6   :  { %p3966_p0 = scmp.ne.s32.totalorder %s4961_s1, %s3965_s30  ;;  %p3969_p1 = scmp.lt.u32.totalorder %s3965_s30, %s4961_s1 }
   0x8   :  { %p3971_p2 = pnand %p3969_p1, %p3966_p0 }
   0xa   :  { %3974 = shalt.err (!%p3971_p2)
}
   0xb   :  { %s3975_s12 = scalar_lea.vmem %s34_s25, 512  ;;  %p3980_p4 = scmp.lt.s32.totalorder %s34_s25, %s34_s25 }
   0xc   :  { %p3976_p3 = scmp.ne.s32.totalorder %s34_s25, %s3975_s12  ;;  %p3981_p5 = scmp.lt.s32.totalorder %s3975_s12, %s3975_s12 }
   0xe   :  { %p3982_p6 = por %p3981_p5, %p3980_p4 }
  0x10   :  { %p3983_p7 = pnand %p3982_p6, %p3976_p3 }
  0x12   :  { %3986 = shalt.err (!%p3983_p7)
}
  0x13   :  { %s4155_s13 = smov 128   ;;  %s4156_s14 = smov 8  }
  0x14   :  { %39 = dma.hbm_to_vmem [thread:$0]  %s4961_s1, 512, %s34_s25, [#allocation9], %s4155_s13, %s4155_s13, %s4156_s14  }
  0x15   :  { %s3987_s19 = scalar_lea.hbm %s4963_s3, 4096 }
  0x16   :  { %p3988_p8 = scmp.ne.s32.totalorder %s4963_s3, %s3987_s19  ;;  %p3991_p9 = scmp.lt.u32.totalorder %s3987_s19, %s4963_s3 }
  0x18   :  { %p3993_p10 = pnand %p3991_p9, %p3988_p8 }
  0x1a   :  { %3996 = shalt.err (!%p3993_p10)
}
  0x1b   :  { %s3997_s24 = scalar_lea.vmem %s4213_s27, 4096  ;;  %p4002_p12 = scmp.lt.s32.totalorder %s4213_s27, %s4213_s27 }
  0x1c   :  { %p3998_p11 = scmp.ne.s32.totalorder %s4213_s27, %s3997_s24  ;;  %p4003_p13 = scmp.lt.s32.totalorder %s3997_s24, %s3997_s24 }
  0x1e   :  { %p4004_p0 = por %p4003_p13, %p4002_p12 }
  0x20   :  { %p4005_p1 = pnand %p4004_p0, %p3998_p11 }
  0x22   :  { %4008 = shalt.err (!%p4005_p1)
}
  0x23   :  { %s4157_s1 = smov 512   ;;  %s4158_s25 = smov 32  }
  0x24   :  { %63 = dma.hbm_to_vmem [thread:$0]  %s4963_s3, 4096, %s4213_s27, [#allocation12], %s4157_s1, %s4157_s1, %s4158_s25  }
  0x25   :  { %s4159_s29 = smov [#allocation5]   ;;  %s4160_s8 = smov [#allocation10]  }
  0x26   :  { %s21_s30 = sshll.u32 %s4159_s29, 4  ;;  %s45_s9 = sshll.u32 %s4160_s8, 4  ;;  %s22_s30 = int_to_ptr.vmem [resolvable:$true] %s21_s30  ;;  %s4247_s9 = int_to_ptr.vmem [resolvable:$true] %s45_s9 }
  0x27   :  { %s4009_s12 = scalar_lea.hbm %s4960_s0, 256 }
  0x28   :  { %p4010_p2 = scmp.ne.s32.totalorder %s4960_s0, %s4009_s12  ;;  %p4013_p3 = scmp.lt.u32.totalorder %s4009_s12, %s4960_s0 }
  0x2a   :  { %p4015_p4 = pnand %p4013_p3, %p4010_p2 }
  0x2c   :  { %4018 = shalt.err (!%p4015_p4)
}
  0x2d   :  { %s4019_s3 = scalar_lea.vmem %s22_s30, 256  ;;  %p4024_p6 = scmp.lt.s32.totalorder %s22_s30, %s22_s30 }
  0x2e   :  { %p4020_p5 = scmp.ne.s32.totalorder %s22_s30, %s4019_s3  ;;  %p4025_p7 = scmp.lt.s32.totalorder %s4019_s3, %s4019_s3 }
  0x30   :  { %p4026_p8 = por %p4025_p7, %p4024_p6 }
  0x32   :  { %p4027_p9 = pnand %p4026_p8, %p4020_p5 }
  0x34   :  { %4030 = shalt.err (!%p4027_p9)
}
  0x35   :  { %27 = dma.hbm_to_vmem [thread:$0]  %s4960_s0, 256, %s22_s30, [#allocation6], %s4155_s13, %s4155_s13, %s4156_s14  }
  0x36   :  { %s4031_s22 = scalar_lea.hbm %s4962_s2, 1024 }
  0x37   :  { %p4032_p10 = scmp.ne.s32.totalorder %s4962_s2, %s4031_s22  ;;  %p4035_p11 = scmp.lt.u32.totalorder %s4031_s22, %s4962_s2 }
  0x39   :  { %p4037_p12 = pnand %p4035_p11, %p4032_p10 }
  0x3b   :  { %4040 = shalt.err (!%p4037_p12)
}
  0x3c   :  { %s4041_s26 = scalar_lea.vmem %s4247_s9, 1024  ;;  %p4046_p0 = scmp.lt.s32.totalorder %s4247_s9, %s4247_s9 }
  0x3d   :  { %p4042_p13 = scmp.ne.s32.totalorder %s4247_s9, %s4041_s26  ;;  %p4047_p1 = scmp.lt.s32.totalorder %s4041_s26, %s4041_s26 }
  0x3f   :  { %p4048_p2 = por %p4047_p1, %p4046_p0 }
  0x41   :  { %p4049_p3 = pnand %p4048_p2, %p4042_p13 }
  0x43   :  { %4052 = shalt.err (!%p4049_p3)
}
  0x44   :  { %s4161_s0 = smov 256   ;;  %s4162_s13 = smov 16  }
  0x45   :  { %51 = dma.hbm_to_vmem [thread:$0]  %s4962_s2, 1024, %s4247_s9, [#allocation9], %s4161_s0, %s4161_s0, %s4162_s13  }
  0x46   :  { %s4163_s29 = smov [#allocation13]   ;;  %s4053_s11 = scalar_lea.hbm %s4966_s6, 1152 }
  0x47   :  { %s70_s30 = sshll.u32 %s4163_s29, 4  ;;  %p4054_p4 = scmp.ne.s32.totalorder %s4966_s6, %s4053_s11  ;;  %s71_s30 = int_to_ptr.vmem [resolvable:$true] %s70_s30 }
  0x48   :  { %p4057_p5 = scmp.lt.u32.totalorder %s4053_s11, %s4966_s6 }
  0x4a   :  { %p4059_p6 = pnand %p4057_p5, %p4054_p4 }
  0x4c   :  { %4062 = shalt.err (!%p4059_p6)
}
  0x4d   :  { %s4063_s18 = scalar_lea.vmem %s71_s30, 1152  ;;  %p4068_p8 = scmp.lt.s32.totalorder %s71_s30, %s71_s30 }
  0x4e   :  { %p4064_p7 = scmp.ne.s32.totalorder %s71_s30, %s4063_s18  ;;  %p4069_p9 = scmp.lt.s32.totalorder %s4063_s18, %s4063_s18 }
  0x50   :  { %p4070_p10 = por %p4069_p9, %p4068_p8 }
  0x52   :  { %p4071_p11 = pnand %p4070_p10, %p4064_p7 }
  0x54   :  { %4074 = shalt.err (!%p4071_p11)
}
  0x55   :  { %73 = dma.hbm_to_vmem [thread:$0]  %s4966_s6, 1152, %s71_s30, [#allocation12]  }
  0x56   :  { %4141 = dma.done.wait [#allocation6], 256  }
  0x57   :  { %4142 = vsyncadd [#allocation6], 4294967040 }
  0x58   :  { %4143 = dma.done.wait [#allocation9], 1536  }
  0x59   :  { %4144 = vsyncadd [#allocation9], 4294965760 }
  0x5a   :  { %4145 = dma.done.wait [#allocation12], 5248  }
  0x5b   :  { %4146 = vsyncadd [#allocation12], 4294962048  ;;  %v4164_v0 = vmov 0.0   ;;  %vm4165_vm0 = vmmov 0   ;;  %v115_v1 = vld [vmem:[#allocation8] sm:$0xff]  ;;  %v192_v3 = vld [vmem:[#allocation10 + $0x8] sm:$0xff] }
  0x5c   :  { %3817 = vmatprep.subr.bf16.mxu0 %v4164_v0  ;;  %3833 = vmatprep.mubr.msk.bf16.mxu0 %vm4165_vm0, %v4164_v0  ;;  %v121_v2 = vunpack.c.l.s8.bf16 %v115_v1  ;;  %v191_v4 = vld [vmem:[#allocation10] sm:$0xff]  ;;  %v122_v5 = vunpack.c.h.s8.bf16 %v115_v1  ;;  %v202_v6 = vunpack.c.l.s8.bf16 %v192_v3  ;;  %v204_v7 = vunpack.c.h.s8.bf16 %v192_v3  ;;  %v116_v9 = vld [vmem:[#allocation8 + $0x8] sm:$0xff]  ;;  %v194_v10 = vld [vmem:[#allocation10 + $0x18] sm:$0xff]  ;;  %s4168_s6 = smov [#allocation2]   ;;  %s4169_s27 = smov [#allocation3]  }
  0x5d   :  { %v201_v8 = vunpack.c.l.s8.bf16 %v191_v4  ;;  %v203_v11 = vunpack.c.h.s8.bf16 %v191_v4  ;;  %v123_v12 = vunpack.c.l.s8.bf16 %v116_v9  ;;  %v206_v13 = vunpack.c.l.s8.bf16 %v194_v10  ;;  %v193_v14 = vld [vmem:[#allocation10 + $0x10] sm:$0xff]  ;;  %v196_v19 = vld [vmem:[#allocation10 + $0x28] sm:$0xff]  ;;  %v195_v23 = vld [vmem:[#allocation10 + $0x20] sm:$0xff]  ;;  %s97_s3 = sshll.u32 %s4168_s6, 4  ;;  %s109_s19 = sshll.u32 %s4169_s27, 4  ;;  %s98_s3 = int_to_ptr.vmem [resolvable:$true] %s97_s3  ;;  %s110_s19 = int_to_ptr.vmem [resolvable:$true] %s109_s19 }
  0x5e   :  { %3818 = vmatpush3.bf16.msra.mxu0 %v121_v2  ;;  %217 = vmatprep.subr.bf16.mxu1 %v202_v6  ;;  %v205_v15 = vunpack.c.l.s8.bf16 %v193_v14  ;;  %v124_v16 = vunpack.c.h.s8.bf16 %v116_v9  ;;  %v208_v17 = vunpack.c.h.s8.bf16 %v194_v10  ;;  %v117_v18 = vld [vmem:[#allocation8 + $0x10] sm:$0xff]  ;;  %v207_v20 = vunpack.c.h.s8.bf16 %v193_v14  ;;  %v118_v26 = vld [vmem:[#allocation8 + $0x18] sm:$0xff]  ;;  %v3717_v43 = vld [vmem:[#allocation13] ss:$0 sm:$0xff]  ;;  %s4075_s22 = scalar_lea.hbm %s4964_s4, 16384 }
  0x5f   :  { %3819 = vmatprep.subr.bf16.mxu0 %v4164_v0  ;;  %218 = vmatpush1.bf16.msra.mxu1 %v201_v8  ;;  %v125_v21 = vunpack.c.l.s8.bf16 %v117_v18  ;;  %v210_v22 = vunpack.c.l.s8.bf16 %v196_v19  ;;  %v209_v24 = vunpack.c.l.s8.bf16 %v195_v23  ;;  %v126_v25 = vunpack.c.h.s8.bf16 %v117_v18  ;;  %v113_v29 = vld [vmem:[#allocation5] sm:$0xff]  ;;  %v114_v30 = vld [vmem:[#allocation5 + $0x8] sm:$0xff]  ;;  %v417_v56 = vld [vmem:[#allocation11 + $0x8] sm:$0xff]  ;;  %p4076_p12 = scmp.ne.s32.totalorder %s4964_s4, %s4075_s22  ;;  %p4079_p13 = scmp.lt.u32.totalorder %s4075_s22, %s4964_s4 }
  0x60   :  { %219 = vmatprep.subr.bf16.mxu1 %v204_v7  ;;  %v127_v27 = vunpack.c.l.s8.bf16 %v118_v26  ;;  %v128_v28 = vunpack.c.h.s8.bf16 %v118_v26  ;;  %v120_v31 = vpack.c.bf16 %v114_v30, %v113_v29  ;;  %v212_v32 = vunpack.c.h.s8.bf16 %v196_v19  ;;  %v198_v34 = vld [vmem:[#allocation10 + $0x38] sm:$0xff]  ;;  %v197_v36 = vld [vmem:[#allocation10 + $0x30] sm:$0xff]  ;;  %v416_v58 = vld [vmem:[#allocation11] sm:$0xff] }
  0x61   :  { %v211_v33 = vunpack.c.h.s8.bf16 %v195_v23  ;;  %v214_v35 = vunpack.c.l.s8.bf16 %v198_v34  ;;  %v213_v37 = vunpack.c.l.s8.bf16 %v197_v36  ;;  %v216_v38 = vunpack.c.h.s8.bf16 %v198_v34  ;;  %v3716_v41 = vld [vmem:[#allocation13 + $0x32] ss:$0 sm:$0xff]  ;;  %v421_v62 = vld [vmem:[#allocation11 + $0x28] sm:$0xff]  ;;  %v424_v6 = vld [vmem:[#allocation11 + $0x40] sm:$0xff]  ;;  %p4081_p0 = pnand %p4079_p13, %p4076_p12 }
  0x62   :  { %3820 = vmatpush3.bf16.msra.mxu0 %v122_v5  ;;  %v215_v39 = vunpack.c.h.s8.bf16 %v197_v36  ;;  %v4166_v40 = vmov 0   ;;  %v452_v57 = vunpack.c.l.s8.bf16 %v417_v56  ;;  %v451_v59 = vunpack.c.l.s8.bf16 %v416_v58  ;;  %v425_v4 = vld [vmem:[#allocation11 + $0x48] sm:$0xff]  ;;  %v432_v18 = vld [vmem:[#allocation11 + $0x80] sm:$0xff] }
  0x63   :  { %3821 = vmatprep.subr.bf16.mxu0 %v4164_v0  ;;  %220 = vmatpush1.bf16.msra.mxu1 %v203_v11  ;;  %v456_v60 = vunpack.c.h.s8.bf16 %v417_v56  ;;  %v455_v61 = vunpack.c.h.s8.bf16 %v416_v58  ;;  %v460_v63 = vunpack.c.l.s8.bf16 %v421_v62  ;;  %v464_v2 = vunpack.c.h.s8.bf16 %v421_v62  ;;  %v429_v10 = vld [vmem:[#allocation11 + $0x68] sm:$0xff]  ;;  %v440_v29 = vld [vmem:[#allocation11 + $0xc0] sm:$0xff] }
  0x64   :  { %221 = vmatprep.subr.bf16.mxu1 %v206_v13  ;;  %249 = vmatprep.mubr.bf16.mxu1 %v4166_v40  ;;  %v468_v5 = vunpack.c.l.s8.bf16 %v425_v4  ;;  %v467_v7 = vunpack.c.l.s8.bf16 %v424_v6  ;;  %v472_v8 = vunpack.c.h.s8.bf16 %v425_v4  ;;  %v471_v9 = vunpack.c.h.s8.bf16 %v424_v6  ;;  %v444_v36 = vld [vmem:[#allocation11 + $0xe0] sm:$0xff]  ;;  %v4293_v40 = vld [vmem:[#allocation11 + $0x18] sm:$0xff] }
  0x65   :  { %v476_v11 = vunpack.c.l.s8.bf16 %v429_v10  ;;  %v480_v14 = vunpack.c.h.s8.bf16 %v429_v10  ;;  %v483_v19 = vunpack.c.l.s8.bf16 %v432_v18  ;;  %v503_v34 = vunpack.c.h.s8.bf16 %v440_v29 }
  0x66   :  { %3822 = vmatpush3.bf16.msra.mxu0 %v123_v12  ;;  %v428_v12 = vld [vmem:[#allocation11 + $0x60] sm:$0xff] }
  0x67   :  { %3823 = vmatprep.subr.bf16.mxu0 %v4164_v0  ;;  %222 = vmatpush1.bf16.msra.mxu1 %v205_v15  ;;  %v475_v13 = vunpack.c.l.s8.bf16 %v428_v12  ;;  %v479_v15 = vunpack.c.h.s8.bf16 %v428_v12 }
  0x68   :  { %223 = vmatprep.subr.bf16.mxu1 %v208_v17 }
  0x6a   :  { %3824 = vmatpush3.bf16.msra.mxu0 %v124_v16  ;;  %v433_v16 = vld [vmem:[#allocation11 + $0x88] sm:$0xff] }
  0x6b   :  { %3825 = vmatprep.subr.bf16.mxu0 %v4164_v0  ;;  %224 = vmatpush1.bf16.msra.mxu1 %v207_v20  ;;  %v484_v17 = vunpack.c.l.s8.bf16 %v433_v16  ;;  %v488_v20 = vunpack.c.h.s8.bf16 %v433_v16 }
  0x6c   :  { %225 = vmatprep.subr.bf16.mxu1 %v210_v22  ;;  %v437_v22 = vld [vmem:[#allocation11 + $0xa8] sm:$0xff] }
  0x6d   :  { %v492_v23 = vunpack.c.l.s8.bf16 %v437_v22  ;;  %v496_v26 = vunpack.c.h.s8.bf16 %v437_v22 }
  0x6e   :  { %3826 = vmatpush3.bf16.msra.mxu0 %v125_v21  ;;  %v487_v21 = vunpack.c.h.s8.bf16 %v432_v18 }
  0x6f   :  { %3827 = vmatprep.subr.bf16.mxu0 %v4164_v0  ;;  %226 = vmatpush1.bf16.msra.mxu1 %v209_v24  ;;  %v436_v24 = vld [vmem:[#allocation11 + $0xa0] sm:$0xff] }
  0x70   :  { %227 = vmatprep.subr.bf16.mxu1 %v212_v32 }
  0x72   :  { %3828 = vmatpush3.bf16.msra.mxu0 %v126_v25  ;;  %v491_v25 = vunpack.c.l.s8.bf16 %v436_v24 }
  0x73   :  { %3829 = vmatprep.subr.bf16.mxu0 %v4164_v0  ;;  %228 = vmatpush1.bf16.msra.mxu1 %v211_v33  ;;  %v445_v33 = vld [vmem:[#allocation11 + $0xe8] sm:$0xff] }
  0x74   :  { %229 = vmatprep.subr.bf16.mxu1 %v214_v35  ;;  %v508_v35 = vunpack.c.l.s8.bf16 %v445_v33 }
  0x76   :  { %3830 = vmatpush3.bf16.msra.mxu0 %v127_v27  ;;  %v495_v27 = vunpack.c.h.s8.bf16 %v436_v24 }
  0x77   :  { %3831 = vmatprep.subr.bf16.mxu0 %v4164_v0  ;;  %230 = vmatpush1.bf16.msra.mxu1 %v213_v37  ;;  %v420_v0 = vld [vmem:[#allocation11 + $0x20] sm:$0xff]  ;;  %v507_v37 = vunpack.c.l.s8.bf16 %v444_v36 }
  0x78   :  { %231 = vmatprep.subr.bf16.mxu1 %v216_v38  ;;  %v459_v1 = vunpack.c.l.s8.bf16 %v420_v0  ;;  %v463_v3 = vunpack.c.h.s8.bf16 %v420_v0  ;;  %v512_v38 = vunpack.c.h.s8.bf16 %v445_v33 }
  0x7a   :  { %3832 = vmatpush3.bf16.msra.mxu0 %v128_v28  ;;  %v441_v28 = vld [vmem:[#allocation11 + $0xc8] sm:$0xff] }
  0x7b   :  { %232 = vmatpush1.bf16.msra.mxu1 %v215_v39  ;;  %v500_v30 = vunpack.c.l.s8.bf16 %v441_v28  ;;  %v504_v32 = vunpack.c.h.s8.bf16 %v441_v28  ;;  %v511_v39 = vunpack.c.h.s8.bf16 %v444_v36 }
  0x7c   :  { %515 = vmatprep.subr.bf16.mxu1 %v452_v57 }
  0x7d   :  { %3834 = vmatmul.mubr.bf16.vlgmr.msra.gmra.mrb[0].mxu0 %v120_v31  ;;  %v499_v31 = vunpack.c.l.s8.bf16 %v440_v29 }
 0x150   :  { %v163_v42 = vpop.f32.mrb[0].mxu0 }
 0x151   :  { %v176_v44 = vmul.f32 %v3716_v41, %v163_v42  ;;  %v3835_v45 = vpop.f32.mrb[1].mxu0  ;;  %v261_v42 = vlaneseq }
 0x152   :  { %v166_v46 = vpop.f32.mrb[2].mxu0  ;;  %v199_v45 = vld [vmem:[#allocation13 + $0x33] sm:$0x3] }
 0x153   :  { %v185_v47 = vadd.f32 %v3717_v43, %v176_v44  ;;  %v177_v48 = vmul.f32 %v3716_v41, %v166_v46  ;;  %v3836_v49 = vpop.f32.mrb[3].mxu0  ;;  %v454_v41 = vunpack.c.l.s8.bf16 %v4293_v40 }
 0x155   :  { %v187_v50 = vmul.f32 0.2, %v185_v47  ;;  %v186_v51 = vadd.f32 %v3717_v43, %v177_v48  ;;  %v4296_v43 = vshrl.u32 %v261_v42, 7  ;;  %v275_v48 = vld [vmem:[#allocation13 + $0x1] sm:$0x3] }
 0x157   :  { %v188_v52 = vmul.f32 0.2, %v186_v51  ;;  %v189_v53 = vmax.f32 %v185_v47, %v187_v50  ;;  %v4299_v44 = vsub.s32 0, %v4296_v43  ;;  %v4302_v46 = vsub.s32 1, %v4296_v43 }
 0x159   :  { %v190_v54 = vmax.f32 %v186_v51, %v188_v52  ;;  %v264_v47 = vrot.slane %v199_v45, %v4299_v44  ;;  %v268_v49 = vrot.slane %v199_v45, %v4302_v46  ;;  %v280_v52 = vrot.slane %v275_v48, %v4299_v44 }
 0x15a   :  { %v4167_v45 = vmov 1966171168  }
 0x15b   :  { %v200_v55 = vpack.c.bf16 %v190_v54, %v189_v53 }
 0x15d   :  { %250 = vmatmul.mubr.bf16.vlgmr.msra.gmra.mrb[0].mxu1 %v200_v55  ;;  %v284_v55 = vrot.slane %v275_v48, %v4302_v46 }
 0x15e   :  { %516 = vmatpush1.bf16.msra.mxu1 %v451_v59 }
 0x15f   :  { %517 = vmatprep.subr.bf16.mxu1 %v456_v60 }
 0x162   :  { %518 = vmatpush1.bf16.msra.mxu1 %v455_v61 }
 0x163   :  { %519 = vmatprep.subr.bf16.mxu1 %v460_v63 }
 0x166   :  { %520 = vmatpush1.bf16.msra.mxu1 %v459_v1 }
 0x167   :  { %521 = vmatprep.subr.bf16.mxu1 %v464_v2 }
 0x16a   :  { %522 = vmatpush1.bf16.msra.mxu1 %v463_v3 }
 0x16b   :  { %523 = vmatprep.subr.bf16.mxu1 %v468_v5 }
 0x16e   :  { %524 = vmatpush1.bf16.msra.mxu1 %v467_v7 }
 0x16f   :  { %525 = vmatprep.subr.bf16.mxu1 %v472_v8 }
 0x172   :  { %526 = vmatpush1.bf16.msra.mxu1 %v471_v9 }
 0x173   :  { %527 = vmatprep.subr.bf16.mxu1 %v476_v11 }
 0x176   :  { %528 = vmatpush1.bf16.msra.mxu1 %v475_v13 }
 0x177   :  { %529 = vmatprep.subr.bf16.mxu1 %v480_v14 }
 0x17a   :  { %530 = vmatpush1.bf16.msra.mxu1 %v479_v15 }
 0x17b   :  { %531 = vmatprep.subr.bf16.mxu1 %v484_v17 }
 0x17e   :  { %532 = vmatpush1.bf16.msra.mxu1 %v483_v19 }
 0x17f   :  { %533 = vmatprep.subr.bf16.mxu1 %v488_v20 }
 0x182   :  { %534 = vmatpush1.bf16.msra.mxu1 %v487_v21 }
 0x183   :  { %535 = vmatprep.subr.bf16.mxu1 %v492_v23 }
 0x186   :  { %536 = vmatpush1.bf16.msra.mxu1 %v491_v25 }
 0x187   :  { %537 = vmatprep.subr.bf16.mxu1 %v496_v26 }
 0x18a   :  { %538 = vmatpush1.bf16.msra.mxu1 %v495_v27 }
 0x18b   :  { %539 = vmatprep.subr.bf16.mxu1 %v500_v30 }
 0x18e   :  { %540 = vmatpush1.bf16.msra.mxu1 %v499_v31 }
 0x18f   :  { %541 = vmatprep.subr.bf16.mxu1 %v504_v32 }
 0x192   :  { %542 = vmatpush1.bf16.msra.mxu1 %v503_v34 }
 0x193   :  { %543 = vmatprep.subr.bf16.mxu1 %v508_v35 }
 0x196   :  { %544 = vmatpush1.bf16.msra.mxu1 %v507_v37 }
 0x197   :  { %545 = vmatprep.subr.bf16.mxu1 %v512_v38 }
 0x19a   :  { %546 = vmatpush1.bf16.msra.mxu1 %v511_v39 }
 0x19b   :  { %558 = vmatprep.subr.bf16.mxu1 %v454_v41 }
 0x230   :  { %v251_v50 = vpop.f32.mrb[0].mxu1 }
 0x231   :  { %v271_v51 = vmul.f32 %v264_v47, %v251_v50  ;;  %v253_v53 = vpop.f32.mrb[1].mxu1 }
 0x232   :  { %v272_v54 = vmul.f32 %v268_v49, %v253_v53  ;;  %v255_v56 = vpop.f32.mrb[2].mxu1 }
 0x233   :  { %v273_v57 = vmul.f32 %v264_v47, %v255_v56  ;;  %v257_v58 = vpop.f32.mrb[3].mxu1  ;;  %v4308_v60 = vadd.f32 %v280_v52, %v271_v51  ;;  %v342_v47 = vunpack.c.l.s4 %v4167_v45  ;;  %v435_v45 = vld [vmem:[#allocation11 + $0x98] sm:$0xff] }
 0x234   :  { %v274_v59 = vmul.f32 %v268_v49, %v257_v58  ;;  %v288_v62 = vadd.f32 %v284_v55, %v272_v54  ;;  %v291_v54 = vld [vmem:[#allocation13 + $0x3] sm:$0x3] }
 0x235   :  { %v4310_v61 = vadd.f32 %v280_v52, %v273_v57  ;;  %v343_v48 = vunpack.c.0.s8 %v342_v47 }
 0x236   :  { %v290_v63 = vadd.f32 %v284_v55, %v274_v59 }
 0x237   :  { %v293_v0 = vadd.f32 %v4310_v61, %v4308_v60  ;;  %v4317_v50 = vsub.s32 %v343_v48, %v4296_v43  ;;  %v486_v48 = vunpack.c.l.s8.bf16 %v435_v45 }
 0x238   :  { %v300_v1 = vadd.f32 %v290_v63, %v288_v62 }
 0x239   :  { %v294_v2 = vrot.slane %v293_v0, 4 }
 0x23a   :  { %v301_v3 = vrot.slane %v300_v1, 4 }
 0x23b   :  { %v295_v4 = vadd.f32 %v294_v2, %v293_v0 }
 0x23c   :  { %v302_v5 = vadd.f32 %v301_v3, %v300_v1 }
 0x23d   :  { %v296_v6 = vrot.slane %v295_v4, 2 }
 0x23e   :  { %v303_v7 = vrot.slane %v302_v5, 2 }
 0x23f   :  { %v297_v8 = vadd.f32 %v296_v6, %v295_v4 }
 0x240   :  { %v304_v9 = vadd.f32 %v303_v7, %v302_v5  ;;  %v292_v7 = vld [vmem:[#allocation13 + $0x5] sm:$0x3] }
 0x241   :  { %v298_v10 = vrot.slane %v297_v8, 1 }
 0x242   :  { %v305_v11 = vrot.slane %v304_v9, 1 }
 0x243   :  { %v299_v12 = vadd.f32 %v298_v10, %v297_v8 }
 0x244   :  { %v306_v13 = vadd.f32 %v305_v11, %v304_v9 }
 0x245   :  { %v308_v14 = vmul.f32 0.0625, %v299_v12 }
 0x246   :  { %v309_v15 = vmul.f32 0.0625, %v306_v13 }
 0x247   :  { %v310_v16 = vsub.f32 %v4308_v60, %v308_v14  ;;  %v312_v17 = vsub.f32 %v4310_v61, %v308_v14 }
 0x248   :  { %v311_v18 = vsub.f32 %v288_v62, %v309_v15  ;;  %v313_v19 = vsub.f32 %v290_v63, %v309_v15 }
 0x249   :  { %v314_v20 = vmul.f32 %v310_v16, %v310_v16  ;;  %v316_v21 = vmul.f32 %v312_v17, %v312_v17 }
 0x24a   :  { %v315_v22 = vmul.f32 %v311_v18, %v311_v18  ;;  %v317_v23 = vmul.f32 %v313_v19, %v313_v19 }
 0x24b   :  { %v318_v24 = vadd.f32 %v316_v21, %v314_v20 }
 0x24c   :  { %v325_v25 = vadd.f32 %v317_v23, %v315_v22 }
 0x24d   :  { %v319_v26 = vrot.slane %v318_v24, 4 }
 0x24e   :  { %v326_v27 = vrot.slane %v325_v25, 4 }
 0x24f   :  { %v320_v28 = vadd.f32 %v319_v26, %v318_v24  ;;  %v458_v24 = vunpack.c.h.s8.bf16 %v4293_v40  ;;  %v426_v40 = vld [vmem:[#allocation11 + $0x50] sm:$0xff] }
 0x250   :  { %v327_v29 = vadd.f32 %v326_v27, %v325_v25  ;;  %v423_v25 = vld [vmem:[#allocation11 + $0x38] sm:$0xff] }
 0x251   :  { %v321_v30 = vrot.slane %v320_v28, 2  ;;  %v462_v27 = vunpack.c.l.s8.bf16 %v423_v25 }
 0x252   :  { %v328_v31 = vrot.slane %v327_v29, 2 }
 0x253   :  { %v322_v32 = vadd.f32 %v321_v30, %v320_v28  ;;  %v422_v28 = vld [vmem:[#allocation11 + $0x30] sm:$0xff]  ;;  %v466_v30 = vunpack.c.h.s8.bf16 %v423_v25 }
 0x254   :  { %v329_v33 = vadd.f32 %v328_v31, %v327_v29  ;;  %v461_v29 = vunpack.c.l.s8.bf16 %v422_v28  ;;  %v427_v31 = vld [vmem:[#allocation11 + $0x58] sm:$0xff] }
 0x255   :  { %v323_v34 = vrot.slane %v322_v32, 1 }
 0x256   :  { %v330_v35 = vrot.slane %v329_v33, 1 }
 0x257   :  { %v324_v36 = vadd.f32 %v323_v34, %v322_v32  ;;  %v465_v32 = vunpack.c.h.s8.bf16 %v422_v28  ;;  %v469_v34 = vunpack.c.l.s8.bf16 %v426_v40 }
 0x258   :  { %v331_v37 = vadd.f32 %v330_v35, %v329_v33  ;;  %v470_v33 = vunpack.c.l.s8.bf16 %v427_v31  ;;  %v474_v35 = vunpack.c.h.s8.bf16 %v427_v31 }
 0x259   :  { %v332_v38 = vmul.f32 0.0625, %v324_v36  ;;  %v431_v36 = vld [vmem:[#allocation11 + $0x78] sm:$0xff] }
 0x25a   :  { %v333_v39 = vmul.f32 0.0625, %v331_v37  ;;  %v473_v37 = vunpack.c.h.s8.bf16 %v426_v40 }
 0x25b   :  { %v334_v41 = vadd.f32 1e-05, %v332_v38  ;;  %v478_v38 = vunpack.c.l.s8.bf16 %v431_v36 }
 0x25c   :  { %v335_v42 = vadd.f32 1e-05, %v333_v39  ;;  %v430_v39 = vld [vmem:[#allocation11 + $0x70] sm:$0xff] }
 0x25d   :  { %3909 = vrsqrt.f32 %v334_v41  ;;  %v477_v41 = vunpack.c.l.s8.bf16 %v430_v39  ;;  %v481_v47 = vunpack.c.h.s8.bf16 %v430_v39 }
 0x25e   :  { %3911 = vrsqrt.f32 %v335_v42  ;;  %v482_v42 = vunpack.c.h.s8.bf16 %v431_v36 }
 0x267   :  { %v3910_v49 = vpop.eup %3909 }
 0x268   :  { %v3912_v51 = vpop.eup %3911 }
 0x269   :  { %v340_v52 = vcombine.low %v3910_v49, %v3912_v51  ;;  %v434_v49 = vld [vmem:[#allocation11 + $0x90] sm:$0xff] }
 0x26a   :  { %v485_v51 = vunpack.c.l.s8.bf16 %v434_v49 }
 0x26b   :  { %v347_v53 = vrot.slane %v340_v52, %v4317_v50  ;;  %v490_v52 = vunpack.c.h.s8.bf16 %v435_v45 }
 0x26d   :  { %v354_v55 = vrot.slane %v347_v53, %v4317_v50  ;;  %v439_v53 = vld [vmem:[#allocation11 + $0xb8] sm:$0xff] }
 0x26f   :  { %v356_v56 = vmul.f32 %v354_v55, %v291_v54  ;;  %v489_v54 = vunpack.c.h.s8.bf16 %v434_v49  ;;  %v494_v55 = vunpack.c.l.s8.bf16 %v439_v53 }
 0x271   :  { %v361_v57 = vrot.slane %v356_v56, %v4299_v44  ;;  %v365_v58 = vrot.slane %v356_v56, %v4302_v46  ;;  %v438_v56 = vld [vmem:[#allocation11 + $0xb0] sm:$0xff] }
 0x273   :  { %v369_v59 = vmul.f32 %v365_v58, %v309_v15  ;;  %v392_v0 = vmul.f32 %v365_v58, %v290_v63  ;;  %v368_v1 = vmul.f32 %v361_v57, %v308_v14  ;;  %v390_v2 = vmul.f32 %v365_v58, %v288_v62 }
 0x274   :  { %v389_v3 = vmul.f32 %v361_v57, %v4308_v60  ;;  %v391_v4 = vmul.f32 %v361_v57, %v4310_v61  ;;  %v418_v61 = vld [vmem:[#allocation11 + $0x10] sm:$0xff]  ;;  %v493_v57 = vunpack.c.l.s8.bf16 %v438_v56  ;;  %v498_v58 = vunpack.c.h.s8.bf16 %v439_v53 }
 0x275   :  { %v372_v5 = vcombine.low %v368_v1, %v369_v59  ;;  %v453_v22 = vunpack.c.l.s8.bf16 %v418_v61  ;;  %v457_v26 = vunpack.c.h.s8.bf16 %v418_v61  ;;  %v443_v59 = vld [vmem:[#allocation11 + $0xd8] sm:$0xff] }
 0x276   :  { %v502_v1 = vunpack.c.l.s8.bf16 %v443_v59 }
 0x277   :  { %v379_v6 = vrot.slane %v372_v5, %v4317_v50  ;;  %v447_v5 = vld [vmem:[#allocation11 + $0xf8] sm:$0xff] }
 0x279   :  { %v386_v8 = vrot.slane %v379_v6, %v4317_v50 }
 0x27b   :  { %v388_v9 = vsub.f32 %v292_v7, %v386_v8  ;;  %v510_v7 = vunpack.c.l.s8.bf16 %v447_v5  ;;  %v446_v8 = vld [vmem:[#allocation11 + $0xf0] sm:$0xff] }
 0x27d   :  { %v401_v10 = vrot.slane %v388_v9, %v4302_v46  ;;  %v397_v11 = vrot.slane %v388_v9, %v4299_v44  ;;  %v509_v9 = vunpack.c.l.s8.bf16 %v446_v8 }
 0x27f   :  { %v405_v12 = vadd.f32 %v401_v10, %v390_v2  ;;  %v407_v13 = vadd.f32 %v401_v10, %v392_v0  ;;  %v404_v63 = vadd.f32 %v397_v11, %v389_v3  ;;  %v406_v14 = vadd.f32 %v397_v11, %v391_v4  ;;  %v442_v2 = vld [vmem:[#allocation11 + $0xd0] sm:$0xff] }
 0x280   :  { %v497_v0 = vunpack.c.h.s8.bf16 %v438_v56  ;;  %v501_v3 = vunpack.c.l.s8.bf16 %v442_v2  ;;  %v506_v4 = vunpack.c.h.s8.bf16 %v443_v59  ;;  %v505_v6 = vunpack.c.h.s8.bf16 %v442_v2 }
 0x281   :  { %v409_v62 = vmul.f32 0.2, %v405_v12  ;;  %v411_v15 = vmul.f32 0.2, %v407_v13  ;;  %v408_v60 = vmul.f32 0.2, %v404_v63  ;;  %v514_v10 = vunpack.c.h.s8.bf16 %v447_v5 }
 0x282   :  { %v410_v16 = vmul.f32 0.2, %v406_v14  ;;  %v513_v11 = vunpack.c.h.s8.bf16 %v446_v8 }
 0x283   :  { %v413_v17 = vmax.f32 %v405_v12, %v409_v62  ;;  %v415_v18 = vmax.f32 %v407_v13, %v411_v15  ;;  %v412_v19 = vmax.f32 %v404_v63, %v408_v60  ;;  %v4334_v62 = vld [vmem:[#allocation13 + $0x35] sm:$0xf]  ;;  %v4338_v60 = vld [vmem:[#allocation13 + $0x7] sm:$0xf] }
 0x284   :  { %v414_v20 = vmax.f32 %v406_v14, %v410_v16  ;;  %v605_v15 = vrot.slane %v4334_v62, %v4299_v44  ;;  %v609_v16 = vrot.slane %v4334_v62, %v4302_v46 }
 0x285   :  { %v450_v21 = vpack.c.bf16 %v415_v18, %v413_v17 }
 0x286   :  { %v4329_v23 = vpack.c.bf16 %v414_v20, %v412_v19  ;;  %v635_v19 = vrot.slane %v4338_v60, %v4299_v44 }
 0x287   :  { %547 = vmatprep.mubr.bf16.mxu1 %v450_v21 }
 0x288   :  { %548 = vmatmul.mubr.bf16.vlgmr.msra.gmra.mrb[4].mxu1 %v4329_v23 }
 0x289   :  { %559 = vmatpush1.bf16.msra.mxu1 %v453_v22  ;;  %590 = vmatprep.mubr.bf16.mxu1 %v450_v21  ;;  %v639_v21 = vrot.slane %v4338_v60, %v4302_v46 }
 0x28a   :  { %560 = vmatprep.subr.bf16.mxu1 %v458_v24 }
 0x28d   :  { %561 = vmatpush1.bf16.msra.mxu1 %v457_v26 }
 0x28e   :  { %562 = vmatprep.subr.bf16.mxu1 %v462_v27 }
 0x291   :  { %563 = vmatpush1.bf16.msra.mxu1 %v461_v29 }
 0x292   :  { %564 = vmatprep.subr.bf16.mxu1 %v466_v30 }
 0x295   :  { %565 = vmatpush1.bf16.msra.mxu1 %v465_v32 }
 0x296   :  { %566 = vmatprep.subr.bf16.mxu1 %v470_v33 }
 0x299   :  { %567 = vmatpush1.bf16.msra.mxu1 %v469_v34 }
 0x29a   :  { %568 = vmatprep.subr.bf16.mxu1 %v474_v35 }
 0x29d   :  { %569 = vmatpush1.bf16.msra.mxu1 %v473_v37 }
 0x29e   :  { %570 = vmatprep.subr.bf16.mxu1 %v478_v38 }
 0x2a1   :  { %571 = vmatpush1.bf16.msra.mxu1 %v477_v41 }
 0x2a2   :  { %572 = vmatprep.subr.bf16.mxu1 %v482_v42 }
 0x2a5   :  { %573 = vmatpush1.bf16.msra.mxu1 %v481_v47 }
 0x2a6   :  { %574 = vmatprep.subr.bf16.mxu1 %v486_v48 }
 0x2a9   :  { %575 = vmatpush1.bf16.msra.mxu1 %v485_v51 }
 0x2aa   :  { %576 = vmatprep.subr.bf16.mxu1 %v490_v52 }
 0x2ad   :  { %577 = vmatpush1.bf16.msra.mxu1 %v489_v54 }
 0x2ae   :  { %578 = vmatprep.subr.bf16.mxu1 %v494_v55 }
 0x2b1   :  { %579 = vmatpush1.bf16.msra.mxu1 %v493_v57 }
 0x2b2   :  { %580 = vmatprep.subr.bf16.mxu1 %v498_v58 }
 0x2b5   :  { %581 = vmatpush1.bf16.msra.mxu1 %v497_v0 }
 0x2b6   :  { %582 = vmatprep.subr.bf16.mxu1 %v502_v1 }
 0x2b9   :  { %583 = vmatpush1.bf16.msra.mxu1 %v501_v3 }
 0x2ba   :  { %584 = vmatprep.subr.bf16.mxu1 %v506_v4 }
 0x2bd   :  { %585 = vmatpush1.bf16.msra.mxu1 %v505_v6 }
 0x2be   :  { %586 = vmatprep.subr.bf16.mxu1 %v510_v7 }
 0x2c1   :  { %587 = vmatpush1.bf16.msra.mxu1 %v509_v9 }
 0x2c2   :  { %588 = vmatprep.subr.bf16.mxu1 %v514_v10 }
 0x2c5   :  { %589 = vmatpush1.bf16.msra.mxu1 %v513_v11 }
 0x2c8   :  { %591 = vmatmul.mubr.bf16.vlgmr.msra.gmra.mrb[8].mxu1 %v4329_v23 }
 0x35b   :  { %v549_v12 = vpop.f32.mrb[4].mxu1 }
 0x35c   :  { %v551_v13 = vpop.f32.mrb[5].mxu1  ;;  %v622_v18 = vmul.f32 %v605_v15, %v549_v12 }
 0x35d   :  { %v553_v63 = vpop.f32.mrb[6].mxu1  ;;  %v623_v20 = vmul.f32 %v609_v16, %v551_v13 }
 0x35e   :  { %v555_v14 = vpop.f32.mrb[7].mxu1  ;;  %v626_v61 = vmul.f32 %v605_v15, %v553_v63 }
 0x35f   :  { %v627_v17 = vmul.f32 %v609_v16, %v555_v14 }
 0x360   :  { %v4346_v22 = vadd.f32 %v635_v19, %v626_v61 }
 0x361   :  { %4084 = shalt.err (!%p4081_p0)  }
 0x362   :  { %s4085_s26 = scalar_lea.vmem %s98_s3, 16384  ;;  %p4090_p2 = scmp.lt.s32.totalorder %s98_s3, %s98_s3 }
 0x363   :  { %p4086_p1 = scmp.ne.s32.totalorder %s98_s3, %s4085_s26  ;;  %p4091_p3 = scmp.lt.s32.totalorder %s4085_s26, %s4085_s26 }
 0x365   :  { %p4092_p4 = por %p4091_p3, %p4090_p2 }
 0x367   :  { %p4093_p5 = pnand %p4092_p4, %p4086_p1 }
 0x369   :  { %4096 = shalt.err (!%p4093_p5)  }
 0x36a   :  { %100 = dma.hbm_to_vmem [thread:$0]  %s4964_s4, 16384, %s98_s3, [#allocation4]  ;;  %v4360_v23 = vadd.f32 %v639_v21, %v627_v17  ;;  %v4362_v24 = vadd.f32 %v635_v19, %v622_v18 }
 0x36b   :  { %s4097_s29 = scalar_lea.hbm %s4965_s5, 28672 }
 0x36c   :  { %p4098_p6 = scmp.ne.s32.totalorder %s4965_s5, %s4097_s29  ;;  %p4101_p7 = scmp.lt.u32.totalorder %s4097_s29, %s4965_s5 }
 0x36e   :  { %p4103_p8 = pnand %p4101_p7, %p4098_p6 }
 0x370   :  { %4106 = shalt.err (!%p4103_p8)  }
 0x371   :  { %s4107_s4 = scalar_lea.vmem %s110_s19, 28672  ;;  %p4112_p10 = scmp.lt.s32.totalorder %s110_s19, %s110_s19 }
 0x372   :  { %p4108_p9 = scmp.ne.s32.totalorder %s110_s19, %s4107_s4  ;;  %p4113_p11 = scmp.lt.s32.totalorder %s4107_s4, %s4107_s4 }
 0x374   :  { %p4114_p12 = por %p4113_p11, %p4112_p10 }
 0x376   :  { %p4115_p13 = pnand %p4114_p12, %p4108_p9 }
 0x378   :  { %4118 = shalt.err (!%p4115_p13)  }
 0x379   :  { %112 = dma.hbm_to_vmem [thread:$0]  %s4965_s5, 28672, %s110_s19, [#allocation4 + $0x1]  ;;  %v4376_v25 = vadd.f32 %v639_v21, %v623_v20  ;;  %v662_v26 = vadd.f32 %v4346_v22, %v4362_v24  ;;  %v4385_v41 = vsub.s32 2, %v4296_v43  ;;  %v4390_v45 = vsub.s32 3, %v4296_v43 }
 0x37b   :  { %v669_v27 = vadd.f32 %v4360_v23, %v4376_v25  ;;  %v663_v28 = vrot.slane %v662_v26, 4  ;;  %v613_v49 = vrot.slane %v4334_v62, %v4385_v41  ;;  %v617_v53 = vrot.slane %v4334_v62, %v4390_v45 }
 0x37c   :  { %v643_v58 = vrot.slane %v4338_v60, %v4385_v41  ;;  %v647_v3 = vrot.slane %v4338_v60, %v4390_v45 }
 0x37d   :  { %v670_v29 = vrot.slane %v669_v27, 4  ;;  %v664_v30 = vadd.f32 %v663_v28, %v662_v26 }
 0x37f   :  { %v671_v31 = vadd.f32 %v670_v29, %v669_v27  ;;  %v665_v32 = vrot.slane %v664_v30, 2 }
 0x381   :  { %v672_v33 = vrot.slane %v671_v31, 2  ;;  %v666_v40 = vadd.f32 %v665_v32, %v664_v30 }
 0x383   :  { %v673_v34 = vadd.f32 %v672_v33, %v671_v31  ;;  %v667_v35 = vrot.slane %v666_v40, 1 }
 0x385   :  { %v674_v36 = vrot.slane %v673_v34, 1  ;;  %v668_v37 = vadd.f32 %v667_v35, %v666_v40 }
 0x387   :  { %v675_v38 = vadd.f32 %v674_v36, %v673_v34  ;;  %v4382_v39 = vmul.f32 0.0625, %v668_v37 }
 0x389   :  { %v4387_v42 = vmul.f32 0.0625, %v675_v38  ;;  %v694_v47 = vsub.f32 %v4362_v24, %v4382_v39  ;;  %v698_v48 = vsub.f32 %v4346_v22, %v4382_v39 }
 0x38b   :  { %v695_v51 = vsub.f32 %v4376_v25, %v4387_v42  ;;  %v699_v52 = vsub.f32 %v4360_v23, %v4387_v42  ;;  %v702_v55 = vmul.f32 %v694_v47, %v694_v47  ;;  %v706_v56 = vmul.f32 %v698_v48, %v698_v48 }
 0x38d   :  { %v703_v0 = vmul.f32 %v695_v51, %v695_v51  ;;  %v707_v1 = vmul.f32 %v699_v52, %v699_v52  ;;  %v710_v8 = vadd.f32 %v706_v56, %v702_v55 }
 0x38f   :  { %v717_v11 = vadd.f32 %v707_v1, %v703_v0  ;;  %v711_v62 = vrot.slane %v710_v8, 4 }
 0x391   :  { %v718_v60 = vrot.slane %v717_v11, 4  ;;  %v712_v18 = vadd.f32 %v711_v62, %v710_v8 }
 0x393   :  { %v719_v20 = vadd.f32 %v718_v60, %v717_v11  ;;  %v713_v28 = vrot.slane %v712_v18, 2 }
 0x395   :  { %v720_v30 = vrot.slane %v719_v20, 2  ;;  %v714_v40 = vadd.f32 %v713_v28, %v712_v18 }
 0x397   :  { %v721_v35 = vadd.f32 %v720_v30, %v719_v20 }
 0x39b   :  { %v592_v54 = vpop.f32.mrb[8].mxu1 }
 0x39c   :  { %v624_v57 = vmul.f32 %v613_v49, %v592_v54  ;;  %v594_v59 = vpop.f32.mrb[9].mxu1 }
 0x39d   :  { %v625_v2 = vmul.f32 %v617_v53, %v594_v59  ;;  %v596_v4 = vpop.f32.mrb[10].mxu1 }
 0x39e   :  { %v628_v5 = vmul.f32 %v613_v49, %v596_v4  ;;  %v598_v6 = vpop.f32.mrb[11].mxu1  ;;  %v4408_v9 = vadd.f32 %v643_v58, %v624_v57  ;;  %v715_v49 = vrot.slane %v714_v40, 1 }
 0x39f   :  { %v629_v7 = vmul.f32 %v617_v53, %v598_v6  ;;  %v4412_v12 = vadd.f32 %v647_v3, %v625_v2  ;;  %v722_v53 = vrot.slane %v721_v35, 1 }
 0x3a0   :  { %v4410_v10 = vadd.f32 %v643_v58, %v628_v5  ;;  %v716_v58 = vadd.f32 %v715_v49, %v714_v40 }
 0x3a1   :  { %v4414_v13 = vadd.f32 %v647_v3, %v629_v7  ;;  %v723_v0 = vadd.f32 %v722_v53, %v721_v35 }
 0x3a2   :  { %v676_v63 = vadd.f32 %v4410_v10, %v4408_v9  ;;  %v738_v4 = vmul.f32 0.0625, %v716_v58 }
 0x3a3   :  { %v683_v14 = vadd.f32 %v4414_v13, %v4412_v12  ;;  %v739_v6 = vmul.f32 0.0625, %v723_v0 }
 0x3a4   :  { %v677_v15 = vrot.slane %v676_v63, 4 }
 0x3a5   :  { %v684_v16 = vrot.slane %v683_v14, 4  ;;  %v743_v62 = vadd.f32 1e-05, %v739_v6 }
 0x3a6   :  { %v678_v61 = vadd.f32 %v677_v15, %v676_v63  ;;  %v742_v63 = vadd.f32 1e-05, %v738_v4 }
 0x3a7   :  { %v685_v17 = vadd.f32 %v684_v16, %v683_v14 }
 0x3a8   :  { %v679_v19 = vrot.slane %v678_v61, 2  ;;  %3913 = vrsqrt.f32 %v742_v63 }
 0x3a9   :  { %v686_v21 = vrot.slane %v685_v17, 2  ;;  %3915 = vrsqrt.f32 %v743_v62 }
 0x3aa   :  { %v680_v26 = vadd.f32 %v679_v19, %v678_v61 }
 0x3ab   :  { %v687_v27 = vadd.f32 %v686_v21, %v685_v17 }
 0x3ac   :  { %v681_v29 = vrot.slane %v680_v26, 1 }
 0x3ad   :  { %v688_v31 = vrot.slane %v687_v27, 1 }
 0x3ae   :  { %v682_v32 = vadd.f32 %v681_v29, %v680_v26 }
 0x3af   :  { %v689_v33 = vadd.f32 %v688_v31, %v687_v27 }
 0x3b0   :  { %v692_v34 = vmul.f32 0.0625, %v682_v32 }
 0x3b1   :  { %v693_v36 = vmul.f32 0.0625, %v689_v33  ;;  %v660_v33 = vld [vmem:[#allocation13 + $0xb] sm:$0xf] }
 0x3b2   :  { %v696_v37 = vsub.f32 %v4408_v9, %v692_v34  ;;  %v700_v38 = vsub.f32 %v4410_v10, %v692_v34  ;;  %v3914_v20 = vpop.eup %3913 }
 0x3b3   :  { %v697_v47 = vsub.f32 %v4412_v12, %v693_v36  ;;  %v701_v48 = vsub.f32 %v4414_v13, %v693_v36  ;;  %v3916_v21 = vpop.eup %3915 }
 0x3b4   :  { %v704_v51 = vmul.f32 %v696_v37, %v696_v37  ;;  %v708_v52 = vmul.f32 %v700_v38, %v700_v38  ;;  %v754_v27 = vcombine.low %v3914_v20, %v3916_v21 }
 0x3b5   :  { %v705_v54 = vmul.f32 %v697_v47, %v697_v47  ;;  %v709_v55 = vmul.f32 %v701_v48, %v701_v48 }
 0x3b6   :  { %v724_v56 = vadd.f32 %v708_v52, %v704_v51  ;;  %v762_v30 = vrot.slane %v754_v27, %v4317_v50 }
 0x3b7   :  { %v731_v57 = vadd.f32 %v709_v55, %v705_v54 }
 0x3b8   :  { %v725_v59 = vrot.slane %v724_v56, 4 }
 0x3b9   :  { %v732_v1 = vrot.slane %v731_v57, 4 }
 0x3ba   :  { %v726_v2 = vadd.f32 %v725_v59, %v724_v56 }
 0x3bb   :  { %v733_v3 = vadd.f32 %v732_v1, %v731_v57 }
 0x3bc   :  { %v727_v5 = vrot.slane %v726_v2, 2 }
 0x3bd   :  { %v734_v7 = vrot.slane %v733_v3, 2 }
 0x3be   :  { %v728_v8 = vadd.f32 %v727_v5, %v726_v2  ;;  %v661_v2 = vld [vmem:[#allocation13 + $0xf] sm:$0xf] }
 0x3bf   :  { %v735_v11 = vadd.f32 %v734_v7, %v733_v3 }
 0x3c0   :  { %v729_v14 = vrot.slane %v728_v8, 1 }
 0x3c1   :  { %v736_v15 = vrot.slane %v735_v11, 1 }
 0x3c2   :  { %v730_v60 = vadd.f32 %v729_v14, %v728_v8 }
 0x3c3   :  { %v737_v16 = vadd.f32 %v736_v15, %v735_v11 }
 0x3c4   :  { %v740_v61 = vmul.f32 0.0625, %v730_v60 }
 0x3c5   :  { %v741_v17 = vmul.f32 0.0625, %v737_v16 }
 0x3c6   :  { %v744_v18 = vadd.f32 1e-05, %v740_v61 }
 0x3c7   :  { %v745_v19 = vadd.f32 1e-05, %v741_v17 }
 0x3c8   :  { %3917 = vrsqrt.f32 %v744_v18 }
 0x3c9   :  { %3919 = vrsqrt.f32 %v745_v19 }
 0x3d2   :  { %v3918_v26 = vpop.eup %3917 }
 0x3d3   :  { %v3920_v28 = vpop.eup %3919 }
 0x3d4   :  { %v755_v29 = vcombine.low %v3918_v26, %v3920_v28 }
 0x3d6   :  { %v769_v31 = vrot.slane %v755_v29, %v4317_v50 }
 0x3d8   :  { %v770_v32 = vcombine.low %v762_v30, %v769_v31 }
 0x3da   :  { %v777_v40 = vrot.slane %v770_v32, %v4317_v50 }
 0x3dc   :  { %v779_v35 = vmul.f32 %v777_v40, %v660_v33 }
 0x3de   :  { %v784_v37 = vrot.slane %v779_v35, %v4299_v44  ;;  %v788_v38 = vrot.slane %v779_v35, %v4302_v46  ;;  %v792_v47 = vrot.slane %v779_v35, %v4385_v41  ;;  %v796_v48 = vrot.slane %v779_v35, %v4390_v45 }
 0x3e0   :  { %v801_v49 = vmul.f32 %v784_v37, %v4382_v39  ;;  %v802_v51 = vmul.f32 %v788_v38, %v4387_v42  ;;  %v803_v52 = vmul.f32 %v792_v47, %v692_v34  ;;  %v804_v53 = vmul.f32 %v796_v48, %v693_v36 }
 0x3e1   :  { %v837_v54 = vmul.f32 %v792_v47, %v4408_v9  ;;  %v838_v55 = vmul.f32 %v796_v48, %v4412_v12  ;;  %v842_v58 = vmul.f32 %v796_v48, %v4414_v13  ;;  %v835_v42 = vmul.f32 %v784_v37, %v4362_v24 }
 0x3e2   :  { %v809_v56 = vcombine.low %v801_v49, %v802_v51  ;;  %v810_v57 = vcombine.low %v803_v52, %v804_v53  ;;  %v836_v34 = vmul.f32 %v788_v38, %v4376_v25  ;;  %v839_v4 = vmul.f32 %v784_v37, %v4346_v22 }
 0x3e3   :  { %v840_v5 = vmul.f32 %v788_v38, %v4360_v23  ;;  %v841_v6 = vmul.f32 %v792_v47, %v4410_v10 }
 0x3e4   :  { %v817_v59 = vrot.slane %v809_v56, %v4317_v50  ;;  %v824_v0 = vrot.slane %v810_v57, %v4317_v50 }
 0x3e6   :  { %v825_v1 = vcombine.low %v817_v59, %v824_v0 }
 0x3e8   :  { %v832_v39 = vrot.slane %v825_v1, %v4317_v50 }
 0x3ea   :  { %v834_v3 = vsub.f32 %v661_v2, %v832_v39 }
 0x3ec   :  { %v847_v9 = vrot.slane %v834_v3, %v4299_v44  ;;  %v851_v12 = vrot.slane %v834_v3, %v4302_v46  ;;  %v855_v36 = vrot.slane %v834_v3, %v4385_v41  ;;  %v859_v13 = vrot.slane %v834_v3, %v4390_v45 }
 0x3ee   :  { %v4448_v7 = vadd.f32 %v847_v9, %v835_v42  ;;  %v865_v8 = vadd.f32 %v851_v12, %v836_v34  ;;  %v4450_v24 = vadd.f32 %v855_v36, %v837_v54  ;;  %v4452_v25 = vadd.f32 %v859_v13, %v838_v55 }
 0x3ef   :  { %v4454_v11 = vadd.f32 %v847_v9, %v839_v4  ;;  %v869_v63 = vadd.f32 %v851_v12, %v840_v5  ;;  %v4456_v14 = vadd.f32 %v855_v36, %v841_v6  ;;  %v4458_v62 = vadd.f32 %v859_v13, %v842_v58 }
 0x3f0   :  { %v4461_v22 = vmul.f32 0.2, %v4448_v7  ;;  %v873_v23 = vmul.f32 0.2, %v865_v8  ;;  %v4464_v10 = vmul.f32 0.2, %v4450_v24 }
 0x3f1   :  { %v4467_v15 = vmul.f32 0.2, %v4452_v25  ;;  %v4470_v60 = vmul.f32 0.2, %v4454_v11  ;;  %v877_v16 = vmul.f32 0.2, %v869_v63 }
 0x3f2   :  { %v4473_v61 = vmul.f32 0.2, %v4456_v14  ;;  %v4476_v17 = vmul.f32 0.2, %v4458_v62  ;;  %v880_v18 = vmax.f32 %v4448_v7, %v4461_v22  ;;  %v881_v19 = vmax.f32 %v865_v8, %v873_v23 }
 0x3f3   :  { %v882_v20 = vmax.f32 %v4450_v24, %v4464_v10  ;;  %v883_v21 = vmax.f32 %v4452_v25, %v4467_v15  ;;  %v884_v26 = vmax.f32 %v4454_v11, %v4470_v60  ;;  %v885_v27 = vmax.f32 %v869_v63, %v877_v16 }
 0x3f4   :  { %v886_v28 = vmax.f32 %v4456_v14, %v4473_v61  ;;  %v887_v29 = vmax.f32 %v4458_v62, %v4476_v17 }
 0x3f5   :  { %4147 = dma.done.wait [#allocation4], 16384 }
 0x3f6   :  { %4148 = vsyncadd [#allocation4], 4294950912  ;;  %v4490_v30 = vpack.c.bf16 %v885_v27, %v881_v19  ;;  %v893_v31 = vld [vmem:[#allocation2 + $0x8] sm:$0xff]  ;;  %v895_v32 = vld [vmem:[#allocation2 + $0x18] sm:$0xff]  ;;  %v4508_v7 = vpack.c.bf16 %v887_v29, %v883_v21 }
 0x3f7   :  { %v892_v33 = vld [vmem:[#allocation2] sm:$0xff]  ;;  %v1026_v40 = vunpack.c.l.s8.bf16 %v893_v31  ;;  %v1034_v35 = vunpack.c.h.s8.bf16 %v893_v31  ;;  %v1028_v37 = vunpack.c.l.s8.bf16 %v895_v32  ;;  %v1036_v38 = vunpack.c.h.s8.bf16 %v895_v32  ;;  %v894_v47 = vld [vmem:[#allocation2 + $0x10] sm:$0xff]  ;;  %v901_v51 = vld [vmem:[#allocation2 + $0x48] sm:$0xff] }
 0x3f8   :  { %1313 = vmatprep.mubr.bf16.mxu0 %v4490_v30  ;;  %1399 = vmatprep.mubr.bf16.mxu1 %v4490_v30  ;;  %v1025_v48 = vunpack.c.l.s8.bf16 %v892_v33  ;;  %v1027_v49 = vunpack.c.l.s8.bf16 %v894_v47  ;;  %v903_v52 = vld [vmem:[#allocation2 + $0x58] sm:$0xff]  ;;  %v1033_v53 = vunpack.c.h.s8.bf16 %v892_v33  ;;  %v1035_v54 = vunpack.c.h.s8.bf16 %v894_v47  ;;  %v900_v57 = vld [vmem:[#allocation2 + $0x40] sm:$0xff]  ;;  %v902_v58 = vld [vmem:[#allocation2 + $0x50] sm:$0xff] }
 0x3f9   :  { %1281 = vmatprep.subr.bf16.mxu0 %v1026_v40  ;;  %1367 = vmatprep.subr.bf16.mxu1 %v1028_v37  ;;  %v1042_v55 = vunpack.c.l.s8.bf16 %v901_v51  ;;  %v1044_v56 = vunpack.c.l.s8.bf16 %v903_v52  ;;  %v1041_v59 = vunpack.c.l.s8.bf16 %v900_v57  ;;  %v1043_v0 = vunpack.c.l.s8.bf16 %v902_v58  ;;  %v909_v39 = vld [vmem:[#allocation2 + $0x88] sm:$0xff]  ;;  %v911_v3 = vld [vmem:[#allocation2 + $0x98] sm:$0xff]  ;;  %v908_v36 = vld [vmem:[#allocation2 + $0x80] sm:$0xff] }
 0x3fa   :  { %1282 = vmatpush1.bf16.msra.mxu0 %v1025_v48  ;;  %1368 = vmatpush1.bf16.msra.mxu1 %v1027_v49  ;;  %v1050_v1 = vunpack.c.h.s8.bf16 %v901_v51  ;;  %v1052_v2 = vunpack.c.h.s8.bf16 %v903_v52  ;;  %v1049_v42 = vunpack.c.h.s8.bf16 %v900_v57  ;;  %v1051_v34 = vunpack.c.h.s8.bf16 %v902_v58  ;;  %v910_v13 = vld [vmem:[#allocation2 + $0x90] sm:$0xff]  ;;  %v917_v63 = vld [vmem:[#allocation2 + $0xc8] sm:$0xff]  ;;  %v919_v23 = vld [vmem:[#allocation2 + $0xd8] sm:$0xff] }
 0x3fb   :  { %1283 = vmatprep.subr.bf16.mxu0 %v1034_v35  ;;  %1369 = vmatprep.subr.bf16.mxu1 %v1036_v38  ;;  %v1058_v9 = vunpack.c.l.s8.bf16 %v909_v39  ;;  %v1060_v12 = vunpack.c.l.s8.bf16 %v911_v3  ;;  %v1057_v4 = vunpack.c.l.s8.bf16 %v908_v36  ;;  %v1059_v5 = vunpack.c.l.s8.bf16 %v910_v13  ;;  %v916_v32 = vld [vmem:[#allocation2 + $0xc0] sm:$0xff]  ;;  %v918_v33 = vld [vmem:[#allocation2 + $0xd0] sm:$0xff]  ;;  %v925_v47 = vld [vmem:[#allocation2 + $0x108] sm:$0xff] }
 0x3fc   :  { %v1066_v6 = vunpack.c.h.s8.bf16 %v909_v39  ;;  %v1068_v8 = vunpack.c.h.s8.bf16 %v911_v3  ;;  %v1065_v16 = vunpack.c.h.s8.bf16 %v908_v36  ;;  %v1067_v19 = vunpack.c.h.s8.bf16 %v910_v13  ;;  %v927_v48 = vld [vmem:[#allocation2 + $0x118] sm:$0xff]  ;;  %v973_v21 = vld [vmem:[#allocation2 + $0x288] sm:$0xff] }
 0x3fd   :  { %v1074_v27 = vunpack.c.l.s8.bf16 %v917_v63  ;;  %v1076_v31 = vunpack.c.l.s8.bf16 %v919_v23  ;;  %v1073_v40 = vunpack.c.l.s8.bf16 %v916_v32  ;;  %v1075_v35 = vunpack.c.l.s8.bf16 %v918_v33  ;;  %v975_v29 = vld [vmem:[#allocation2 + $0x298] sm:$0xff] }
 0x3fe   :  { %1284 = vmatpush1.bf16.msra.mxu0 %v1033_v53  ;;  %1370 = vmatpush1.bf16.msra.mxu1 %v1035_v54  ;;  %v1082_v37 = vunpack.c.h.s8.bf16 %v917_v63  ;;  %v1084_v38 = vunpack.c.h.s8.bf16 %v919_v23  ;;  %v1081_v49 = vunpack.c.h.s8.bf16 %v916_v32  ;;  %v1083_v51 = vunpack.c.h.s8.bf16 %v918_v33  ;;  %v924_v54 = vld [vmem:[#allocation2 + $0x100] sm:$0xff] }
 0x3ff   :  { %1285 = vmatprep.subr.bf16.mxu0 %v1042_v55  ;;  %1371 = vmatprep.subr.bf16.mxu1 %v1044_v56  ;;  %v1090_v52 = vunpack.c.l.s8.bf16 %v925_v47  ;;  %v1092_v53 = vunpack.c.l.s8.bf16 %v927_v48  ;;  %v926_v55 = vld [vmem:[#allocation2 + $0x110] sm:$0xff]  ;;  %v1089_v56 = vunpack.c.l.s8.bf16 %v924_v54  ;;  %v1098_v58 = vunpack.c.h.s8.bf16 %v925_v47 }
 0x400   :  { %v1091_v57 = vunpack.c.l.s8.bf16 %v926_v55  ;;  %v1099_v39 = vunpack.c.h.s8.bf16 %v926_v55 }
 0x402   :  { %1286 = vmatpush1.bf16.msra.mxu0 %v1041_v59  ;;  %1372 = vmatpush1.bf16.msra.mxu1 %v1043_v0  ;;  %v1100_v59 = vunpack.c.h.s8.bf16 %v927_v48  ;;  %v933_v0 = vld [vmem:[#allocation2 + $0x148] sm:$0xff] }
 0x403   :  { %1287 = vmatprep.subr.bf16.mxu0 %v1050_v1  ;;  %1373 = vmatprep.subr.bf16.mxu1 %v1052_v2  ;;  %v935_v1 = vld [vmem:[#allocation2 + $0x158] sm:$0xff]  ;;  %v1097_v2 = vunpack.c.h.s8.bf16 %v924_v54  ;;  %v1106_v3 = vunpack.c.l.s8.bf16 %v933_v0  ;;  %v1114_v13 = vunpack.c.h.s8.bf16 %v933_v0 }
 0x406   :  { %1288 = vmatpush1.bf16.msra.mxu0 %v1049_v42  ;;  %1374 = vmatpush1.bf16.msra.mxu1 %v1051_v34  ;;  %v1108_v42 = vunpack.c.l.s8.bf16 %v935_v1  ;;  %v932_v34 = vld [vmem:[#allocation2 + $0x140] sm:$0xff] }
 0x407   :  { %1289 = vmatprep.subr.bf16.mxu0 %v1058_v9  ;;  %1375 = vmatprep.subr.bf16.mxu1 %v1060_v12  ;;  %v934_v9 = vld [vmem:[#allocation2 + $0x150] sm:$0xff]  ;;  %v1105_v12 = vunpack.c.l.s8.bf16 %v932_v34 }
 0x408   :  { %v1107_v36 = vunpack.c.l.s8.bf16 %v934_v9  ;;  %v1115_v63 = vunpack.c.h.s8.bf16 %v934_v9 }
 0x40a   :  { %1290 = vmatpush1.bf16.msra.mxu0 %v1057_v4  ;;  %1376 = vmatpush1.bf16.msra.mxu1 %v1059_v5  ;;  %v1116_v4 = vunpack.c.h.s8.bf16 %v935_v1  ;;  %v941_v5 = vld [vmem:[#allocation2 + $0x188] sm:$0xff] }
 0x40b   :  { %1291 = vmatprep.subr.bf16.mxu0 %v1066_v6  ;;  %1377 = vmatprep.subr.bf16.mxu1 %v1068_v8  ;;  %v943_v6 = vld [vmem:[#allocation2 + $0x198] sm:$0xff]  ;;  %v1113_v8 = vunpack.c.h.s8.bf16 %v932_v34  ;;  %v1122_v23 = vunpack.c.l.s8.bf16 %v941_v5  ;;  %v1130_v33 = vunpack.c.h.s8.bf16 %v941_v5  ;;  %v966_v5 = vld [vmem:[#allocation2 + $0x250] sm:$0xff] }
 0x40c   :  { %v1171_v62 = vunpack.c.l.s8.bf16 %v966_v5 }
 0x40e   :  { %1292 = vmatpush1.bf16.msra.mxu0 %v1065_v16  ;;  %1378 = vmatpush1.bf16.msra.mxu1 %v1067_v19  ;;  %v1124_v16 = vunpack.c.l.s8.bf16 %v943_v6  ;;  %v940_v19 = vld [vmem:[#allocation2 + $0x180] sm:$0xff] }
 0x40f   :  { %1293 = vmatprep.subr.bf16.mxu0 %v1074_v27  ;;  %1379 = vmatprep.subr.bf16.mxu1 %v1076_v31  ;;  %v942_v27 = vld [vmem:[#allocation2 + $0x190] sm:$0xff]  ;;  %v1121_v31 = vunpack.c.l.s8.bf16 %v940_v19 }
 0x410   :  { %v1123_v32 = vunpack.c.l.s8.bf16 %v942_v27  ;;  %v1131_v47 = vunpack.c.h.s8.bf16 %v942_v27 }
 0x412   :  { %1294 = vmatpush1.bf16.msra.mxu0 %v1073_v40  ;;  %1380 = vmatpush1.bf16.msra.mxu1 %v1075_v35  ;;  %v1132_v40 = vunpack.c.h.s8.bf16 %v943_v6  ;;  %v949_v35 = vld [vmem:[#allocation2 + $0x1c8] sm:$0xff] }
 0x413   :  { %1295 = vmatprep.subr.bf16.mxu0 %v1082_v37  ;;  %1381 = vmatprep.subr.bf16.mxu1 %v1084_v38  ;;  %v951_v37 = vld [vmem:[#allocation2 + $0x1d8] sm:$0xff]  ;;  %v1129_v38 = vunpack.c.h.s8.bf16 %v940_v19  ;;  %v1138_v48 = vunpack.c.l.s8.bf16 %v949_v35  ;;  %v1146_v55 = vunpack.c.h.s8.bf16 %v949_v35  ;;  %v974_v19 = vld [vmem:[#allocation2 + $0x290] sm:$0xff] }
 0x414   :  { %v983_v35 = vld [vmem:[#allocation2 + $0x2d8] sm:$0xff] }
 0x416   :  { %1296 = vmatpush1.bf16.msra.mxu0 %v1081_v49  ;;  %1382 = vmatpush1.bf16.msra.mxu1 %v1083_v51  ;;  %v1140_v49 = vunpack.c.l.s8.bf16 %v951_v37  ;;  %v948_v51 = vld [vmem:[#allocation2 + $0x1c0] sm:$0xff] }
 0x417   :  { %1297 = vmatprep.subr.bf16.mxu0 %v1090_v52  ;;  %1383 = vmatprep.subr.bf16.mxu1 %v1092_v53  ;;  %v950_v52 = vld [vmem:[#allocation2 + $0x1d0] sm:$0xff]  ;;  %v1137_v53 = vunpack.c.l.s8.bf16 %v948_v51 }
 0x418   :  { %v1139_v54 = vunpack.c.l.s8.bf16 %v950_v52  ;;  %v1147_v0 = vunpack.c.h.s8.bf16 %v950_v52 }
 0x41a   :  { %1298 = vmatpush1.bf16.msra.mxu0 %v1089_v56  ;;  %1384 = vmatpush1.bf16.msra.mxu1 %v1091_v57  ;;  %v1148_v56 = vunpack.c.h.s8.bf16 %v951_v37  ;;  %v957_v57 = vld [vmem:[#allocation2 + $0x208] sm:$0xff] }
 0x41b   :  { %1299 = vmatprep.subr.bf16.mxu0 %v1098_v58  ;;  %1385 = vmatprep.subr.bf16.mxu1 %v1100_v59  ;;  %v959_v58 = vld [vmem:[#allocation2 + $0x218] sm:$0xff]  ;;  %v1145_v59 = vunpack.c.h.s8.bf16 %v948_v51  ;;  %v1154_v1 = vunpack.c.l.s8.bf16 %v957_v57  ;;  %v982_v51 = vld [vmem:[#allocation2 + $0x2d0] sm:$0xff] }
 0x41e   :  { %1300 = vmatpush1.bf16.msra.mxu0 %v1097_v2  ;;  %1386 = vmatpush1.bf16.msra.mxu1 %v1099_v39  ;;  %v1156_v2 = vunpack.c.l.s8.bf16 %v959_v58  ;;  %v956_v39 = vld [vmem:[#allocation2 + $0x200] sm:$0xff] }
 0x41f   :  { %1301 = vmatprep.subr.bf16.mxu0 %v1106_v3  ;;  %1387 = vmatprep.subr.bf16.mxu1 %v1108_v42  ;;  %v958_v3 = vld [vmem:[#allocation2 + $0x210] sm:$0xff]  ;;  %v4500_v42 = vpack.c.bf16 %v884_v26, %v880_v18  ;;  %v1153_v34 = vunpack.c.l.s8.bf16 %v956_v39  ;;  %v1161_v11 = vunpack.c.h.s8.bf16 %v956_v39  ;;  %v964_v26 = vld [vmem:[#allocation2 + $0x240] sm:$0xff] }
 0x420   :  { %v1155_v9 = vunpack.c.l.s8.bf16 %v958_v3  ;;  %v1163_v22 = vunpack.c.h.s8.bf16 %v958_v3  ;;  %v1169_v25 = vunpack.c.l.s8.bf16 %v964_v26  ;;  %v1177_v6 = vunpack.c.h.s8.bf16 %v964_v26  ;;  %v990_v39 = vld [vmem:[#allocation2 + $0x310] sm:$0xff] }
 0x421   :  { %v998_v26 = vld [vmem:[#allocation2 + $0x350] sm:$0xff] }
 0x422   :  { %1302 = vmatpush1.bf16.msra.mxu0 %v1105_v12  ;;  %1388 = vmatpush1.bf16.msra.mxu1 %v1107_v36  ;;  %v1162_v12 = vunpack.c.h.s8.bf16 %v957_v57  ;;  %v1164_v36 = vunpack.c.h.s8.bf16 %v959_v58  ;;  %v991_v57 = vld [vmem:[#allocation2 + $0x318] sm:$0xff] }
 0x423   :  { %1303 = vmatprep.subr.bf16.mxu0 %v1114_v13  ;;  %1389 = vmatprep.subr.bf16.mxu1 %v1116_v4  ;;  %v965_v13 = vld [vmem:[#allocation2 + $0x248] sm:$0xff]  ;;  %v967_v4 = vld [vmem:[#allocation2 + $0x258] sm:$0xff] }
 0x424   :  { %v1170_v60 = vunpack.c.l.s8.bf16 %v965_v13  ;;  %v1172_v18 = vunpack.c.l.s8.bf16 %v967_v4  ;;  %v1178_v15 = vunpack.c.h.s8.bf16 %v965_v13  ;;  %v1180_v17 = vunpack.c.h.s8.bf16 %v967_v4  ;;  %v999_v13 = vld [vmem:[#allocation2 + $0x358] sm:$0xff] }
 0x426   :  { %1304 = vmatpush1.bf16.msra.mxu0 %v1113_v8  ;;  %1390 = vmatpush1.bf16.msra.mxu1 %v1115_v63  ;;  %v1179_v8 = vunpack.c.h.s8.bf16 %v966_v5  ;;  %v1186_v63 = vunpack.c.l.s8.bf16 %v973_v21 }
 0x427   :  { %1305 = vmatprep.subr.bf16.mxu0 %v1122_v23  ;;  %1391 = vmatprep.subr.bf16.mxu1 %v1124_v16  ;;  %v1188_v23 = vunpack.c.l.s8.bf16 %v975_v29  ;;  %v972_v16 = vld [vmem:[#allocation2 + $0x280] sm:$0xff] }
 0x428   :  { %v1185_v27 = vunpack.c.l.s8.bf16 %v972_v16  ;;  %v1193_v37 = vunpack.c.h.s8.bf16 %v972_v16  ;;  %v1006_v16 = vld [vmem:[#allocation2 + $0x390] sm:$0xff] }
 0x42a   :  { %1306 = vmatpush1.bf16.msra.mxu0 %v1121_v31  ;;  %1392 = vmatpush1.bf16.msra.mxu1 %v1123_v32  ;;  %v1187_v31 = vunpack.c.l.s8.bf16 %v974_v19  ;;  %v1194_v32 = vunpack.c.h.s8.bf16 %v973_v21  ;;  %v1007_v21 = vld [vmem:[#allocation2 + $0x398] sm:$0xff] }
 0x42b   :  { %1307 = vmatprep.subr.bf16.mxu0 %v1130_v33  ;;  %1393 = vmatprep.subr.bf16.mxu1 %v1132_v40  ;;  %v1196_v33 = vunpack.c.h.s8.bf16 %v975_v29  ;;  %v981_v40 = vld [vmem:[#allocation2 + $0x2c8] sm:$0xff] }
 0x42e   :  { %1308 = vmatpush1.bf16.msra.mxu0 %v1129_v38  ;;  %1394 = vmatpush1.bf16.msra.mxu1 %v1131_v47  ;;  %v1195_v38 = vunpack.c.h.s8.bf16 %v974_v19  ;;  %v1202_v47 = vunpack.c.l.s8.bf16 %v981_v40 }
 0x42f   :  { %1309 = vmatprep.subr.bf16.mxu0 %v1138_v48  ;;  %1395 = vmatprep.subr.bf16.mxu1 %v1140_v49  ;;  %v1204_v48 = vunpack.c.l.s8.bf16 %v983_v35  ;;  %v980_v49 = vld [vmem:[#allocation2 + $0x2c0] sm:$0xff] }
 0x430   :  { %v1201_v52 = vunpack.c.l.s8.bf16 %v980_v49  ;;  %v1209_v58 = vunpack.c.h.s8.bf16 %v980_v49  ;;  %v1014_v49 = vld [vmem:[#allocation2 + $0x3d0] sm:$0xff] }
 0x432   :  { %1310 = vmatpush1.bf16.msra.mxu0 %v1137_v53  ;;  %1396 = vmatpush1.bf16.msra.mxu1 %v1139_v54  ;;  %v1203_v53 = vunpack.c.l.s8.bf16 %v982_v51  ;;  %v1210_v54 = vunpack.c.h.s8.bf16 %v981_v40  ;;  %v1015_v40 = vld [vmem:[#allocation2 + $0x3d8] sm:$0xff] }
 0x433   :  { %1311 = vmatprep.subr.bf16.mxu0 %v1146_v55  ;;  %1397 = vmatprep.subr.bf16.mxu1 %v1148_v56  ;;  %v1212_v55 = vunpack.c.h.s8.bf16 %v983_v35  ;;  %v989_v56 = vld [vmem:[#allocation2 + $0x308] sm:$0xff] }
 0x436   :  { %1312 = vmatpush1.bf16.msra.mxu0 %v1145_v59  ;;  %1398 = vmatpush1.bf16.msra.mxu1 %v1147_v0  ;;  %v1211_v59 = vunpack.c.h.s8.bf16 %v982_v51  ;;  %v1218_v0 = vunpack.c.l.s8.bf16 %v989_v56 }
 0x437   :  { %1324 = vmatprep.subr.bf16.mxu0 %v1154_v1  ;;  %1410 = vmatprep.subr.bf16.mxu1 %v1156_v2  ;;  %v1220_v1 = vunpack.c.l.s8.bf16 %v991_v57  ;;  %v988_v2 = vld [vmem:[#allocation2 + $0x300] sm:$0xff] }
 0x438   :  { %v1217_v3 = vunpack.c.l.s8.bf16 %v988_v2  ;;  %v1225_v4 = vunpack.c.h.s8.bf16 %v988_v2  ;;  %v898_v2 = vld [vmem:[#allocation2 + $0x30] sm:$0xff] }
 0x439   :  { %1314 = vmatmul.mubr.bf16.vlgmr.msra.gmra.mrb[4].mxu0 %v4500_v42  ;;  %1400 = vmatmul.mubr.bf16.vlgmr.msra.gmra.mrb[12].mxu1 %v4500_v42  ;;  %v1039_v14 = vunpack.c.h.s8.bf16 %v898_v2 }
 0x43a   :  { %1325 = vmatpush1.bf16.msra.mxu0 %v1153_v34  ;;  %1411 = vmatpush1.bf16.msra.mxu1 %v1155_v9  ;;  %v1219_v34 = vunpack.c.l.s8.bf16 %v990_v39  ;;  %v1226_v9 = vunpack.c.h.s8.bf16 %v989_v56  ;;  %v899_v56 = vld [vmem:[#allocation2 + $0x38] sm:$0xff] }
 0x43b   :  { %1326 = vmatprep.subr.bf16.mxu0 %v1162_v12  ;;  %1412 = vmatprep.subr.bf16.mxu1 %v1164_v36  ;;  %v1228_v12 = vunpack.c.h.s8.bf16 %v991_v57  ;;  %v997_v36 = vld [vmem:[#allocation2 + $0x348] sm:$0xff] }
 0x43c   :  { %1356 = vmatprep.mubr.bf16.mxu0 %v4508_v7  ;;  %1442 = vmatprep.mubr.bf16.mxu1 %v4508_v7 }
 0x43e   :  { %1327 = vmatpush1.bf16.msra.mxu0 %v1161_v11  ;;  %1413 = vmatpush1.bf16.msra.mxu1 %v1163_v22  ;;  %v1227_v11 = vunpack.c.h.s8.bf16 %v990_v39  ;;  %v1234_v22 = vunpack.c.l.s8.bf16 %v997_v36  ;;  %v4520_v39 = vpack.c.bf16 %v886_v28, %v882_v20  ;;  %v904_v20 = vld [vmem:[#allocation2 + $0x60] sm:$0xff]  ;;  %v906_v28 = vld [vmem:[#allocation2 + $0x70] sm:$0xff] }
 0x43f   :  { %1328 = vmatprep.subr.bf16.mxu0 %v1170_v60  ;;  %1414 = vmatprep.subr.bf16.mxu1 %v1172_v18  ;;  %v1236_v60 = vunpack.c.l.s8.bf16 %v999_v13  ;;  %v996_v18 = vld [vmem:[#allocation2 + $0x340] sm:$0xff] }
 0x440   :  { %v1233_v5 = vunpack.c.l.s8.bf16 %v996_v18  ;;  %v1241_v29 = vunpack.c.h.s8.bf16 %v996_v18  ;;  %v913_v18 = vld [vmem:[#allocation2 + $0xa8] sm:$0xff] }
 0x442   :  { %1329 = vmatpush1.bf16.msra.mxu0 %v1169_v25  ;;  %1415 = vmatpush1.bf16.msra.mxu1 %v1171_v62  ;;  %v1235_v25 = vunpack.c.l.s8.bf16 %v998_v26  ;;  %v1242_v62 = vunpack.c.h.s8.bf16 %v997_v36  ;;  %v905_v36 = vld [vmem:[#allocation2 + $0x68] sm:$0xff] }
 0x443   :  { %1330 = vmatprep.subr.bf16.mxu0 %v1178_v15  ;;  %1416 = vmatprep.subr.bf16.mxu1 %v1180_v17  ;;  %v1244_v15 = vunpack.c.h.s8.bf16 %v999_v13  ;;  %v1005_v17 = vld [vmem:[#allocation2 + $0x388] sm:$0xff]  ;;  %v907_v13 = vld [vmem:[#allocation2 + $0x78] sm:$0xff]  ;;  %v1046_v10 = vunpack.c.l.s8.bf16 %v905_v36 }
 0x444   :  { %v1048_v61 = vunpack.c.l.s8.bf16 %v907_v13 }
 0x446   :  { %1331 = vmatpush1.bf16.msra.mxu0 %v1177_v6  ;;  %1417 = vmatpush1.bf16.msra.mxu1 %v1179_v8  ;;  %v1243_v6 = vunpack.c.h.s8.bf16 %v998_v26  ;;  %v1250_v8 = vunpack.c.l.s8.bf16 %v1005_v17  ;;  %v915_v26 = vld [vmem:[#allocation2 + $0xb8] sm:$0xff] }
 0x447   :  { %1332 = vmatprep.subr.bf16.mxu0 %v1186_v63  ;;  %1418 = vmatprep.subr.bf16.mxu1 %v1188_v23  ;;  %v1252_v63 = vunpack.c.l.s8.bf16 %v1007_v21  ;;  %v1004_v23 = vld [vmem:[#allocation2 + $0x380] sm:$0xff] }
 0x448   :  { %v1249_v19 = vunpack.c.l.s8.bf16 %v1004_v23  ;;  %v1257_v35 = vunpack.c.h.s8.bf16 %v1004_v23  ;;  %v923_v23 = vld [vmem:[#allocation2 + $0xf8] sm:$0xff] }
 0x44a   :  { %1333 = vmatpush1.bf16.msra.mxu0 %v1185_v27  ;;  %1419 = vmatpush1.bf16.msra.mxu1 %v1187_v31  ;;  %v1251_v27 = vunpack.c.l.s8.bf16 %v1006_v16  ;;  %v1258_v31 = vunpack.c.h.s8.bf16 %v1005_v17  ;;  %v912_v17 = vld [vmem:[#allocation2 + $0xa0] sm:$0xff] }
 0x44b   :  { %1334 = vmatprep.subr.bf16.mxu0 %v1194_v32  ;;  %1420 = vmatprep.subr.bf16.mxu1 %v1196_v33  ;;  %v1260_v32 = vunpack.c.h.s8.bf16 %v1007_v21  ;;  %v1013_v33 = vld [vmem:[#allocation2 + $0x3c8] sm:$0xff]  ;;  %v1061_v21 = vunpack.c.l.s8.bf16 %v912_v17 }
 0x44e   :  { %1335 = vmatpush1.bf16.msra.mxu0 %v1193_v37  ;;  %1421 = vmatpush1.bf16.msra.mxu1 %v1195_v38  ;;  %v1259_v37 = vunpack.c.h.s8.bf16 %v1006_v16  ;;  %v1266_v38 = vunpack.c.l.s8.bf16 %v1013_v33  ;;  %v1069_v16 = vunpack.c.h.s8.bf16 %v912_v17  ;;  %v955_v17 = vld [vmem:[#allocation2 + $0x1f8] sm:$0xff] }
 0x44f   :  { %1336 = vmatprep.subr.bf16.mxu0 %v1202_v47  ;;  %1422 = vmatprep.subr.bf16.mxu1 %v1204_v48  ;;  %v1268_v47 = vunpack.c.l.s8.bf16 %v1015_v40  ;;  %v1012_v48 = vld [vmem:[#allocation2 + $0x3c0] sm:$0xff] }
 0x450   :  { %v1265_v51 = vunpack.c.l.s8.bf16 %v1012_v48  ;;  %v1273_v57 = vunpack.c.h.s8.bf16 %v1012_v48  ;;  %v931_v48 = vld [vmem:[#allocation2 + $0x138] sm:$0xff] }
 0x452   :  { %1337 = vmatpush1.bf16.msra.mxu0 %v1201_v52  ;;  %1423 = vmatpush1.bf16.msra.mxu1 %v1203_v53  ;;  %v1267_v52 = vunpack.c.l.s8.bf16 %v1014_v49  ;;  %v1274_v53 = vunpack.c.h.s8.bf16 %v1013_v33  ;;  %v922_v33 = vld [vmem:[#allocation2 + $0xf0] sm:$0xff] }
 0x453   :  { %1338 = vmatprep.subr.bf16.mxu0 %v1210_v54  ;;  %1424 = vmatprep.subr.bf16.mxu1 %v1212_v55  ;;  %v1276_v54 = vunpack.c.h.s8.bf16 %v1015_v40  ;;  %v897_v55 = vld [vmem:[#allocation2 + $0x28] sm:$0xff] }
 0x456   :  { %1339 = vmatpush1.bf16.msra.mxu0 %v1209_v58  ;;  %1425 = vmatpush1.bf16.msra.mxu1 %v1211_v59  ;;  %v1275_v58 = vunpack.c.h.s8.bf16 %v1014_v49  ;;  %v1030_v59 = vunpack.c.l.s8.bf16 %v897_v55 }
 0x457   :  { %1340 = vmatprep.subr.bf16.mxu0 %v1218_v0  ;;  %1426 = vmatprep.subr.bf16.mxu1 %v1220_v1  ;;  %v1032_v0 = vunpack.c.l.s8.bf16 %v899_v56  ;;  %v896_v1 = vld [vmem:[#allocation2 + $0x20] sm:$0xff] }
 0x458   :  { %v1037_v24 = vunpack.c.h.s8.bf16 %v896_v1 }
 0x45a   :  { %1341 = vmatpush1.bf16.msra.mxu0 %v1217_v3  ;;  %1427 = vmatpush1.bf16.msra.mxu1 %v1219_v34  ;;  %v1029_v3 = vunpack.c.l.s8.bf16 %v896_v1  ;;  %v1031_v34 = vunpack.c.l.s8.bf16 %v898_v2  ;;  %v939_v1 = vld [vmem:[#allocation2 + $0x178] sm:$0xff] }
 0x45b   :  { %1342 = vmatprep.subr.bf16.mxu0 %v1226_v9  ;;  %1428 = vmatprep.subr.bf16.mxu1 %v1228_v12  ;;  %v1038_v9 = vunpack.c.h.s8.bf16 %v897_v55  ;;  %v1040_v12 = vunpack.c.h.s8.bf16 %v899_v56  ;;  %v930_v55 = vld [vmem:[#allocation2 + $0x130] sm:$0xff] }
 0x45e   :  { %1343 = vmatpush1.bf16.msra.mxu0 %v1225_v4  ;;  %1429 = vmatpush1.bf16.msra.mxu1 %v1227_v11  ;;  %v1045_v4 = vunpack.c.l.s8.bf16 %v904_v20  ;;  %v1047_v11 = vunpack.c.l.s8.bf16 %v906_v28 }
 0x45f   :  { %1344 = vmatprep.subr.bf16.mxu0 %v1234_v22  ;;  %1430 = vmatprep.subr.bf16.mxu1 %v1236_v60  ;;  %v1054_v22 = vunpack.c.h.s8.bf16 %v905_v36  ;;  %v1056_v60 = vunpack.c.h.s8.bf16 %v907_v13  ;;  %v938_v36 = vld [vmem:[#allocation2 + $0x170] sm:$0xff] }
 0x462   :  { %1345 = vmatpush1.bf16.msra.mxu0 %v1233_v5  ;;  %1431 = vmatpush1.bf16.msra.mxu1 %v1235_v25  ;;  %v1053_v5 = vunpack.c.h.s8.bf16 %v904_v20  ;;  %v1055_v25 = vunpack.c.h.s8.bf16 %v906_v28  ;;  %v947_v20 = vld [vmem:[#allocation2 + $0x1b8] sm:$0xff] }
 0x463   :  { %1346 = vmatprep.subr.bf16.mxu0 %v1242_v62  ;;  %1432 = vmatprep.subr.bf16.mxu1 %v1244_v15  ;;  %v1062_v62 = vunpack.c.l.s8.bf16 %v913_v18  ;;  %v1064_v15 = vunpack.c.l.s8.bf16 %v915_v26 }
 0x466   :  { %1347 = vmatpush1.bf16.msra.mxu0 %v1241_v29  ;;  %1433 = vmatpush1.bf16.msra.mxu1 %v1243_v6  ;;  %v1070_v6 = vunpack.c.h.s8.bf16 %v913_v18  ;;  %v946_v18 = vld [vmem:[#allocation2 + $0x1b0] sm:$0xff] }
 0x467   :  { %1348 = vmatprep.subr.bf16.mxu0 %v1250_v8  ;;  %1434 = vmatprep.subr.bf16.mxu1 %v1252_v63  ;;  %v1072_v8 = vunpack.c.h.s8.bf16 %v915_v26  ;;  %v921_v63 = vld [vmem:[#allocation2 + $0xe8] sm:$0xff] }
 0x46a   :  { %1349 = vmatpush1.bf16.msra.mxu0 %v1249_v19  ;;  %1435 = vmatpush1.bf16.msra.mxu1 %v1251_v27  ;;  %v1078_v27 = vunpack.c.l.s8.bf16 %v921_v63 }
 0x46b   :  { %1350 = vmatprep.subr.bf16.mxu0 %v1258_v31  ;;  %1436 = vmatprep.subr.bf16.mxu1 %v1260_v32  ;;  %v1080_v31 = vunpack.c.l.s8.bf16 %v923_v23  ;;  %v920_v32 = vld [vmem:[#allocation2 + $0xe0] sm:$0xff] }
 0x46c   :  { %v1077_v40 = vunpack.c.l.s8.bf16 %v920_v32  ;;  %v1085_v49 = vunpack.c.h.s8.bf16 %v920_v32  ;;  %v963_v32 = vld [vmem:[#allocation2 + $0x238] sm:$0xff] }
 0x46e   :  { %1351 = vmatpush1.bf16.msra.mxu0 %v1257_v35  ;;  %1437 = vmatpush1.bf16.msra.mxu1 %v1259_v37  ;;  %v1079_v35 = vunpack.c.l.s8.bf16 %v922_v33  ;;  %v1086_v37 = vunpack.c.h.s8.bf16 %v921_v63  ;;  %v954_v63 = vld [vmem:[#allocation2 + $0x1f0] sm:$0xff] }
 0x46f   :  { %1352 = vmatprep.subr.bf16.mxu0 %v1266_v38  ;;  %1438 = vmatprep.subr.bf16.mxu1 %v1268_v47  ;;  %v1088_v38 = vunpack.c.h.s8.bf16 %v923_v23  ;;  %v929_v47 = vld [vmem:[#allocation2 + $0x128] sm:$0xff] }
 0x472   :  { %1353 = vmatpush1.bf16.msra.mxu0 %v1265_v51  ;;  %1439 = vmatpush1.bf16.msra.mxu1 %v1267_v52  ;;  %v1087_v51 = vunpack.c.h.s8.bf16 %v922_v33  ;;  %v1094_v52 = vunpack.c.l.s8.bf16 %v929_v47 }
 0x473   :  { %1354 = vmatprep.subr.bf16.mxu0 %v1274_v53  ;;  %1440 = vmatprep.subr.bf16.mxu1 %v1276_v54  ;;  %v1096_v53 = vunpack.c.l.s8.bf16 %v931_v48  ;;  %v928_v54 = vld [vmem:[#allocation2 + $0x120] sm:$0xff] }
 0x474   :  { %v1093_v56 = vunpack.c.l.s8.bf16 %v928_v54  ;;  %v1101_v2 = vunpack.c.h.s8.bf16 %v928_v54  ;;  %v971_v54 = vld [vmem:[#allocation2 + $0x278] sm:$0xff] }
 0x476   :  { %1355 = vmatpush1.bf16.msra.mxu0 %v1273_v57  ;;  %1441 = vmatpush1.bf16.msra.mxu1 %v1275_v58  ;;  %v1095_v57 = vunpack.c.l.s8.bf16 %v930_v55  ;;  %v1102_v58 = vunpack.c.h.s8.bf16 %v929_v47  ;;  %v962_v47 = vld [vmem:[#allocation2 + $0x230] sm:$0xff] }
 0x477   :  { %1453 = vmatprep.subr.bf16.mxu0 %v1030_v59  ;;  %1539 = vmatprep.subr.bf16.mxu1 %v1032_v0  ;;  %v1104_v59 = vunpack.c.h.s8.bf16 %v931_v48  ;;  %v937_v0 = vld [vmem:[#allocation2 + $0x168] sm:$0xff] }
 0x479   :  { %1357 = vmatmul.mubr.bf16.vlgmr.msra.gmra.mrb[4].mxu0 %v4520_v39  ;;  %1443 = vmatmul.mubr.bf16.vlgmr.msra.gmra.mrb[12].mxu1 %v4520_v39 }
 0x47a   :  { %1454 = vmatpush1.bf16.msra.mxu0 %v1029_v3  ;;  %1540 = vmatpush1.bf16.msra.mxu1 %v1031_v34  ;;  %v1103_v3 = vunpack.c.h.s8.bf16 %v930_v55  ;;  %v1110_v34 = vunpack.c.l.s8.bf16 %v937_v0 }
 0x47b   :  { %1455 = vmatprep.subr.bf16.mxu0 %v1038_v9  ;;  %1541 = vmatprep.subr.bf16.mxu1 %v1040_v12  ;;  %v1112_v9 = vunpack.c.l.s8.bf16 %v939_v1  ;;  %v936_v12 = vld [vmem:[#allocation2 + $0x160] sm:$0xff] }
 0x47c   :  { %1485 = vmatprep.mubr.bf16.mxu0 %v4490_v30  ;;  %1571 = vmatprep.mubr.bf16.mxu1 %v4490_v30  ;;  %v914_v30 = vld [vmem:[#allocation2 + $0xb0] sm:$0xff]  ;;  %v1109_v13 = vunpack.c.l.s8.bf16 %v936_v12  ;;  %v1117_v28 = vunpack.c.h.s8.bf16 %v936_v12 }
 0x47d   :  { %v1063_v29 = vunpack.c.l.s8.bf16 %v914_v30  ;;  %v1071_v19 = vunpack.c.h.s8.bf16 %v914_v30 }
 0x47e   :  { %1456 = vmatpush1.bf16.msra.mxu0 %v1037_v24  ;;  %1542 = vmatpush1.bf16.msra.mxu1 %v1039_v14  ;;  %v1111_v24 = vunpack.c.l.s8.bf16 %v938_v36  ;;  %v1118_v14 = vunpack.c.h.s8.bf16 %v937_v0  ;;  %v970_v0 = vld [vmem:[#allocation2 + $0x270] sm:$0xff] }
 0x47f   :  { %1457 = vmatprep.subr.bf16.mxu0 %v1046_v10  ;;  %1543 = vmatprep.subr.bf16.mxu1 %v1048_v61  ;;  %v1120_v10 = vunpack.c.h.s8.bf16 %v939_v1  ;;  %v945_v61 = vld [vmem:[#allocation2 + $0x1a8] sm:$0xff] }
 0x482   :  { %1458 = vmatpush1.bf16.msra.mxu0 %v1045_v4  ;;  %1544 = vmatpush1.bf16.msra.mxu1 %v1047_v11  ;;  %v1119_v4 = vunpack.c.h.s8.bf16 %v938_v36  ;;  %v1126_v11 = vunpack.c.l.s8.bf16 %v945_v61  ;;  %v1183_v36 = vunpack.c.h.s8.bf16 %v970_v0 }
 0x483   :  { %1459 = vmatprep.subr.bf16.mxu0 %v1054_v22  ;;  %1545 = vmatprep.subr.bf16.mxu1 %v1056_v60  ;;  %v1128_v22 = vunpack.c.l.s8.bf16 %v947_v20  ;;  %v944_v60 = vld [vmem:[#allocation2 + $0x1a0] sm:$0xff] }
 0x484   :  { %v1125_v26 = vunpack.c.l.s8.bf16 %v944_v60  ;;  %v1133_v30 = vunpack.c.h.s8.bf16 %v944_v60 }
 0x486   :  { %1460 = vmatpush1.bf16.msra.mxu0 %v1053_v5  ;;  %1546 = vmatpush1.bf16.msra.mxu1 %v1055_v25  ;;  %v1127_v5 = vunpack.c.l.s8.bf16 %v946_v18  ;;  %v1134_v25 = vunpack.c.h.s8.bf16 %v945_v61 }
 0x487   :  { %1461 = vmatprep.subr.bf16.mxu0 %v1062_v62  ;;  %1547 = vmatprep.subr.bf16.mxu1 %v1064_v15  ;;  %v1136_v62 = vunpack.c.h.s8.bf16 %v947_v20  ;;  %v953_v15 = vld [vmem:[#allocation2 + $0x1e8] sm:$0xff] }
 0x48a   :  { %1462 = vmatpush1.bf16.msra.mxu0 %v1061_v21  ;;  %1548 = vmatpush1.bf16.msra.mxu1 %v1063_v29  ;;  %v1135_v21 = vunpack.c.h.s8.bf16 %v946_v18  ;;  %v1142_v29 = vunpack.c.l.s8.bf16 %v953_v15 }
 0x48b   :  { %1463 = vmatprep.subr.bf16.mxu0 %v1070_v6  ;;  %1549 = vmatprep.subr.bf16.mxu1 %v1072_v8  ;;  %v1144_v6 = vunpack.c.l.s8.bf16 %v955_v17  ;;  %v952_v8 = vld [vmem:[#allocation2 + $0x1e0] sm:$0xff] }
 0x48c   :  { %v1141_v23 = vunpack.c.l.s8.bf16 %v952_v8  ;;  %v1149_v33 = vunpack.c.h.s8.bf16 %v952_v8 }
 0x48e   :  { %1464 = vmatpush1.bf16.msra.mxu0 %v1069_v16  ;;  %1550 = vmatpush1.bf16.msra.mxu1 %v1071_v19  ;;  %v1143_v16 = vunpack.c.l.s8.bf16 %v954_v63  ;;  %v1150_v19 = vunpack.c.h.s8.bf16 %v953_v15 }
 0x48f   :  { %1465 = vmatprep.subr.bf16.mxu0 %v1078_v27  ;;  %1551 = vmatprep.subr.bf16.mxu1 %v1080_v31  ;;  %v1152_v27 = vunpack.c.h.s8.bf16 %v955_v17  ;;  %v961_v31 = vld [vmem:[#allocation2 + $0x228] sm:$0xff] }
 0x492   :  { %1466 = vmatpush1.bf16.msra.mxu0 %v1077_v40  ;;  %1552 = vmatpush1.bf16.msra.mxu1 %v1079_v35  ;;  %v1151_v40 = vunpack.c.h.s8.bf16 %v954_v63  ;;  %v1158_v35 = vunpack.c.l.s8.bf16 %v961_v31 }
 0x493   :  { %1467 = vmatprep.subr.bf16.mxu0 %v1086_v37  ;;  %1553 = vmatprep.subr.bf16.mxu1 %v1088_v38  ;;  %v1160_v37 = vunpack.c.l.s8.bf16 %v963_v32  ;;  %v960_v38 = vld [vmem:[#allocation2 + $0x220] sm:$0xff] }
 0x494   :  { %v1157_v48 = vunpack.c.l.s8.bf16 %v960_v38  ;;  %v1165_v55 = vunpack.c.h.s8.bf16 %v960_v38 }
 0x496   :  { %1468 = vmatpush1.bf16.msra.mxu0 %v1085_v49  ;;  %1554 = vmatpush1.bf16.msra.mxu1 %v1087_v51  ;;  %v1159_v49 = vunpack.c.l.s8.bf16 %v962_v47  ;;  %v1166_v51 = vunpack.c.h.s8.bf16 %v961_v31 }
 0x497   :  { %1469 = vmatprep.subr.bf16.mxu0 %v1094_v52  ;;  %1555 = vmatprep.subr.bf16.mxu1 %v1096_v53  ;;  %v1168_v52 = vunpack.c.h.s8.bf16 %v963_v32  ;;  %v969_v53 = vld [vmem:[#allocation2 + $0x268] sm:$0xff] }
 0x49a   :  { %1470 = vmatpush1.bf16.msra.mxu0 %v1093_v56  ;;  %1556 = vmatpush1.bf16.msra.mxu1 %v1095_v57  ;;  %v1167_v56 = vunpack.c.h.s8.bf16 %v962_v47  ;;  %v1174_v57 = vunpack.c.l.s8.bf16 %v969_v53 }
 0x49b   :  { %1471 = vmatprep.subr.bf16.mxu0 %v1102_v58  ;;  %1557 = vmatprep.subr.bf16.mxu1 %v1104_v59  ;;  %v1176_v58 = vunpack.c.l.s8.bf16 %v971_v54  ;;  %v968_v59 = vld [vmem:[#allocation2 + $0x260] sm:$0xff] }
 0x49c   :  { %v1173_v1 = vunpack.c.l.s8.bf16 %v968_v59  ;;  %v1181_v12 = vunpack.c.h.s8.bf16 %v968_v59 }
 0x49e   :  { %1472 = vmatpush1.bf16.msra.mxu0 %v1101_v2  ;;  %1558 = vmatpush1.bf16.msra.mxu1 %v1103_v3  ;;  %v1175_v2 = vunpack.c.l.s8.bf16 %v970_v0  ;;  %v1184_v3 = vunpack.c.h.s8.bf16 %v971_v54 }
 0x49f   :  { %1473 = vmatprep.subr.bf16.mxu0 %v1110_v34  ;;  %1559 = vmatprep.subr.bf16.mxu1 %v1112_v9  ;;  %v977_v34 = vld [vmem:[#allocation2 + $0x2a8] sm:$0xff]  ;;  %v979_v9 = vld [vmem:[#allocation2 + $0x2b8] sm:$0xff] }
 0x4a0   :  { %v1198_v20 = vunpack.c.h.s8.bf16 %v977_v34 }
 0x4a2   :  { %1474 = vmatpush1.bf16.msra.mxu0 %v1109_v13  ;;  %1560 = vmatpush1.bf16.msra.mxu1 %v1111_v24  ;;  %v1190_v13 = vunpack.c.l.s8.bf16 %v977_v34  ;;  %v1192_v24 = vunpack.c.l.s8.bf16 %v979_v9 }
 0x4a3   :  { %1475 = vmatprep.subr.bf16.mxu0 %v1118_v14  ;;  %1561 = vmatprep.subr.bf16.mxu1 %v1120_v10  ;;  %v976_v14 = vld [vmem:[#allocation2 + $0x2a0] sm:$0xff] }
 0x4a4   :  { %v1189_v10 = vunpack.c.l.s8.bf16 %v976_v14 }
 0x4a6   :  { %1476 = vmatpush1.bf16.msra.mxu0 %v1117_v28  ;;  %1562 = vmatpush1.bf16.msra.mxu1 %v1119_v4  ;;  %v1200_v28 = vunpack.c.h.s8.bf16 %v979_v9  ;;  %v985_v4 = vld [vmem:[#allocation2 + $0x2e8] sm:$0xff] }
 0x4a7   :  { %1477 = vmatprep.subr.bf16.mxu0 %v1126_v11  ;;  %1563 = vmatprep.subr.bf16.mxu1 %v1128_v22  ;;  %v987_v11 = vld [vmem:[#allocation2 + $0x2f8] sm:$0xff]  ;;  %v1197_v22 = vunpack.c.h.s8.bf16 %v976_v14  ;;  %v1206_v18 = vunpack.c.l.s8.bf16 %v985_v4  ;;  %v1214_v17 = vunpack.c.h.s8.bf16 %v985_v4 }
 0x4aa   :  { %1478 = vmatpush1.bf16.msra.mxu0 %v1125_v26  ;;  %1564 = vmatpush1.bf16.msra.mxu1 %v1127_v5  ;;  %v1208_v26 = vunpack.c.l.s8.bf16 %v987_v11  ;;  %v984_v5 = vld [vmem:[#allocation2 + $0x2e0] sm:$0xff] }
 0x4ab   :  { %1479 = vmatprep.subr.bf16.mxu0 %v1134_v25  ;;  %1565 = vmatprep.subr.bf16.mxu1 %v1136_v62  ;;  %v986_v25 = vld [vmem:[#allocation2 + $0x2f0] sm:$0xff]  ;;  %v1205_v62 = vunpack.c.l.s8.bf16 %v984_v5 }
 0x4ac   :  { %v1207_v15 = vunpack.c.l.s8.bf16 %v986_v25  ;;  %v1215_v8 = vunpack.c.h.s8.bf16 %v986_v25 }
 0x4ae   :  { %1480 = vmatpush1.bf16.msra.mxu0 %v1133_v30  ;;  %1566 = vmatpush1.bf16.msra.mxu1 %v1135_v21  ;;  %v1216_v30 = vunpack.c.h.s8.bf16 %v987_v11  ;;  %v993_v21 = vld [vmem:[#allocation2 + $0x328] sm:$0xff] }
 0x4af   :  { %1481 = vmatprep.subr.bf16.mxu0 %v1142_v29  ;;  %1567 = vmatprep.subr.bf16.mxu1 %v1144_v6  ;;  %v995_v29 = vld [vmem:[#allocation2 + $0x338] sm:$0xff]  ;;  %v1213_v6 = vunpack.c.h.s8.bf16 %v984_v5  ;;  %v1222_v63 = vunpack.c.l.s8.bf16 %v993_v21  ;;  %v1230_v32 = vunpack.c.h.s8.bf16 %v993_v21 }
 0x4b2   :  { %1482 = vmatpush1.bf16.msra.mxu0 %v1141_v23  ;;  %1568 = vmatpush1.bf16.msra.mxu1 %v1143_v16  ;;  %v1224_v23 = vunpack.c.l.s8.bf16 %v995_v29  ;;  %v992_v16 = vld [vmem:[#allocation2 + $0x320] sm:$0xff] }
 0x4b3   :  { %1483 = vmatprep.subr.bf16.mxu0 %v1150_v19  ;;  %1569 = vmatprep.subr.bf16.mxu1 %v1152_v27  ;;  %v994_v19 = vld [vmem:[#allocation2 + $0x330] sm:$0xff]  ;;  %v1221_v27 = vunpack.c.l.s8.bf16 %v992_v16 }
 0x4b4   :  { %v1223_v31 = vunpack.c.l.s8.bf16 %v994_v19  ;;  %v1231_v38 = vunpack.c.h.s8.bf16 %v994_v19 }
 0x4b6   :  { %1484 = vmatpush1.bf16.msra.mxu0 %v1149_v33  ;;  %1570 = vmatpush1.bf16.msra.mxu1 %v1151_v40  ;;  %v1232_v33 = vunpack.c.h.s8.bf16 %v995_v29  ;;  %v1001_v40 = vld [vmem:[#allocation2 + $0x368] sm:$0xff] }
 0x4b7   :  { %1496 = vmatprep.subr.bf16.mxu0 %v1158_v35  ;;  %1582 = vmatprep.subr.bf16.mxu1 %v1160_v37  ;;  %v1003_v35 = vld [vmem:[#allocation2 + $0x378] sm:$0xff]  ;;  %v1229_v37 = vunpack.c.h.s8.bf16 %v992_v16  ;;  %v1238_v47 = vunpack.c.l.s8.bf16 %v1001_v40  ;;  %v1246_v54 = vunpack.c.h.s8.bf16 %v1001_v40  ;;  %v4532_v29 = vld [vmem:[#allocation13 + $0x39] sm:$0xff] }
 0x4b8   :  { %v1633_v16 = vrot.slane %v4532_v29, %v4302_v46  ;;  %v1641_v19 = vrot.slane %v4532_v29, %v4390_v45 }
 0x4b9   :  { %1486 = vmatmul.mubr.bf16.vlgmr.msra.gmra.mrb[8].mxu0 %v4500_v42  ;;  %1572 = vmatmul.mubr.bf16.vlgmr.msra.gmra.mrb[16].mxu1 %v4500_v42  ;;  %v1182_v42 = vunpack.c.h.s8.bf16 %v969_v53 }
 0x4ba   :  { %1497 = vmatpush1.bf16.msra.mxu0 %v1157_v48  ;;  %1583 = vmatpush1.bf16.msra.mxu1 %v1159_v49  ;;  %v1240_v48 = vunpack.c.l.s8.bf16 %v1003_v35  ;;  %v1000_v49 = vld [vmem:[#allocation2 + $0x360] sm:$0xff] }
 0x4bb   :  { %1498 = vmatprep.subr.bf16.mxu0 %v1166_v51  ;;  %1584 = vmatprep.subr.bf16.mxu1 %v1168_v52  ;;  %v1002_v51 = vld [vmem:[#allocation2 + $0x370] sm:$0xff]  ;;  %v1237_v52 = vunpack.c.l.s8.bf16 %v1000_v49 }
 0x4bc   :  { %1528 = vmatprep.mubr.bf16.mxu0 %v4508_v7  ;;  %1614 = vmatprep.mubr.bf16.mxu1 %v4508_v7  ;;  %v978_v7 = vld [vmem:[#allocation2 + $0x2b0] sm:$0xff]  ;;  %v1239_v53 = vunpack.c.l.s8.bf16 %v1002_v51  ;;  %v1247_v59 = vunpack.c.h.s8.bf16 %v1002_v51 }
 0x4bd   :  { %v1191_v61 = vunpack.c.l.s8.bf16 %v978_v7  ;;  %v1199_v60 = vunpack.c.h.s8.bf16 %v978_v7 }
 0x4be   :  { %1499 = vmatpush1.bf16.msra.mxu0 %v1165_v55  ;;  %1585 = vmatpush1.bf16.msra.mxu1 %v1167_v56  ;;  %v1248_v55 = vunpack.c.h.s8.bf16 %v1003_v35  ;;  %v1009_v56 = vld [vmem:[#allocation2 + $0x3a8] sm:$0xff] }
 0x4bf   :  { %1500 = vmatprep.subr.bf16.mxu0 %v1174_v57  ;;  %1586 = vmatprep.subr.bf16.mxu1 %v1176_v58  ;;  %v1011_v57 = vld [vmem:[#allocation2 + $0x3b8] sm:$0xff]  ;;  %v1245_v58 = vunpack.c.h.s8.bf16 %v1000_v49  ;;  %v1254_v0 = vunpack.c.l.s8.bf16 %v1009_v56  ;;  %v1262_v9 = vunpack.c.h.s8.bf16 %v1009_v56 }
 0x4c2   :  { %1501 = vmatpush1.bf16.msra.mxu0 %v1173_v1  ;;  %1587 = vmatpush1.bf16.msra.mxu1 %v1175_v2  ;;  %v1256_v1 = vunpack.c.l.s8.bf16 %v1011_v57  ;;  %v1008_v2 = vld [vmem:[#allocation2 + $0x3a0] sm:$0xff] }
 0x4c3   :  { %1502 = vmatprep.subr.bf16.mxu0 %v1182_v42  ;;  %1588 = vmatprep.subr.bf16.mxu1 %v1184_v3  ;;  %v1010_v42 = vld [vmem:[#allocation2 + $0x3b0] sm:$0xff]  ;;  %v1253_v3 = vunpack.c.l.s8.bf16 %v1008_v2 }
 0x4c4   :  { %v1255_v34 = vunpack.c.l.s8.bf16 %v1010_v42  ;;  %v1263_v14 = vunpack.c.h.s8.bf16 %v1010_v42 }
 0x4c6   :  { %1503 = vmatpush1.bf16.msra.mxu0 %v1181_v12  ;;  %1589 = vmatpush1.bf16.msra.mxu1 %v1183_v36  ;;  %v1264_v12 = vunpack.c.h.s8.bf16 %v1011_v57  ;;  %v1017_v36 = vld [vmem:[#allocation2 + $0x3e8] sm:$0xff] }
 0x4c7   :  { %1504 = vmatprep.subr.bf16.mxu0 %v1190_v13  ;;  %1590 = vmatprep.subr.bf16.mxu1 %v1192_v24  ;;  %v1019_v13 = vld [vmem:[#allocation2 + $0x3f8] sm:$0xff]  ;;  %v1261_v24 = vunpack.c.h.s8.bf16 %v1008_v2  ;;  %v1270_v7 = vunpack.c.l.s8.bf16 %v1017_v36  ;;  %v1278_v11 = vunpack.c.h.s8.bf16 %v1017_v36 }
 0x4ca   :  { %1505 = vmatpush1.bf16.msra.mxu0 %v1189_v10  ;;  %1591 = vmatpush1.bf16.msra.mxu1 %v1191_v61  ;;  %v1272_v10 = vunpack.c.l.s8.bf16 %v1019_v13  ;;  %v1016_v61 = vld [vmem:[#allocation2 + $0x3e0] sm:$0xff] }
 0x4cb   :  { %1506 = vmatprep.subr.bf16.mxu0 %v1198_v20  ;;  %1592 = vmatprep.subr.bf16.mxu1 %v1200_v28  ;;  %v1018_v20 = vld [vmem:[#allocation2 + $0x3f0] sm:$0xff]  ;;  %v1269_v28 = vunpack.c.l.s8.bf16 %v1016_v61 }
 0x4cc   :  { %v1271_v4 = vunpack.c.l.s8.bf16 %v1018_v20 }
 0x4ce   :  { %1507 = vmatpush1.bf16.msra.mxu0 %v1197_v22  ;;  %1593 = vmatpush1.bf16.msra.mxu1 %v1199_v60  ;;  %v1280_v22 = vunpack.c.h.s8.bf16 %v1019_v13  ;;  %v1277_v60 = vunpack.c.h.s8.bf16 %v1016_v61 }
 0x4cf   :  { %1508 = vmatprep.subr.bf16.mxu0 %v1206_v18  ;;  %1594 = vmatprep.subr.bf16.mxu1 %v1208_v26  ;;  %v1279_v18 = vunpack.c.h.s8.bf16 %v1018_v20 }
 0x4d2   :  { %1509 = vmatpush1.bf16.msra.mxu0 %v1205_v62  ;;  %1595 = vmatpush1.bf16.msra.mxu1 %v1207_v15 }
 0x4d3   :  { %1510 = vmatprep.subr.bf16.mxu0 %v1214_v17  ;;  %1596 = vmatprep.subr.bf16.mxu1 %v1216_v30 }
 0x4d6   :  { %1511 = vmatpush1.bf16.msra.mxu0 %v1213_v6  ;;  %1597 = vmatpush1.bf16.msra.mxu1 %v1215_v8  ;;  %v1629_v6 = vrot.slane %v4532_v29, %v4299_v44  ;;  %v1637_v8 = vrot.slane %v4532_v29, %v4385_v41 }
 0x4d7   :  { %1512 = vmatprep.subr.bf16.mxu0 %v1222_v63  ;;  %1598 = vmatprep.subr.bf16.mxu1 %v1224_v23  ;;  %v4538_v63 = vld [vmem:[#allocation13 + $0x13] sm:$0xff] }
 0x4d8   :  { %v1699_v51 = vrot.slane %v4538_v63, %v4390_v45 }
 0x4da   :  { %1513 = vmatpush1.bf16.msra.mxu0 %v1221_v27  ;;  %1599 = vmatpush1.bf16.msra.mxu1 %v1223_v31  ;;  %v1687_v31 = vrot.slane %v4538_v63, %v4299_v44 }
 0x4db   :  { %1514 = vmatprep.subr.bf16.mxu0 %v1230_v32  ;;  %1600 = vmatprep.subr.bf16.mxu1 %v1232_v33  ;;  %v1695_v33 = vrot.slane %v4538_v63, %v4385_v41 }
 0x4de   :  { %1515 = vmatpush1.bf16.msra.mxu0 %v1229_v37  ;;  %1601 = vmatpush1.bf16.msra.mxu1 %v1231_v38 }
 0x4df   :  { %1516 = vmatprep.subr.bf16.mxu0 %v1238_v47  ;;  %1602 = vmatprep.subr.bf16.mxu1 %v1240_v48  ;;  %v1691_v48 = vrot.slane %v4538_v63, %v4302_v46 }
 0x4e2   :  { %1517 = vmatpush1.bf16.msra.mxu0 %v1237_v52  ;;  %1603 = vmatpush1.bf16.msra.mxu1 %v1239_v53 }
 0x4e3   :  { %1518 = vmatprep.subr.bf16.mxu0 %v1246_v54  ;;  %1604 = vmatprep.subr.bf16.mxu1 %v1248_v55 }
 0x4e6   :  { %1519 = vmatpush1.bf16.msra.mxu0 %v1245_v58  ;;  %1605 = vmatpush1.bf16.msra.mxu1 %v1247_v59 }
 0x4e7   :  { %1520 = vmatprep.subr.bf16.mxu0 %v1254_v0  ;;  %1606 = vmatprep.subr.bf16.mxu1 %v1256_v1 }
 0x4ea   :  { %1521 = vmatpush1.bf16.msra.mxu0 %v1253_v3  ;;  %1607 = vmatpush1.bf16.msra.mxu1 %v1255_v34 }
 0x4eb   :  { %1522 = vmatprep.subr.bf16.mxu0 %v1262_v9  ;;  %1608 = vmatprep.subr.bf16.mxu1 %v1264_v12 }
 0x4ee   :  { %1523 = vmatpush1.bf16.msra.mxu0 %v1261_v24  ;;  %1609 = vmatpush1.bf16.msra.mxu1 %v1263_v14 }
 0x4ef   :  { %1524 = vmatprep.subr.bf16.mxu0 %v1270_v7  ;;  %1610 = vmatprep.subr.bf16.mxu1 %v1272_v10 }
 0x4f2   :  { %1525 = vmatpush1.bf16.msra.mxu0 %v1269_v28  ;;  %1611 = vmatpush1.bf16.msra.mxu1 %v1271_v4 }
 0x4f3   :  { %1526 = vmatprep.subr.bf16.mxu0 %v1278_v11  ;;  %1612 = vmatprep.subr.bf16.mxu1 %v1280_v22 }
 0x4f6   :  { %1527 = vmatpush1.bf16.msra.mxu0 %v1277_v60  ;;  %1613 = vmatpush1.bf16.msra.mxu1 %v1279_v18 }
 0x4f9   :  { %1529 = vmatmul.mubr.bf16.vlgmr.msra.gmra.mrb[8].mxu0 %v4520_v39  ;;  %1615 = vmatmul.mubr.bf16.vlgmr.msra.gmra.mrb[16].mxu1 %v4520_v39 }
 0x54c   :  { %v1358_v26 = vpop.f32.mrb[4].mxu0  ;;  %v1444_v5 = vpop.f32.mrb[12].mxu1 }
 0x54d   :  { %v1360_v25 = vpop.f32.mrb[5].mxu0  ;;  %v1446_v62 = vpop.f32.mrb[13].mxu1  ;;  %v1666_v27 = vmul.f32 %v1629_v6, %v1358_v26  ;;  %v1668_v32 = vmul.f32 %v1637_v8, %v1444_v5 }
 0x54e   :  { %v1362_v15 = vpop.f32.mrb[6].mxu0  ;;  %v1448_v17 = vpop.f32.mrb[14].mxu1  ;;  %v1667_v47 = vmul.f32 %v1633_v16, %v1360_v25  ;;  %v1669_v49 = vmul.f32 %v1641_v19, %v1446_v62 }
 0x54f   :  { %v1364_v30 = vpop.f32.mrb[7].mxu0  ;;  %v1450_v21 = vpop.f32.mrb[15].mxu1  ;;  %v1674_v23 = vmul.f32 %v1629_v6, %v1362_v15  ;;  %v1676_v39 = vmul.f32 %v1637_v8, %v1448_v17  ;;  %v4556_v52 = vadd.f32 %v1687_v31, %v1666_v27  ;;  %v4558_v53 = vadd.f32 %v1695_v33, %v1668_v32 }
 0x550   :  { %v1675_v40 = vmul.f32 %v1633_v16, %v1364_v30  ;;  %v1677_v35 = vmul.f32 %v1641_v19, %v1450_v21  ;;  %v4568_v58 = vadd.f32 %v1691_v48, %v1667_v47  ;;  %v4570_v59 = vadd.f32 %v1699_v51, %v1669_v49 }
 0x551   :  { %v4548_v37 = vadd.f32 %v1687_v31, %v1674_v23  ;;  %v4550_v38 = vadd.f32 %v1695_v33, %v1676_v39  ;;  %v4601_v47 = vsub.s32 4, %v4296_v43  ;;  %v4607_v49 = vsub.s32 5, %v4296_v43 }
 0x552   :  { %v4560_v54 = vadd.f32 %v1691_v48, %v1675_v40  ;;  %v4562_v55 = vadd.f32 %v1699_v51, %v1677_v35  ;;  %v4604_v48 = vsub.s32 6, %v4296_v43  ;;  %v4610_v51 = vsub.s32 7, %v4296_v43 }
 0x553   :  { %v1742_v56 = vadd.f32 %v4548_v37, %v4556_v52  ;;  %v1756_v57 = vadd.f32 %v4550_v38, %v4558_v53 }
 0x554   :  { %v1749_v0 = vadd.f32 %v4560_v54, %v4568_v58  ;;  %v1763_v1 = vadd.f32 %v4562_v55, %v4570_v59 }
 0x555   :  { %v1743_v2 = vrot.slane %v1742_v56, 4  ;;  %v1757_v42 = vrot.slane %v1756_v57, 4 }
 0x556   :  { %v1750_v3 = vrot.slane %v1749_v0, 4  ;;  %v1764_v34 = vrot.slane %v1763_v1, 4 }
 0x557   :  { %v1744_v9 = vadd.f32 %v1743_v2, %v1742_v56  ;;  %v1758_v12 = vadd.f32 %v1757_v42, %v1756_v57 }
 0x558   :  { %v1751_v36 = vadd.f32 %v1750_v3, %v1749_v0  ;;  %v1765_v13 = vadd.f32 %v1764_v34, %v1763_v1  ;;  %v1645_v3 = vrot.slane %v4532_v29, %v4601_v47  ;;  %v1653_v34 = vrot.slane %v4532_v29, %v4604_v48 }
 0x559   :  { %v1745_v24 = vrot.slane %v1744_v9, 2  ;;  %v1759_v14 = vrot.slane %v1758_v12, 2 }
 0x55a   :  { %v1752_v7 = vrot.slane %v1751_v36, 2  ;;  %v1766_v10 = vrot.slane %v1765_v13, 2 }
 0x55b   :  { %v1746_v61 = vadd.f32 %v1745_v24, %v1744_v9  ;;  %v1760_v20 = vadd.f32 %v1759_v14, %v1758_v12  ;;  %v1649_v9 = vrot.slane %v4532_v29, %v4607_v49  ;;  %v1657_v12 = vrot.slane %v4532_v29, %v4610_v51 }
 0x55c   :  { %v1753_v28 = vadd.f32 %v1752_v7, %v1751_v36  ;;  %v1767_v4 = vadd.f32 %v1766_v10, %v1765_v13  ;;  %v1707_v29 = vrot.slane %v4538_v63, %v4607_v49 }
 0x55d   :  { %v1747_v11 = vrot.slane %v1746_v61, 1  ;;  %v1761_v22 = vrot.slane %v1760_v20, 1 }
 0x55e   :  { %v1754_v60 = vrot.slane %v1753_v28, 1  ;;  %v1768_v18 = vrot.slane %v1767_v4, 1 }
 0x55f   :  { %v1748_v26 = vadd.f32 %v1747_v11, %v1746_v61  ;;  %v1762_v5 = vadd.f32 %v1761_v22, %v1760_v20  ;;  %v1703_v61 = vrot.slane %v4538_v63, %v4601_v47 }
 0x560   :  { %v1755_v25 = vadd.f32 %v1754_v60, %v1753_v28  ;;  %v1769_v62 = vadd.f32 %v1768_v18, %v1767_v4  ;;  %v1711_v28 = vrot.slane %v4538_v63, %v4604_v48  ;;  %v1715_v18 = vrot.slane %v4538_v63, %v4610_v51 }
 0x561   :  { %v4576_v15 = vmul.f32 0.0625, %v1748_v26  ;;  %v4578_v17 = vmul.f32 0.0625, %v1762_v5 }
 0x562   :  { %v4580_v30 = vmul.f32 0.0625, %v1755_v25  ;;  %v4582_v21 = vmul.f32 0.0625, %v1769_v62 }
 0x563   :  { %v1806_v6 = vsub.f32 %v4556_v52, %v4576_v15  ;;  %v1814_v8 = vsub.f32 %v4548_v37, %v4576_v15  ;;  %v1808_v23 = vsub.f32 %v4558_v53, %v4578_v17  ;;  %v1816_v39 = vsub.f32 %v4550_v38, %v4578_v17 }
 0x564   :  { %v1807_v16 = vsub.f32 %v4568_v58, %v4580_v30  ;;  %v1815_v19 = vsub.f32 %v4560_v54, %v4580_v30  ;;  %v1809_v27 = vsub.f32 %v4570_v59, %v4582_v21  ;;  %v1817_v31 = vsub.f32 %v4562_v55, %v4582_v21 }
 0x565   :  { %v1822_v32 = vmul.f32 %v1806_v6, %v1806_v6  ;;  %v1830_v33 = vmul.f32 %v1814_v8, %v1814_v8  ;;  %v1824_v40 = vmul.f32 %v1808_v23, %v1808_v23  ;;  %v1832_v35 = vmul.f32 %v1816_v39, %v1816_v39 }
 0x566   :  { %v1823_v56 = vmul.f32 %v1807_v16, %v1807_v16  ;;  %v1831_v57 = vmul.f32 %v1815_v19, %v1815_v19  ;;  %v1825_v0 = vmul.f32 %v1809_v27, %v1809_v27  ;;  %v1833_v1 = vmul.f32 %v1817_v31, %v1817_v31 }
 0x567   :  { %v1838_v2 = vadd.f32 %v1830_v33, %v1822_v32  ;;  %v1852_v42 = vadd.f32 %v1832_v35, %v1824_v40 }
 0x568   :  { %v1845_v43 = vadd.f32 %v1831_v57, %v1823_v56  ;;  %v1859_v36 = vadd.f32 %v1833_v1, %v1825_v0 }
 0x569   :  { %v1839_v13 = vrot.slane %v1838_v2, 4  ;;  %v1853_v24 = vrot.slane %v1852_v42, 4 }
 0x56a   :  { %v1846_v25 = vrot.slane %v1845_v43, 4  ;;  %v1860_v62 = vrot.slane %v1859_v36, 4 }
 0x56b   :  { %v1840_v16 = vadd.f32 %v1839_v13, %v1838_v2  ;;  %v1854_v19 = vadd.f32 %v1853_v24, %v1852_v42 }
 0x56d   :  { %v1841_v24 = vrot.slane %v1840_v16, 2 }
 0x5cc   :  { %v1530_v14 = vpop.f32.mrb[8].mxu0  ;;  %v1616_v7 = vpop.f32.mrb[16].mxu1 }
 0x5cd   :  { %v1670_v10 = vmul.f32 %v1645_v3, %v1530_v14  ;;  %v1672_v20 = vmul.f32 %v1653_v34, %v1616_v7  ;;  %v1532_v4 = vpop.f32.mrb[9].mxu0  ;;  %v1618_v11 = vpop.f32.mrb[17].mxu1  ;;  %v1855_v14 = vrot.slane %v1854_v19, 2 }
 0x5ce   :  { %v1671_v22 = vmul.f32 %v1649_v9, %v1532_v4  ;;  %v1673_v60 = vmul.f32 %v1657_v12, %v1618_v11  ;;  %v1534_v26 = vpop.f32.mrb[10].mxu0  ;;  %v1620_v5 = vpop.f32.mrb[18].mxu1 }
 0x5cf   :  { %v1678_v6 = vmul.f32 %v1645_v3, %v1534_v26  ;;  %v1680_v8 = vmul.f32 %v1653_v34, %v1620_v5  ;;  %v1536_v23 = vpop.f32.mrb[11].mxu0  ;;  %v1622_v39 = vpop.f32.mrb[19].mxu1  ;;  %v4628_v32 = vadd.f32 %v1703_v61, %v1670_v10  ;;  %v4630_v33 = vadd.f32 %v1711_v28, %v1672_v20 }
 0x5d0   :  { %v1679_v27 = vmul.f32 %v1649_v9, %v1536_v23  ;;  %v1681_v31 = vmul.f32 %v1657_v12, %v1622_v39  ;;  %v4636_v63 = vadd.f32 %v1707_v29, %v1671_v22  ;;  %v4638_v56 = vadd.f32 %v1715_v18, %v1673_v60 }
 0x5d1   :  { %v4632_v40 = vadd.f32 %v1703_v61, %v1678_v6  ;;  %v4634_v35 = vadd.f32 %v1711_v28, %v1680_v8  ;;  %v1847_v34 = vadd.f32 %v1846_v25, %v1845_v43  ;;  %v1861_v9 = vadd.f32 %v1860_v62, %v1859_v36 }
 0x5d2   :  { %v4640_v57 = vadd.f32 %v1707_v29, %v1679_v27  ;;  %v4642_v0 = vadd.f32 %v1715_v18, %v1681_v31  ;;  %v1842_v18 = vadd.f32 %v1841_v24, %v1840_v16  ;;  %v1856_v26 = vadd.f32 %v1855_v14, %v1854_v19 }
 0x5d3   :  { %4971 = vst [vmem:[#allocation27_spill] sm:$0xff] %v4634_v35  ;;  %v1770_v1 = vadd.f32 %v4632_v40, %v4628_v32  ;;  %v1784_v2 = vadd.f32 %v4634_v35, %v4630_v33  ;;  %v1848_v11 = vrot.slane %v1847_v34, 2  ;;  %v1862_v22 = vrot.slane %v1861_v9, 2 }
 0x5d4   :  { %4972 = vst [vmem:[#allocation28_spill] sm:$0xff] %v4640_v57  ;;  %4973 = vst [vmem:[#allocation29_spill] sm:$0xff] %v4642_v0  ;;  %v1777_v42 = vadd.f32 %v4640_v57, %v4636_v63  ;;  %v1791_v3 = vadd.f32 %v4642_v0, %v4638_v56  ;;  %v1843_v31 = vrot.slane %v1842_v18, 1 }
 0x5d5   :  { %v1771_v12 = vrot.slane %v1770_v1, 4  ;;  %v1785_v13 = vrot.slane %v1784_v2, 4  ;;  %v1849_v8 = vadd.f32 %v1848_v11, %v1847_v34  ;;  %v1863_v23 = vadd.f32 %v1862_v22, %v1861_v9 }
 0x5d6   :  { %v1778_v7 = vrot.slane %v1777_v42, 4  ;;  %v1792_v10 = vrot.slane %v1791_v3, 4 }
 0x5d7   :  { %v1772_v61 = vadd.f32 %v1771_v12, %v1770_v1  ;;  %v1786_v20 = vadd.f32 %v1785_v13, %v1784_v2  ;;  %v1857_v1 = vrot.slane %v1856_v26, 1  ;;  %v1850_v16 = vrot.slane %v1849_v8, 1 }
 0x5d8   :  { %v1779_v28 = vadd.f32 %v1778_v7, %v1777_v42  ;;  %v1793_v4 = vadd.f32 %v1792_v10, %v1791_v3  ;;  %v1864_v19 = vrot.slane %v1863_v23, 1  ;;  %v1844_v10 = vadd.f32 %v1843_v31, %v1842_v18 }
 0x5d9   :  { %v1773_v29 = vrot.slane %v1772_v61, 2  ;;  %v1787_v60 = vrot.slane %v1786_v20, 2 }
 0x5da   :  { %v1780_v5 = vrot.slane %v1779_v28, 2  ;;  %v1794_v6 = vrot.slane %v1793_v4, 2 }
 0x5db   :  { %v1774_v43 = vadd.f32 %v1773_v29, %v1772_v61  ;;  %v1788_v36 = vadd.f32 %v1787_v60, %v1786_v20  ;;  %v1858_v61 = vadd.f32 %v1857_v1, %v1856_v26 }
 0x5dc   :  { %v1781_v25 = vadd.f32 %v1780_v5, %v1779_v28  ;;  %v1795_v62 = vadd.f32 %v1794_v6, %v1793_v4 }
 0x5dd   :  { %v1775_v39 = vrot.slane %v1774_v43, 1  ;;  %v1789_v27 = vrot.slane %v1788_v36, 1 }
 0x5de   :  { %v1782_v2 = vrot.slane %v1781_v25, 1  ;;  %v1796_v42 = vrot.slane %v1795_v62, 1 }
 0x5df   :  { %v1776_v3 = vadd.f32 %v1775_v39, %v1774_v43  ;;  %v1790_v12 = vadd.f32 %v1789_v27, %v1788_v36  ;;  %v1851_v27 = vadd.f32 %v1850_v16, %v1849_v8 }
 0x5e0   :  { %v1783_v13 = vadd.f32 %v1782_v2, %v1781_v25  ;;  %v1797_v7 = vadd.f32 %v1796_v42, %v1795_v62  ;;  %v1865_v2 = vadd.f32 %v1864_v19, %v1863_v23 }
 0x5e1   :  { %v4652_v24 = vmul.f32 0.0625, %v1776_v3  ;;  %v4654_v14 = vmul.f32 0.0625, %v1790_v12  ;;  %v1894_v12 = vmul.f32 0.0625, %v1844_v10 }
 0x5e2   :  { %v4656_v34 = vmul.f32 0.0625, %v1783_v13  ;;  %v4658_v9 = vmul.f32 0.0625, %v1797_v7 }
 0x5e3   :  { %v1810_v20 = vsub.f32 %v4628_v32, %v4652_v24  ;;  %v1818_v28 = vsub.f32 %v4632_v40, %v4652_v24  ;;  %v1812_v4 = vsub.f32 %v4630_v33, %v4654_v14  ;;  %v1820_v11 = vsub.f32 %v4634_v35, %v4654_v14 }
 0x5e4   :  { %v1811_v22 = vsub.f32 %v4636_v63, %v4656_v34  ;;  %v1819_v29 = vsub.f32 %v4640_v57, %v4656_v34  ;;  %v1813_v60 = vsub.f32 %v4638_v56, %v4658_v9  ;;  %v1821_v18 = vsub.f32 %v4642_v0, %v4658_v9 }
 0x5e5   :  { %v1826_v26 = vmul.f32 %v1810_v20, %v1810_v20  ;;  %v1834_v5 = vmul.f32 %v1818_v28, %v1818_v28  ;;  %v1828_v6 = vmul.f32 %v1812_v4, %v1812_v4  ;;  %v1836_v43 = vmul.f32 %v1820_v11, %v1820_v11 }
 0x5e6   :  { %v1827_v36 = vmul.f32 %v1811_v22, %v1811_v22  ;;  %v1835_v25 = vmul.f32 %v1819_v29, %v1819_v29  ;;  %v1829_v62 = vmul.f32 %v1813_v60, %v1813_v60  ;;  %v1837_v39 = vmul.f32 %v1821_v18, %v1821_v18 }
 0x5e7   :  { %v1866_v31 = vadd.f32 %v1834_v5, %v1826_v26  ;;  %v1880_v1 = vadd.f32 %v1836_v43, %v1828_v6  ;;  %v1896_v35 = vmul.f32 0.0625, %v1858_v61  ;;  %v1895_v20 = vmul.f32 0.0625, %v1851_v27 }
 0x5e8   :  { %v1873_v42 = vadd.f32 %v1835_v25, %v1827_v36  ;;  %v1887_v3 = vadd.f32 %v1837_v39, %v1829_v62  ;;  %v1897_v11 = vmul.f32 0.0625, %v1865_v2  ;;  %v1902_v60 = vadd.f32 1e-05, %v1894_v12 }
 0x5e9   :  { %v1867_v13 = vrot.slane %v1866_v31, 4  ;;  %v1881_v7 = vrot.slane %v1880_v1, 4  ;;  %v1904_v16 = vadd.f32 1e-05, %v1896_v35  ;;  %v1903_v19 = vadd.f32 1e-05, %v1895_v20 }
 0x5ea   :  { %v1874_v57 = vrot.slane %v1873_v42, 4  ;;  %v1888_v0 = vrot.slane %v1887_v3, 4  ;;  %v1905_v6 = vadd.f32 1e-05, %v1897_v11  ;;  %3921 = vrsqrt.f32 %v1902_v60 }
 0x5eb   :  { %v1868_v28 = vadd.f32 %v1867_v13, %v1866_v31  ;;  %v1882_v4 = vadd.f32 %v1881_v7, %v1880_v1  ;;  %3923 = vrsqrt.f32 %v1904_v16 }
 0x5ec   :  { %v1875_v22 = vadd.f32 %v1874_v57, %v1873_v42  ;;  %v1889_v29 = vadd.f32 %v1888_v0, %v1887_v3  ;;  %3925 = vrsqrt.f32 %v1903_v19 }
 0x5ed   :  { %v1869_v18 = vrot.slane %v1868_v28, 2  ;;  %v1883_v8 = vrot.slane %v1882_v4, 2  ;;  %3927 = vrsqrt.f32 %v1905_v6 }
 0x5ee   :  { %v1876_v26 = vrot.slane %v1875_v22, 2  ;;  %v1890_v23 = vrot.slane %v1889_v29, 2 }
 0x5ef   :  { %v1870_v5 = vadd.f32 %v1869_v18, %v1868_v28  ;;  %v1884_v10 = vadd.f32 %v1883_v8, %v1882_v4 }
 0x5f0   :  { %v1877_v43 = vadd.f32 %v1876_v26, %v1875_v22  ;;  %v1891_v61 = vadd.f32 %v1890_v23, %v1889_v29 }
 0x5f1   :  { %v1871_v36 = vrot.slane %v1870_v5, 1  ;;  %v1885_v25 = vrot.slane %v1884_v10, 1 }
 0x5f2   :  { %v1878_v62 = vrot.slane %v1877_v43, 1  ;;  %v1892_v39 = vrot.slane %v1891_v61, 1 }
 0x5f3   :  { %v1872_v57 = vadd.f32 %v1871_v36, %v1870_v5  ;;  %v1886_v0 = vadd.f32 %v1885_v25, %v1884_v10 }
 0x5f4   :  { %v1879_v27 = vadd.f32 %v1878_v62, %v1877_v43  ;;  %v1893_v35 = vadd.f32 %v1892_v39, %v1891_v61  ;;  %v3922_v20 = vpop.eup %3921  ;;  %v1740_v62 = vld [vmem:[#allocation13 + $0x1b] sm:$0xff] }
 0x5f5   :  { %v1898_v31 = vmul.f32 0.0625, %v1872_v57  ;;  %v1900_v1 = vmul.f32 0.0625, %v1886_v0  ;;  %v3924_v28 = vpop.eup %3923 }
 0x5f6   :  { %v1899_v2 = vmul.f32 0.0625, %v1879_v27  ;;  %v1901_v42 = vmul.f32 0.0625, %v1893_v35  ;;  %v3926_v4 = vpop.eup %3925 }
 0x5f7   :  { %v1906_v3 = vadd.f32 1e-05, %v1898_v31  ;;  %v1908_v12 = vadd.f32 1e-05, %v1900_v1  ;;  %v3928_v11 = vpop.eup %3927  ;;  %v1926_v22 = vcombine.low %v3922_v20, %v3926_v4 }
 0x5f8   :  { %v1907_v13 = vadd.f32 1e-05, %v1899_v2  ;;  %v1909_v7 = vadd.f32 1e-05, %v1901_v42  ;;  %v1927_v29 = vcombine.low %v3924_v28, %v3928_v11 }
 0x5f9   :  { %3929 = vrsqrt.f32 %v1906_v3  ;;  %v1936_v16 = vrot.slane %v1926_v22, %v4317_v50 }
 0x5fa   :  { %3931 = vrsqrt.f32 %v1908_v12  ;;  %v1943_v26 = vrot.slane %v1927_v29, %v4317_v50 }
 0x5fb   :  { %3933 = vrsqrt.f32 %v1907_v13 }
 0x5fc   :  { %3935 = vrsqrt.f32 %v1909_v7  ;;  %v1958_v6 = vcombine.low %v1936_v16, %v1943_v26  ;;  %v1741_v26 = vld [vmem:[#allocation13 + $0x23] sm:$0xff] }
 0x5fe   :  { %v1966_v36 = vrot.slane %v1958_v6, %v4317_v50 }
 0x603   :  { %v3930_v60 = vpop.eup %3929 }
 0x604   :  { %v3932_v18 = vpop.eup %3931 }
 0x605   :  { %v3934_v8 = vpop.eup %3933 }
 0x606   :  { %v3936_v23 = vpop.eup %3935  ;;  %v1928_v19 = vcombine.low %v3930_v60, %v3934_v8 }
 0x607   :  { %v1929_v5 = vcombine.low %v3932_v18, %v3936_v23 }
 0x608   :  { %v1950_v10 = vrot.slane %v1928_v19, %v4317_v50 }
 0x609   :  { %v1957_v43 = vrot.slane %v1929_v5, %v4317_v50 }
 0x60b   :  { %v1959_v61 = vcombine.low %v1950_v10, %v1957_v43 }
 0x60d   :  { %v1973_v25 = vrot.slane %v1959_v61, %v4317_v50 }
 0x60f   :  { %v1974_v39 = vcombine.low %v1966_v36, %v1973_v25 }
 0x611   :  { %v1976_v57 = vmul.f32 %v1974_v39, %v1740_v62 }
 0x613   :  { %v1981_v0 = vrot.slane %v1976_v57, %v4299_v44  ;;  %v1985_v27 = vrot.slane %v1976_v57, %v4302_v46  ;;  %v1989_v35 = vrot.slane %v1976_v57, %v4385_v41  ;;  %v1993_v31 = vrot.slane %v1976_v57, %v4390_v45 }
 0x614   :  { %v1997_v1 = vrot.slane %v1976_v57, %v4601_v47  ;;  %v2001_v2 = vrot.slane %v1976_v57, %v4607_v49  ;;  %v2005_v42 = vrot.slane %v1976_v57, %v4604_v48  ;;  %v2009_v3 = vrot.slane %v1976_v57, %v4610_v51  ;;  %v4975_v57 = vld [vmem:[#allocation27_spill] sm:$0xff] }
 0x615   :  { %v2018_v12 = vmul.f32 %v1981_v0, %v4576_v15  ;;  %v2019_v13 = vmul.f32 %v1985_v27, %v4580_v30  ;;  %v2020_v7 = vmul.f32 %v1989_v35, %v4578_v17  ;;  %v2021_v20 = vmul.f32 %v1993_v31, %v4582_v21 }
 0x616   :  { %v2022_v28 = vmul.f32 %v1997_v1, %v4652_v24  ;;  %v2023_v4 = vmul.f32 %v2001_v2, %v4656_v34  ;;  %v2024_v11 = vmul.f32 %v2005_v42, %v4654_v14  ;;  %v2025_v22 = vmul.f32 %v2009_v3, %v4658_v9 }
 0x617   :  { %v2034_v29 = vcombine.low %v2018_v12, %v2019_v13  ;;  %v2035_v60 = vcombine.low %v2020_v7, %v2021_v20  ;;  %v2085_v23 = vmul.f32 %v1981_v0, %v4556_v52  ;;  %v2086_v19 = vmul.f32 %v1985_v27, %v4568_v58 }
 0x618   :  { %v2036_v18 = vcombine.low %v2022_v28, %v2023_v4  ;;  %v2037_v8 = vcombine.low %v2024_v11, %v2025_v22  ;;  %v2087_v5 = vmul.f32 %v1989_v35, %v4558_v53  ;;  %v2088_v10 = vmul.f32 %v1993_v31, %v4570_v59  ;;  %v4974_v59 = vld [vmem:[#allocation28_spill] sm:$0xff] }
 0x619   :  { %v2044_v15 = vrot.slane %v2034_v29, %v4317_v50  ;;  %v2051_v30 = vrot.slane %v2035_v60, %v4317_v50  ;;  %v2089_v6 = vmul.f32 %v1997_v1, %v4628_v32  ;;  %v2090_v43 = vmul.f32 %v2001_v2, %v4636_v63 }
 0x61a   :  { %v2058_v17 = vrot.slane %v2036_v18, %v4317_v50  ;;  %v2065_v21 = vrot.slane %v2037_v8, %v4317_v50  ;;  %v2091_v61 = vmul.f32 %v2005_v42, %v4630_v33  ;;  %v2092_v25 = vmul.f32 %v2009_v3, %v4638_v56 }
 0x61b   :  { %v2066_v16 = vcombine.low %v2044_v15, %v2051_v30  ;;  %v2094_v62 = vmul.f32 %v1985_v27, %v4560_v54  ;;  %v2095_v52 = vmul.f32 %v1989_v35, %v4550_v38  ;;  %v2096_v58 = vmul.f32 %v1993_v31, %v4562_v55  ;;  %v4976_v31 = vld [vmem:[#allocation29_spill] sm:$0xff] }
 0x61c   :  { %v2067_v24 = vcombine.low %v2058_v17, %v2065_v21  ;;  %v2097_v53 = vmul.f32 %v1997_v1, %v4632_v40  ;;  %v2098_v39 = vmul.f32 %v2001_v2, %v4974_v59  ;;  %v2099_v40 = vmul.f32 %v2005_v42, %v4975_v57 }
 0x61d   :  { %v2074_v34 = vrot.slane %v2066_v16, %v4317_v50  ;;  %v2100_v1 = vmul.f32 %v2009_v3, %v4976_v31 }
 0x61e   :  { %v2081_v14 = vrot.slane %v2067_v24, %v4317_v50  ;;  %v2093_v50 = vmul.f32 %v1981_v0, %v4548_v37 }
 0x620   :  { %v2082_v9 = vcombine.low %v2074_v34, %v2081_v14 }
 0x622   :  { %v2084_v36 = vsub.f32 %v1741_v26, %v2082_v9 }
 0x624   :  { %v2105_v32 = vrot.slane %v2084_v36, %v4299_v44  ;;  %v2109_v63 = vrot.slane %v2084_v36, %v4302_v46  ;;  %v2113_v33 = vrot.slane %v2084_v36, %v4385_v41  ;;  %v2117_v56 = vrot.slane %v2084_v36, %v4390_v45 }
 0x625   :  { %v2121_v37 = vrot.slane %v2084_v36, %v4601_v47  ;;  %v2125_v54 = vrot.slane %v2084_v36, %v4607_v49  ;;  %v2129_v38 = vrot.slane %v2084_v36, %v4604_v48  ;;  %v2133_v55 = vrot.slane %v2084_v36, %v4610_v51 }
 0x626   :  { %v4727_v0 = vadd.f32 %v2105_v32, %v2085_v23  ;;  %v2143_v27 = vadd.f32 %v2109_v63, %v2086_v19  ;;  %v4729_v35 = vadd.f32 %v2113_v33, %v2087_v5  ;;  %v4732_v2 = vadd.f32 %v2117_v56, %v2088_v10 }
 0x627   :  { %v4734_v12 = vadd.f32 %v2121_v37, %v2089_v6  ;;  %v4736_v13 = vadd.f32 %v2125_v54, %v2090_v43  ;;  %v4738_v7 = vadd.f32 %v2129_v38, %v2091_v61  ;;  %v4740_v20 = vadd.f32 %v2133_v55, %v2092_v25 }
 0x628   :  { %v4742_v51 = vadd.f32 %v2105_v32, %v2093_v50  ;;  %v2151_v42 = vadd.f32 %v2109_v63, %v2094_v62  ;;  %v4744_v28 = vadd.f32 %v2113_v33, %v2095_v52  ;;  %v4746_v4 = vadd.f32 %v2117_v56, %v2096_v58 }
 0x629   :  { %v4748_v11 = vadd.f32 %v2121_v37, %v2097_v53  ;;  %v4750_v3 = vadd.f32 %v2125_v54, %v2098_v39  ;;  %v4752_v22 = vadd.f32 %v2129_v38, %v2099_v40  ;;  %v4755_v29 = vmul.f32 0.2, %v4727_v0 }
 0x62a   :  { %v2159_v60 = vmul.f32 0.2, %v2143_v27  ;;  %v4758_v18 = vmul.f32 0.2, %v4729_v35  ;;  %v4760_v8 = vadd.f32 %v2133_v55, %v2100_v1  ;;  %v4763_v15 = vmul.f32 0.2, %v4732_v2 }
 0x62b   :  { %v4766_v30 = vmul.f32 0.2, %v4734_v12  ;;  %v4769_v17 = vmul.f32 0.2, %v4736_v13  ;;  %v4772_v21 = vmul.f32 0.2, %v4738_v7  ;;  %v2174_v34 = vmax.f32 %v4727_v0, %v4755_v29 }
 0x62c   :  { %v4775_v16 = vmul.f32 0.2, %v4740_v20  ;;  %v4778_v24 = vmul.f32 0.2, %v4742_v51  ;;  %v2167_v14 = vmul.f32 0.2, %v2151_v42  ;;  %v2175_v23 = vmax.f32 %v2143_v27, %v2159_v60 }
 0x62d   :  { %v4783_v26 = vmul.f32 0.2, %v4744_v28  ;;  %v4786_v9 = vmul.f32 0.2, %v4746_v4  ;;  %v4789_v19 = vmul.f32 0.2, %v4748_v11  ;;  %v2176_v6 = vmax.f32 %v4729_v35, %v4758_v18 }
 0x62e   :  { %v4792_v5 = vmul.f32 0.2, %v4750_v3  ;;  %v4795_v10 = vmul.f32 0.2, %v4752_v22  ;;  %v4800_v43 = vmul.f32 0.2, %v4760_v8  ;;  %v2177_v61 = vmax.f32 %v4732_v2, %v4763_v15 }
 0x62f   :  { %v2179_v25 = vmax.f32 %v4736_v13, %v4769_v17  ;;  %v2182_v52 = vmax.f32 %v4742_v51, %v4778_v24  ;;  %v2183_v58 = vmax.f32 %v2151_v42, %v2167_v14  ;;  %v2184_v53 = vmax.f32 %v4744_v28, %v4783_v26 }
 0x630   :  { %v2185_v59 = vmax.f32 %v4746_v4, %v4786_v9  ;;  %v2187_v32 = vmax.f32 %v4750_v3, %v4792_v5 }
 0x631   :  { %4149 = dma.done.wait [#allocation4 + $0x1], 28672 }
 0x632   :  { %4150 = vsyncadd [#allocation4 + $0x1], 4294938624  ;;  %v4826_v56 = vpack.c.bf16 %v2183_v58, %v2175_v23  ;;  %v2195_v37 = vld [vmem:[#allocation3 + $0x8] sm:$0xff]  ;;  %v2197_v54 = vld [vmem:[#allocation3 + $0x18] sm:$0xff]  ;;  %v4844_v0 = vpack.c.bf16 %v2185_v59, %v2177_v61  ;;  %v4864_v35 = vpack.c.bf16 %v2187_v32, %v2179_v25  ;;  %s4170_s5 = smov [#allocation14]  }
 0x633   :  { %v2194_v38 = vld [vmem:[#allocation3] sm:$0xff]  ;;  %v2428_v55 = vunpack.c.l.s8.bf16 %v2195_v37  ;;  %v2435_v57 = vunpack.c.h.s8.bf16 %v2195_v37  ;;  %v2430_v40 = vunpack.c.l.s8.bf16 %v2197_v54  ;;  %v2437_v27 = vunpack.c.h.s8.bf16 %v2197_v54  ;;  %v2196_v31 = vld [vmem:[#allocation3 + $0x10] sm:$0xff]  ;;  %v2201_v33 = vld [vmem:[#allocation3 + $0x38] sm:$0xff]  ;;  %s3689_s16 = sshll.u32 %s4170_s5, 4  ;;  %s3690_s16 = int_to_ptr.vmem [resolvable:$true] %s3689_s16 }
 0x634   :  { %2907 = vmatprep.mubr.bf16.mxu0 %v4826_v56  ;;  %3079 = vmatprep.mubr.bf16.mxu1 %v4826_v56  ;;  %v2427_v1 = vunpack.c.l.s8.bf16 %v2194_v38  ;;  %v2429_v42 = vunpack.c.l.s8.bf16 %v2196_v31  ;;  %v2202_v60 = vld [vmem:[#allocation3 + $0x40] sm:$0xff]  ;;  %v2204_v14 = vld [vmem:[#allocation3 + $0x50] sm:$0xff]  ;;  %v2434_v23 = vunpack.c.h.s8.bf16 %v2194_v38  ;;  %v2436_v58 = vunpack.c.h.s8.bf16 %v2196_v31  ;;  %v2203_v62 = vld [vmem:[#allocation3 + $0x48] sm:$0xff]  ;;  %s4119_s17 = scalar_lea.vmem %s3690_s16, 1792  ;;  %p4124_p1 = scmp.lt.s32.totalorder %s3690_s16, %s3690_s16 }
 0x635   :  { %2875 = vmatprep.subr.bf16.mxu0 %v2428_v55  ;;  %3047 = vmatprep.subr.bf16.mxu1 %v2430_v40  ;;  %v2442_v63 = vunpack.c.l.s8.bf16 %v2202_v60  ;;  %v2444_v50 = vunpack.c.l.s8.bf16 %v2204_v14  ;;  %v2441_v37 = vunpack.c.l.s8.bf16 %v2201_v33  ;;  %v2443_v54 = vunpack.c.l.s8.bf16 %v2203_v62  ;;  %v2209_v55 = vld [vmem:[#allocation3 + $0x78] sm:$0xff]  ;;  %v2211_v40 = vld [vmem:[#allocation3 + $0x88] sm:$0xff]  ;;  %p4120_p0 = scmp.ne.s32.totalorder %s3690_s16, %s4119_s17  ;;  %p4125_p2 = scmp.lt.s32.totalorder %s4119_s17, %s4119_s17 }
 0x636   :  { %2876 = vmatpush1.bf16.msra.mxu0 %v2427_v1  ;;  %3048 = vmatpush1.bf16.msra.mxu1 %v2429_v42  ;;  %v2449_v39 = vunpack.c.h.s8.bf16 %v2202_v60  ;;  %v2451_v36 = vunpack.c.h.s8.bf16 %v2204_v14  ;;  %v2448_v38 = vunpack.c.h.s8.bf16 %v2201_v33  ;;  %v2450_v31 = vunpack.c.h.s8.bf16 %v2203_v62  ;;  %v2208_v1 = vld [vmem:[#allocation3 + $0x70] sm:$0xff]  ;;  %v2210_v42 = vld [vmem:[#allocation3 + $0x80] sm:$0xff]  ;;  %v2265_v61 = vld [vmem:[#allocation3 + $0x238] sm:$0xff] }
 0x637   :  { %2877 = vmatprep.subr.bf16.mxu0 %v2435_v57  ;;  %3049 = vmatprep.subr.bf16.mxu1 %v2437_v27  ;;  %v2456_v57 = vunpack.c.l.s8.bf16 %v2209_v55  ;;  %v2458_v27 = vunpack.c.l.s8.bf16 %v2211_v40  ;;  %v2216_v60 = vld [vmem:[#allocation3 + $0xb0] sm:$0xff]  ;;  %v2218_v14 = vld [vmem:[#allocation3 + $0xc0] sm:$0xff]  ;;  %v2462_v33 = vunpack.c.h.s8.bf16 %v2208_v1  ;;  %v2464_v62 = vunpack.c.h.s8.bf16 %v2210_v42  ;;  %v2267_v59 = vld [vmem:[#allocation3 + $0x248] sm:$0xff]  ;;  %p4126_p3 = por %p4125_p2, %p4124_p1 }
 0x638   :  { %v2321_v25 = vld [vmem:[#allocation3 + $0x3f8] sm:$0xff]  ;;  %v2323_v32 = vld [vmem:[#allocation3 + $0x408] sm:$0xff] }
 0x639   :  { %p4127_p4 = pnand %p4126_p3, %p4120_p0 }
 0x63a   :  { %2878 = vmatpush1.bf16.msra.mxu0 %v2434_v23  ;;  %3050 = vmatpush1.bf16.msra.mxu1 %v2436_v58  ;;  %v2455_v23 = vunpack.c.l.s8.bf16 %v2208_v1  ;;  %v2457_v58 = vunpack.c.l.s8.bf16 %v2210_v42 }
 0x63b   :  { %2879 = vmatprep.subr.bf16.mxu0 %v2442_v63  ;;  %3051 = vmatprep.subr.bf16.mxu1 %v2444_v50  ;;  %v2463_v50 = vunpack.c.h.s8.bf16 %v2209_v55  ;;  %v2465_v63 = vunpack.c.h.s8.bf16 %v2211_v40  ;;  %v2477_v55 = vunpack.c.h.s8.bf16 %v2216_v60  ;;  %v2479_v40 = vunpack.c.h.s8.bf16 %v2218_v14 }
 0x63e   :  { %2880 = vmatpush1.bf16.msra.mxu0 %v2441_v37  ;;  %3052 = vmatpush1.bf16.msra.mxu1 %v2443_v54  ;;  %v2215_v37 = vld [vmem:[#allocation3 + $0xa8] sm:$0xff]  ;;  %v2217_v54 = vld [vmem:[#allocation3 + $0xb8] sm:$0xff] }
 0x63f   :  { %2881 = vmatprep.subr.bf16.mxu0 %v2449_v39  ;;  %3053 = vmatprep.subr.bf16.mxu1 %v2451_v36  ;;  %v2470_v36 = vunpack.c.l.s8.bf16 %v2216_v60  ;;  %v2472_v39 = vunpack.c.l.s8.bf16 %v2218_v14  ;;  %v2476_v1 = vunpack.c.h.s8.bf16 %v2215_v37  ;;  %v2478_v42 = vunpack.c.h.s8.bf16 %v2217_v54 }
 0x642   :  { %2882 = vmatpush1.bf16.msra.mxu0 %v2448_v38  ;;  %3054 = vmatpush1.bf16.msra.mxu1 %v2450_v31  ;;  %v2469_v38 = vunpack.c.l.s8.bf16 %v2215_v37  ;;  %v2471_v31 = vunpack.c.l.s8.bf16 %v2217_v54 }
 0x643   :  { %2883 = vmatprep.subr.bf16.mxu0 %v2456_v57  ;;  %3055 = vmatprep.subr.bf16.mxu1 %v2458_v27  ;;  %v2223_v57 = vld [vmem:[#allocation3 + $0xe8] sm:$0xff]  ;;  %v2225_v27 = vld [vmem:[#allocation3 + $0xf8] sm:$0xff] }
 0x644   :  { %v2491_v60 = vunpack.c.h.s8.bf16 %v2223_v57  ;;  %v2493_v14 = vunpack.c.h.s8.bf16 %v2225_v27 }
 0x646   :  { %2884 = vmatpush1.bf16.msra.mxu0 %v2455_v23  ;;  %3056 = vmatpush1.bf16.msra.mxu1 %v2457_v58  ;;  %v2484_v23 = vunpack.c.l.s8.bf16 %v2223_v57  ;;  %v2486_v58 = vunpack.c.l.s8.bf16 %v2225_v27 }
 0x647   :  { %2885 = vmatprep.subr.bf16.mxu0 %v2463_v50  ;;  %3057 = vmatprep.subr.bf16.mxu1 %v2465_v63  ;;  %v2222_v50 = vld [vmem:[#allocation3 + $0xe0] sm:$0xff]  ;;  %v2224_v63 = vld [vmem:[#allocation3 + $0xf0] sm:$0xff] }
 0x648   :  { %v2490_v37 = vunpack.c.h.s8.bf16 %v2222_v50  ;;  %v2492_v54 = vunpack.c.h.s8.bf16 %v2224_v63 }
 0x64a   :  { %2886 = vmatpush1.bf16.msra.mxu0 %v2462_v33  ;;  %3058 = vmatpush1.bf16.msra.mxu1 %v2464_v62  ;;  %v2483_v33 = vunpack.c.l.s8.bf16 %v2222_v50  ;;  %v2485_v62 = vunpack.c.l.s8.bf16 %v2224_v63 }
 0x64b   :  { %2887 = vmatprep.subr.bf16.mxu0 %v2470_v36  ;;  %3059 = vmatprep.subr.bf16.mxu1 %v2472_v39  ;;  %v2230_v36 = vld [vmem:[#allocation3 + $0x120] sm:$0xff]  ;;  %v2232_v39 = vld [vmem:[#allocation3 + $0x130] sm:$0xff] }
 0x64c   :  { %v2505_v57 = vunpack.c.h.s8.bf16 %v2230_v36  ;;  %v2507_v27 = vunpack.c.h.s8.bf16 %v2232_v39 }
 0x64e   :  { %2888 = vmatpush1.bf16.msra.mxu0 %v2469_v38  ;;  %3060 = vmatpush1.bf16.msra.mxu1 %v2471_v31  ;;  %v2498_v38 = vunpack.c.l.s8.bf16 %v2230_v36  ;;  %v2500_v31 = vunpack.c.l.s8.bf16 %v2232_v39 }
 0x64f   :  { %2889 = vmatprep.subr.bf16.mxu0 %v2477_v55  ;;  %3061 = vmatprep.subr.bf16.mxu1 %v2479_v40  ;;  %v2229_v55 = vld [vmem:[#allocation3 + $0x118] sm:$0xff]  ;;  %v2231_v40 = vld [vmem:[#allocation3 + $0x128] sm:$0xff] }
 0x650   :  { %v2504_v50 = vunpack.c.h.s8.bf16 %v2229_v55  ;;  %v2506_v63 = vunpack.c.h.s8.bf16 %v2231_v40 }
 0x652   :  { %2890 = vmatpush1.bf16.msra.mxu0 %v2476_v1  ;;  %3062 = vmatpush1.bf16.msra.mxu1 %v2478_v42  ;;  %v2497_v1 = vunpack.c.l.s8.bf16 %v2229_v55  ;;  %v2499_v42 = vunpack.c.l.s8.bf16 %v2231_v40 }
 0x653   :  { %2891 = vmatprep.subr.bf16.mxu0 %v2484_v23  ;;  %3063 = vmatprep.subr.bf16.mxu1 %v2486_v58  ;;  %v2237_v23 = vld [vmem:[#allocation3 + $0x158] sm:$0xff]  ;;  %v2239_v58 = vld [vmem:[#allocation3 + $0x168] sm:$0xff] }
 0x654   :  { %v2519_v36 = vunpack.c.h.s8.bf16 %v2237_v23  ;;  %v2521_v39 = vunpack.c.h.s8.bf16 %v2239_v58 }
 0x656   :  { %2892 = vmatpush1.bf16.msra.mxu0 %v2483_v33  ;;  %3064 = vmatpush1.bf16.msra.mxu1 %v2485_v62  ;;  %v2512_v33 = vunpack.c.l.s8.bf16 %v2237_v23  ;;  %v2514_v62 = vunpack.c.l.s8.bf16 %v2239_v58 }
 0x657   :  { %2893 = vmatprep.subr.bf16.mxu0 %v2491_v60  ;;  %3065 = vmatprep.subr.bf16.mxu1 %v2493_v14  ;;  %v2236_v60 = vld [vmem:[#allocation3 + $0x150] sm:$0xff]  ;;  %v2238_v14 = vld [vmem:[#allocation3 + $0x160] sm:$0xff] }
 0x658   :  { %v2518_v55 = vunpack.c.h.s8.bf16 %v2236_v60  ;;  %v2520_v40 = vunpack.c.h.s8.bf16 %v2238_v14 }
 0x65a   :  { %2894 = vmatpush1.bf16.msra.mxu0 %v2490_v37  ;;  %3066 = vmatpush1.bf16.msra.mxu1 %v2492_v54  ;;  %v2511_v37 = vunpack.c.l.s8.bf16 %v2236_v60  ;;  %v2513_v54 = vunpack.c.l.s8.bf16 %v2238_v14 }
 0x65b   :  { %2895 = vmatprep.subr.bf16.mxu0 %v2498_v38  ;;  %3067 = vmatprep.subr.bf16.mxu1 %v2500_v31  ;;  %v2244_v38 = vld [vmem:[#allocation3 + $0x190] sm:$0xff]  ;;  %v2246_v31 = vld [vmem:[#allocation3 + $0x1a0] sm:$0xff] }
 0x65c   :  { %v2533_v23 = vunpack.c.h.s8.bf16 %v2244_v38  ;;  %v2535_v58 = vunpack.c.h.s8.bf16 %v2246_v31 }
 0x65e   :  { %2896 = vmatpush1.bf16.msra.mxu0 %v2497_v1  ;;  %3068 = vmatpush1.bf16.msra.mxu1 %v2499_v42  ;;  %v2526_v1 = vunpack.c.l.s8.bf16 %v2244_v38  ;;  %v2528_v42 = vunpack.c.l.s8.bf16 %v2246_v31  ;;  %v4836_v38 = vpack.c.bf16 %v2182_v52, %v2174_v34  ;;  %v2257_v52 = vld [vmem:[#allocation3 + $0x1f8] sm:$0xff] }
 0x65f   :  { %2897 = vmatprep.subr.bf16.mxu0 %v2505_v57  ;;  %3069 = vmatprep.subr.bf16.mxu1 %v2507_v27  ;;  %v2243_v57 = vld [vmem:[#allocation3 + $0x188] sm:$0xff]  ;;  %v2245_v27 = vld [vmem:[#allocation3 + $0x198] sm:$0xff]  ;;  %v2553_v2 = vunpack.c.l.s8.bf16 %v2257_v52 }
 0x660   :  { %v2532_v60 = vunpack.c.h.s8.bf16 %v2243_v57  ;;  %v2534_v14 = vunpack.c.h.s8.bf16 %v2245_v27 }
 0x662   :  { %2898 = vmatpush1.bf16.msra.mxu0 %v2504_v50  ;;  %3070 = vmatpush1.bf16.msra.mxu1 %v2506_v63  ;;  %v2525_v50 = vunpack.c.l.s8.bf16 %v2243_v57  ;;  %v2527_v63 = vunpack.c.l.s8.bf16 %v2245_v27  ;;  %v2260_v57 = vld [vmem:[#allocation3 + $0x210] sm:$0xff]  ;;  %v2259_v27 = vld [vmem:[#allocation3 + $0x208] sm:$0xff] }
 0x663   :  { %2899 = vmatprep.subr.bf16.mxu0 %v2512_v33  ;;  %3071 = vmatprep.subr.bf16.mxu1 %v2514_v62  ;;  %v2251_v33 = vld [vmem:[#allocation3 + $0x1c8] sm:$0xff]  ;;  %v2253_v62 = vld [vmem:[#allocation3 + $0x1d8] sm:$0xff]  ;;  %v2556_v34 = vunpack.c.l.s8.bf16 %v2260_v57  ;;  %v2555_v4 = vunpack.c.l.s8.bf16 %v2259_v27  ;;  %v2563_v9 = vunpack.c.h.s8.bf16 %v2260_v57 }
 0x664   :  { %v2273_v57 = vld [vmem:[#allocation3 + $0x278] sm:$0xff] }
 0x666   :  { %2900 = vmatpush1.bf16.msra.mxu0 %v2511_v37  ;;  %3072 = vmatpush1.bf16.msra.mxu1 %v2513_v54  ;;  %v2540_v37 = vunpack.c.l.s8.bf16 %v2251_v33  ;;  %v2542_v54 = vunpack.c.l.s8.bf16 %v2253_v62 }
 0x667   :  { %2901 = vmatprep.subr.bf16.mxu0 %v2519_v36  ;;  %3073 = vmatprep.subr.bf16.mxu1 %v2521_v39  ;;  %v2250_v36 = vld [vmem:[#allocation3 + $0x1c0] sm:$0xff]  ;;  %v2252_v39 = vld [vmem:[#allocation3 + $0x1d0] sm:$0xff] }
 0x668   :  { %v2539_v31 = vunpack.c.l.s8.bf16 %v2250_v36  ;;  %v2546_v51 = vunpack.c.h.s8.bf16 %v2250_v36  ;;  %v2548_v29 = vunpack.c.h.s8.bf16 %v2252_v39  ;;  %v2272_v36 = vld [vmem:[#allocation3 + $0x270] sm:$0xff] }
 0x66a   :  { %2902 = vmatpush1.bf16.msra.mxu0 %v2518_v55  ;;  %3074 = vmatpush1.bf16.msra.mxu1 %v2520_v40  ;;  %v2541_v55 = vunpack.c.l.s8.bf16 %v2252_v39  ;;  %v2547_v40 = vunpack.c.h.s8.bf16 %v2251_v33  ;;  %v2264_v33 = vld [vmem:[#allocation3 + $0x230] sm:$0xff]  ;;  %v2274_v39 = vld [vmem:[#allocation3 + $0x280] sm:$0xff] }
 0x66b   :  { %2903 = vmatprep.subr.bf16.mxu0 %v2526_v1  ;;  %3075 = vmatprep.subr.bf16.mxu1 %v2528_v42  ;;  %v2549_v1 = vunpack.c.h.s8.bf16 %v2253_v62  ;;  %v2258_v42 = vld [vmem:[#allocation3 + $0x200] sm:$0xff] }
 0x66c   :  { %v2554_v24 = vunpack.c.l.s8.bf16 %v2258_v42  ;;  %v2561_v15 = vunpack.c.h.s8.bf16 %v2258_v42  ;;  %v2266_v62 = vld [vmem:[#allocation3 + $0x240] sm:$0xff]  ;;  %v2271_v42 = vld [vmem:[#allocation3 + $0x268] sm:$0xff] }
 0x66e   :  { %2904 = vmatpush1.bf16.msra.mxu0 %v2525_v50  ;;  %3076 = vmatpush1.bf16.msra.mxu1 %v2527_v63  ;;  %v2560_v50 = vunpack.c.h.s8.bf16 %v2257_v52  ;;  %v2562_v63 = vunpack.c.h.s8.bf16 %v2259_v27  ;;  %v2279_v52 = vld [vmem:[#allocation3 + $0x2a8] sm:$0xff]  ;;  %v2281_v27 = vld [vmem:[#allocation3 + $0x2b8] sm:$0xff] }
 0x66f   :  { %2905 = vmatprep.subr.bf16.mxu0 %v2533_v23  ;;  %3077 = vmatprep.subr.bf16.mxu1 %v2535_v58  ;;  %v2568_v23 = vunpack.c.l.s8.bf16 %v2265_v61  ;;  %v2570_v58 = vunpack.c.l.s8.bf16 %v2267_v59 }
 0x672   :  { %2906 = vmatpush1.bf16.msra.mxu0 %v2532_v60  ;;  %3078 = vmatpush1.bf16.msra.mxu1 %v2534_v14  ;;  %v2567_v60 = vunpack.c.l.s8.bf16 %v2264_v33  ;;  %v2569_v14 = vunpack.c.l.s8.bf16 %v2266_v62 }
 0x673   :  { %2918 = vmatprep.subr.bf16.mxu0 %v2540_v37  ;;  %3090 = vmatprep.subr.bf16.mxu1 %v2542_v54  ;;  %v2575_v37 = vunpack.c.h.s8.bf16 %v2265_v61  ;;  %v2577_v54 = vunpack.c.h.s8.bf16 %v2267_v59  ;;  %v2278_v61 = vld [vmem:[#allocation3 + $0x2a0] sm:$0xff]  ;;  %v2280_v59 = vld [vmem:[#allocation3 + $0x2b0] sm:$0xff] }
 0x675   :  { %2908 = vmatmul.mubr.bf16.vlgmr.msra.gmra.mrb[12].mxu0 %v4836_v38  ;;  %3080 = vmatmul.mubr.bf16.vlgmr.msra.gmra.mrb[20].mxu1 %v4836_v38 }
 0x676   :  { %2919 = vmatpush1.bf16.msra.mxu0 %v2539_v31  ;;  %3091 = vmatpush1.bf16.msra.mxu1 %v2541_v55  ;;  %v2574_v31 = vunpack.c.h.s8.bf16 %v2264_v33  ;;  %v2576_v55 = vunpack.c.h.s8.bf16 %v2266_v62  ;;  %v2286_v33 = vld [vmem:[#allocation3 + $0x2e0] sm:$0xff]  ;;  %v2288_v62 = vld [vmem:[#allocation3 + $0x2f0] sm:$0xff] }
 0x677   :  { %2920 = vmatprep.subr.bf16.mxu0 %v2547_v40  ;;  %3092 = vmatprep.subr.bf16.mxu1 %v2549_v1  ;;  %v2582_v40 = vunpack.c.l.s8.bf16 %v2272_v36  ;;  %v2584_v1 = vunpack.c.l.s8.bf16 %v2274_v39 }
 0x678   :  { %2950 = vmatprep.mubr.bf16.mxu0 %v4844_v0  ;;  %3122 = vmatprep.mubr.bf16.mxu1 %v4844_v0 }
 0x67a   :  { %2921 = vmatpush1.bf16.msra.mxu0 %v2546_v51  ;;  %3093 = vmatpush1.bf16.msra.mxu1 %v2548_v29  ;;  %v2581_v51 = vunpack.c.l.s8.bf16 %v2271_v42  ;;  %v2583_v29 = vunpack.c.l.s8.bf16 %v2273_v57 }
 0x67b   :  { %2922 = vmatprep.subr.bf16.mxu0 %v2554_v24  ;;  %3094 = vmatprep.subr.bf16.mxu1 %v2556_v34  ;;  %v2589_v24 = vunpack.c.h.s8.bf16 %v2272_v36  ;;  %v2591_v34 = vunpack.c.h.s8.bf16 %v2274_v39  ;;  %v2285_v36 = vld [vmem:[#allocation3 + $0x2d8] sm:$0xff]  ;;  %v2287_v39 = vld [vmem:[#allocation3 + $0x2e8] sm:$0xff] }
 0x67e   :  { %2923 = vmatpush1.bf16.msra.mxu0 %v2553_v2  ;;  %3095 = vmatpush1.bf16.msra.mxu1 %v2555_v4  ;;  %v2588_v2 = vunpack.c.h.s8.bf16 %v2271_v42  ;;  %v2590_v4 = vunpack.c.h.s8.bf16 %v2273_v57  ;;  %v2293_v42 = vld [vmem:[#allocation3 + $0x318] sm:$0xff]  ;;  %v2295_v57 = vld [vmem:[#allocation3 + $0x328] sm:$0xff] }
 0x67f   :  { %2924 = vmatprep.subr.bf16.mxu0 %v2561_v15  ;;  %3096 = vmatprep.subr.bf16.mxu1 %v2563_v9  ;;  %v2596_v15 = vunpack.c.l.s8.bf16 %v2279_v52  ;;  %v2598_v9 = vunpack.c.l.s8.bf16 %v2281_v27 }
 0x682   :  { %2925 = vmatpush1.bf16.msra.mxu0 %v2560_v50  ;;  %3097 = vmatpush1.bf16.msra.mxu1 %v2562_v63  ;;  %v2595_v50 = vunpack.c.l.s8.bf16 %v2278_v61  ;;  %v2597_v63 = vunpack.c.l.s8.bf16 %v2280_v59 }
 0x683   :  { %2926 = vmatprep.subr.bf16.mxu0 %v2568_v23  ;;  %3098 = vmatprep.subr.bf16.mxu1 %v2570_v58  ;;  %v2603_v23 = vunpack.c.h.s8.bf16 %v2279_v52  ;;  %v2605_v58 = vunpack.c.h.s8.bf16 %v2281_v27  ;;  %v2292_v52 = vld [vmem:[#allocation3 + $0x310] sm:$0xff]  ;;  %v2294_v27 = vld [vmem:[#allocation3 + $0x320] sm:$0xff] }
 0x686   :  { %2927 = vmatpush1.bf16.msra.mxu0 %v2567_v60  ;;  %3099 = vmatpush1.bf16.msra.mxu1 %v2569_v14  ;;  %v2602_v60 = vunpack.c.h.s8.bf16 %v2278_v61  ;;  %v2604_v14 = vunpack.c.h.s8.bf16 %v2280_v59  ;;  %v2300_v61 = vld [vmem:[#allocation3 + $0x350] sm:$0xff]  ;;  %v2302_v59 = vld [vmem:[#allocation3 + $0x360] sm:$0xff] }
 0x687   :  { %2928 = vmatprep.subr.bf16.mxu0 %v2575_v37  ;;  %3100 = vmatprep.subr.bf16.mxu1 %v2577_v54  ;;  %v2610_v37 = vunpack.c.l.s8.bf16 %v2286_v33  ;;  %v2612_v54 = vunpack.c.l.s8.bf16 %v2288_v62 }
 0x68a   :  { %2929 = vmatpush1.bf16.msra.mxu0 %v2574_v31  ;;  %3101 = vmatpush1.bf16.msra.mxu1 %v2576_v55  ;;  %v2609_v31 = vunpack.c.l.s8.bf16 %v2285_v36  ;;  %v2611_v55 = vunpack.c.l.s8.bf16 %v2287_v39 }
 0x68b   :  { %2930 = vmatprep.subr.bf16.mxu0 %v2582_v40  ;;  %3102 = vmatprep.subr.bf16.mxu1 %v2584_v1  ;;  %v2617_v40 = vunpack.c.h.s8.bf16 %v2286_v33  ;;  %v2619_v1 = vunpack.c.h.s8.bf16 %v2288_v62  ;;  %v2299_v33 = vld [vmem:[#allocation3 + $0x348] sm:$0xff]  ;;  %v2301_v62 = vld [vmem:[#allocation3 + $0x358] sm:$0xff] }
 0x68e   :  { %2931 = vmatpush1.bf16.msra.mxu0 %v2581_v51  ;;  %3103 = vmatpush1.bf16.msra.mxu1 %v2583_v29  ;;  %v2616_v51 = vunpack.c.h.s8.bf16 %v2285_v36  ;;  %v2618_v29 = vunpack.c.h.s8.bf16 %v2287_v39  ;;  %v2307_v36 = vld [vmem:[#allocation3 + $0x388] sm:$0xff]  ;;  %v2309_v39 = vld [vmem:[#allocation3 + $0x398] sm:$0xff] }
 0x68f   :  { %2932 = vmatprep.subr.bf16.mxu0 %v2589_v24  ;;  %3104 = vmatprep.subr.bf16.mxu1 %v2591_v34  ;;  %v2624_v24 = vunpack.c.l.s8.bf16 %v2293_v42  ;;  %v2626_v34 = vunpack.c.l.s8.bf16 %v2295_v57 }
 0x692   :  { %2933 = vmatpush1.bf16.msra.mxu0 %v2588_v2  ;;  %3105 = vmatpush1.bf16.msra.mxu1 %v2590_v4  ;;  %v2623_v2 = vunpack.c.l.s8.bf16 %v2292_v52  ;;  %v2625_v4 = vunpack.c.l.s8.bf16 %v2294_v27 }
 0x693   :  { %2934 = vmatprep.subr.bf16.mxu0 %v2596_v15  ;;  %3106 = vmatprep.subr.bf16.mxu1 %v2598_v9  ;;  %v2631_v15 = vunpack.c.h.s8.bf16 %v2293_v42  ;;  %v2633_v9 = vunpack.c.h.s8.bf16 %v2295_v57  ;;  %v2306_v42 = vld [vmem:[#allocation3 + $0x380] sm:$0xff]  ;;  %v2308_v57 = vld [vmem:[#allocation3 + $0x390] sm:$0xff] }
 0x694   :  { %v2658_v28 = vunpack.c.h.s8.bf16 %v2306_v42  ;;  %v2660_v18 = vunpack.c.h.s8.bf16 %v2308_v57 }
 0x696   :  { %2935 = vmatpush1.bf16.msra.mxu0 %v2595_v50  ;;  %3107 = vmatpush1.bf16.msra.mxu1 %v2597_v63  ;;  %v2630_v50 = vunpack.c.h.s8.bf16 %v2292_v52  ;;  %v2632_v63 = vunpack.c.h.s8.bf16 %v2294_v27  ;;  %v2661_v52 = vunpack.c.h.s8.bf16 %v2309_v39  ;;  %v2314_v27 = vld [vmem:[#allocation3 + $0x3c0] sm:$0xff] }
 0x697   :  { %2936 = vmatprep.subr.bf16.mxu0 %v2603_v23  ;;  %3108 = vmatprep.subr.bf16.mxu1 %v2605_v58  ;;  %v2638_v23 = vunpack.c.l.s8.bf16 %v2300_v61  ;;  %v2640_v58 = vunpack.c.l.s8.bf16 %v2302_v59  ;;  %v2666_v26 = vunpack.c.l.s8.bf16 %v2314_v27  ;;  %v2673_v17 = vunpack.c.h.s8.bf16 %v2314_v27 }
 0x69a   :  { %2937 = vmatpush1.bf16.msra.mxu0 %v2602_v60  ;;  %3109 = vmatpush1.bf16.msra.mxu1 %v2604_v14  ;;  %v2637_v60 = vunpack.c.l.s8.bf16 %v2299_v33  ;;  %v2639_v14 = vunpack.c.l.s8.bf16 %v2301_v62 }
 0x69b   :  { %2938 = vmatprep.subr.bf16.mxu0 %v2610_v37  ;;  %3110 = vmatprep.subr.bf16.mxu1 %v2612_v54  ;;  %v2645_v37 = vunpack.c.h.s8.bf16 %v2300_v61  ;;  %v2647_v54 = vunpack.c.h.s8.bf16 %v2302_v59  ;;  %v2680_v61 = vunpack.c.l.s8.bf16 %v2321_v25  ;;  %v2682_v59 = vunpack.c.l.s8.bf16 %v2323_v32 }
 0x69e   :  { %2939 = vmatpush1.bf16.msra.mxu0 %v2609_v31  ;;  %3111 = vmatpush1.bf16.msra.mxu1 %v2611_v55  ;;  %v2644_v31 = vunpack.c.h.s8.bf16 %v2299_v33  ;;  %v2646_v55 = vunpack.c.h.s8.bf16 %v2301_v62  ;;  %v2687_v33 = vunpack.c.h.s8.bf16 %v2321_v25  ;;  %v2689_v62 = vunpack.c.h.s8.bf16 %v2323_v32 }
 0x69f   :  { %2940 = vmatprep.subr.bf16.mxu0 %v2617_v40  ;;  %3112 = vmatprep.subr.bf16.mxu1 %v2619_v1  ;;  %v2652_v40 = vunpack.c.l.s8.bf16 %v2307_v36  ;;  %v2654_v1 = vunpack.c.l.s8.bf16 %v2309_v39 }
 0x6a2   :  { %2941 = vmatpush1.bf16.msra.mxu0 %v2616_v51  ;;  %3113 = vmatpush1.bf16.msra.mxu1 %v2618_v29  ;;  %v4856_v51 = vpack.c.bf16 %v2184_v53, %v2176_v6  ;;  %v2651_v29 = vunpack.c.l.s8.bf16 %v2306_v42  ;;  %v2313_v53 = vld [vmem:[#allocation3 + $0x3b8] sm:$0xff] }
 0x6a3   :  { %2942 = vmatprep.subr.bf16.mxu0 %v2624_v24  ;;  %3114 = vmatprep.subr.bf16.mxu1 %v2626_v34  ;;  %v2653_v24 = vunpack.c.l.s8.bf16 %v2308_v57  ;;  %v2659_v34 = vunpack.c.h.s8.bf16 %v2307_v36  ;;  %v2665_v13 = vunpack.c.l.s8.bf16 %v2313_v53 }
 0x6a6   :  { %2943 = vmatpush1.bf16.msra.mxu0 %v2623_v2  ;;  %3115 = vmatpush1.bf16.msra.mxu1 %v2625_v4  ;;  %v2316_v2 = vld [vmem:[#allocation3 + $0x3d0] sm:$0xff]  ;;  %v2315_v4 = vld [vmem:[#allocation3 + $0x3c8] sm:$0xff] }
 0x6a7   :  { %2944 = vmatprep.subr.bf16.mxu0 %v2631_v15  ;;  %3116 = vmatprep.subr.bf16.mxu1 %v2633_v9  ;;  %v2668_v6 = vunpack.c.l.s8.bf16 %v2316_v2  ;;  %v2667_v3 = vunpack.c.l.s8.bf16 %v2315_v4  ;;  %v2675_v5 = vunpack.c.h.s8.bf16 %v2316_v2  ;;  %v2672_v15 = vunpack.c.h.s8.bf16 %v2313_v53 }
 0x6a8   :  { %v2674_v9 = vunpack.c.h.s8.bf16 %v2315_v4 }
 0x6aa   :  { %2945 = vmatpush1.bf16.msra.mxu0 %v2630_v50  ;;  %3117 = vmatpush1.bf16.msra.mxu1 %v2632_v63  ;;  %v2320_v50 = vld [vmem:[#allocation3 + $0x3f0] sm:$0xff]  ;;  %v2322_v63 = vld [vmem:[#allocation3 + $0x400] sm:$0xff] }
 0x6ab   :  { %2946 = vmatprep.subr.bf16.mxu0 %v2638_v23  ;;  %3118 = vmatprep.subr.bf16.mxu1 %v2640_v58  ;;  %v2679_v23 = vunpack.c.l.s8.bf16 %v2320_v50  ;;  %v2681_v58 = vunpack.c.l.s8.bf16 %v2322_v63 }
 0x6ae   :  { %2947 = vmatpush1.bf16.msra.mxu0 %v2637_v60  ;;  %3119 = vmatpush1.bf16.msra.mxu1 %v2639_v14  ;;  %v2328_v60 = vld [vmem:[#allocation3 + $0x430] sm:$0xff]  ;;  %v2330_v14 = vld [vmem:[#allocation3 + $0x440] sm:$0xff] }
 0x6af   :  { %2948 = vmatprep.subr.bf16.mxu0 %v2645_v37  ;;  %3120 = vmatprep.subr.bf16.mxu1 %v2647_v54  ;;  %v2686_v37 = vunpack.c.h.s8.bf16 %v2320_v50  ;;  %v2688_v54 = vunpack.c.h.s8.bf16 %v2322_v63  ;;  %v2694_v36 = vunpack.c.l.s8.bf16 %v2328_v60  ;;  %v2696_v39 = vunpack.c.l.s8.bf16 %v2330_v14 }
 0x6b0   :  { %v2701_v42 = vunpack.c.h.s8.bf16 %v2328_v60  ;;  %v2703_v57 = vunpack.c.h.s8.bf16 %v2330_v14 }
 0x6b2   :  { %2949 = vmatpush1.bf16.msra.mxu0 %v2644_v31  ;;  %3121 = vmatpush1.bf16.msra.mxu1 %v2646_v55  ;;  %v2327_v31 = vld [vmem:[#allocation3 + $0x428] sm:$0xff]  ;;  %v2329_v55 = vld [vmem:[#allocation3 + $0x438] sm:$0xff] }
 0x6b3   :  { %2961 = vmatprep.subr.bf16.mxu0 %v2652_v40  ;;  %3133 = vmatprep.subr.bf16.mxu1 %v2654_v1  ;;  %v2693_v40 = vunpack.c.l.s8.bf16 %v2327_v31  ;;  %v2695_v1 = vunpack.c.l.s8.bf16 %v2329_v55 }
 0x6b5   :  { %2951 = vmatmul.mubr.bf16.vlgmr.msra.gmra.mrb[12].mxu0 %v4856_v51  ;;  %3123 = vmatmul.mubr.bf16.vlgmr.msra.gmra.mrb[20].mxu1 %v4856_v51 }
 0x6b6   :  { %2962 = vmatpush1.bf16.msra.mxu0 %v2651_v29  ;;  %3134 = vmatpush1.bf16.msra.mxu1 %v2653_v24  ;;  %v2335_v29 = vld [vmem:[#allocation3 + $0x468] sm:$0xff]  ;;  %v2337_v24 = vld [vmem:[#allocation3 + $0x478] sm:$0xff] }
 0x6b7   :  { %2963 = vmatprep.subr.bf16.mxu0 %v2659_v34  ;;  %3135 = vmatprep.subr.bf16.mxu1 %v2661_v52  ;;  %v2700_v34 = vunpack.c.h.s8.bf16 %v2327_v31  ;;  %v2702_v52 = vunpack.c.h.s8.bf16 %v2329_v55  ;;  %v2708_v27 = vunpack.c.l.s8.bf16 %v2335_v29  ;;  %v2710_v2 = vunpack.c.l.s8.bf16 %v2337_v24 }
 0x6b8   :  { %2993 = vmatprep.mubr.bf16.mxu0 %v4864_v35  ;;  %3165 = vmatprep.mubr.bf16.mxu1 %v4864_v35  ;;  %v2715_v53 = vunpack.c.h.s8.bf16 %v2335_v29  ;;  %v2717_v4 = vunpack.c.h.s8.bf16 %v2337_v24 }
 0x6ba   :  { %2964 = vmatpush1.bf16.msra.mxu0 %v2658_v28  ;;  %3136 = vmatpush1.bf16.msra.mxu1 %v2660_v18  ;;  %v2334_v28 = vld [vmem:[#allocation3 + $0x460] sm:$0xff]  ;;  %v2336_v18 = vld [vmem:[#allocation3 + $0x470] sm:$0xff] }
 0x6bb   :  { %2965 = vmatprep.subr.bf16.mxu0 %v2666_v26  ;;  %3137 = vmatprep.subr.bf16.mxu1 %v2668_v6  ;;  %v2707_v26 = vunpack.c.l.s8.bf16 %v2334_v28  ;;  %v2709_v6 = vunpack.c.l.s8.bf16 %v2336_v18 }
 0x6be   :  { %2966 = vmatpush1.bf16.msra.mxu0 %v2665_v13  ;;  %3138 = vmatpush1.bf16.msra.mxu1 %v2667_v3  ;;  %v2342_v13 = vld [vmem:[#allocation3 + $0x4a0] sm:$0xff]  ;;  %v2344_v3 = vld [vmem:[#allocation3 + $0x4b0] sm:$0xff] }
 0x6bf   :  { %2967 = vmatprep.subr.bf16.mxu0 %v2673_v17  ;;  %3139 = vmatprep.subr.bf16.mxu1 %v2675_v5  ;;  %v2714_v17 = vunpack.c.h.s8.bf16 %v2334_v28  ;;  %v2716_v5 = vunpack.c.h.s8.bf16 %v2336_v18  ;;  %v2722_v25 = vunpack.c.l.s8.bf16 %v2342_v13  ;;  %v2724_v32 = vunpack.c.l.s8.bf16 %v2344_v3 }
 0x6c0   :  { %v2729_v50 = vunpack.c.h.s8.bf16 %v2342_v13  ;;  %v2731_v63 = vunpack.c.h.s8.bf16 %v2344_v3 }
 0x6c2   :  { %2968 = vmatpush1.bf16.msra.mxu0 %v2672_v15  ;;  %3140 = vmatpush1.bf16.msra.mxu1 %v2674_v9  ;;  %v2341_v15 = vld [vmem:[#allocation3 + $0x498] sm:$0xff]  ;;  %v2343_v9 = vld [vmem:[#allocation3 + $0x4a8] sm:$0xff] }
 0x6c3   :  { %2969 = vmatprep.subr.bf16.mxu0 %v2680_v61  ;;  %3141 = vmatprep.subr.bf16.mxu1 %v2682_v59  ;;  %v2721_v61 = vunpack.c.l.s8.bf16 %v2341_v15  ;;  %v2723_v59 = vunpack.c.l.s8.bf16 %v2343_v9 }
 0x6c6   :  { %2970 = vmatpush1.bf16.msra.mxu0 %v2679_v23  ;;  %3142 = vmatpush1.bf16.msra.mxu1 %v2681_v58  ;;  %v2349_v23 = vld [vmem:[#allocation3 + $0x4d8] sm:$0xff]  ;;  %v2351_v58 = vld [vmem:[#allocation3 + $0x4e8] sm:$0xff] }
 0x6c7   :  { %2971 = vmatprep.subr.bf16.mxu0 %v2687_v33  ;;  %3143 = vmatprep.subr.bf16.mxu1 %v2689_v62  ;;  %v2728_v33 = vunpack.c.h.s8.bf16 %v2341_v15  ;;  %v2730_v62 = vunpack.c.h.s8.bf16 %v2343_v9  ;;  %v2736_v60 = vunpack.c.l.s8.bf16 %v2349_v23  ;;  %v2738_v14 = vunpack.c.l.s8.bf16 %v2351_v58 }
 0x6c8   :  { %v2743_v31 = vunpack.c.h.s8.bf16 %v2349_v23  ;;  %v2745_v55 = vunpack.c.h.s8.bf16 %v2351_v58  ;;  %v2372_v23 = vld [vmem:[#allocation3 + $0x590] sm:$0xff]  ;;  %v4979_v58 = vmax.f32 %v4740_v20, %v4775_v16 }
 0x6ca   :  { %2972 = vmatpush1.bf16.msra.mxu0 %v2686_v37  ;;  %3144 = vmatpush1.bf16.msra.mxu1 %v2688_v54  ;;  %v2348_v37 = vld [vmem:[#allocation3 + $0x4d0] sm:$0xff]  ;;  %v2350_v54 = vld [vmem:[#allocation3 + $0x4e0] sm:$0xff] }
 0x6cb   :  { %2973 = vmatprep.subr.bf16.mxu0 %v2694_v36  ;;  %3145 = vmatprep.subr.bf16.mxu1 %v2696_v39  ;;  %v2735_v36 = vunpack.c.l.s8.bf16 %v2348_v37  ;;  %v2737_v39 = vunpack.c.l.s8.bf16 %v2350_v54 }
 0x6ce   :  { %2974 = vmatpush1.bf16.msra.mxu0 %v2693_v40  ;;  %3146 = vmatpush1.bf16.msra.mxu1 %v2695_v1  ;;  %v2356_v40 = vld [vmem:[#allocation3 + $0x510] sm:$0xff]  ;;  %v2358_v1 = vld [vmem:[#allocation3 + $0x520] sm:$0xff] }
 0x6cf   :  { %2975 = vmatprep.subr.bf16.mxu0 %v2701_v42  ;;  %3147 = vmatprep.subr.bf16.mxu1 %v2703_v57  ;;  %v2742_v42 = vunpack.c.h.s8.bf16 %v2348_v37  ;;  %v2744_v57 = vunpack.c.h.s8.bf16 %v2350_v54  ;;  %v2750_v29 = vunpack.c.l.s8.bf16 %v2356_v40  ;;  %v2752_v24 = vunpack.c.l.s8.bf16 %v2358_v1  ;;  %v2377_v37 = vld [vmem:[#allocation3 + $0x5b8] sm:$0xff]  ;;  %v2379_v54 = vld [vmem:[#allocation3 + $0x5c8] sm:$0xff] }
 0x6d0   :  { %v2757_v28 = vunpack.c.h.s8.bf16 %v2356_v40  ;;  %v2759_v18 = vunpack.c.h.s8.bf16 %v2358_v1  ;;  %v2376_v40 = vld [vmem:[#allocation3 + $0x5b0] sm:$0xff]  ;;  %v2378_v1 = vld [vmem:[#allocation3 + $0x5c0] sm:$0xff] }
 0x6d2   :  { %2976 = vmatpush1.bf16.msra.mxu0 %v2700_v34  ;;  %3148 = vmatpush1.bf16.msra.mxu1 %v2702_v52  ;;  %v2355_v34 = vld [vmem:[#allocation3 + $0x508] sm:$0xff]  ;;  %v2357_v52 = vld [vmem:[#allocation3 + $0x518] sm:$0xff] }
 0x6d3   :  { %2977 = vmatprep.subr.bf16.mxu0 %v2708_v27  ;;  %3149 = vmatprep.subr.bf16.mxu1 %v2710_v2  ;;  %v2749_v27 = vunpack.c.l.s8.bf16 %v2355_v34  ;;  %v2751_v2 = vunpack.c.l.s8.bf16 %v2357_v52 }
 0x6d6   :  { %2978 = vmatpush1.bf16.msra.mxu0 %v2707_v26  ;;  %3150 = vmatpush1.bf16.msra.mxu1 %v2709_v6  ;;  %v2363_v26 = vld [vmem:[#allocation3 + $0x548] sm:$0xff]  ;;  %v2365_v6 = vld [vmem:[#allocation3 + $0x558] sm:$0xff] }
 0x6d7   :  { %2979 = vmatprep.subr.bf16.mxu0 %v2715_v53  ;;  %3151 = vmatprep.subr.bf16.mxu1 %v2717_v4  ;;  %v2756_v53 = vunpack.c.h.s8.bf16 %v2355_v34  ;;  %v2758_v4 = vunpack.c.h.s8.bf16 %v2357_v52  ;;  %v2764_v13 = vunpack.c.l.s8.bf16 %v2363_v26  ;;  %v2766_v3 = vunpack.c.l.s8.bf16 %v2365_v6  ;;  %v2384_v34 = vld [vmem:[#allocation3 + $0x5f0] sm:$0xff]  ;;  %v2386_v52 = vld [vmem:[#allocation3 + $0x600] sm:$0xff] }
 0x6da   :  { %2980 = vmatpush1.bf16.msra.mxu0 %v2714_v17  ;;  %3152 = vmatpush1.bf16.msra.mxu1 %v2716_v5  ;;  %v2362_v17 = vld [vmem:[#allocation3 + $0x540] sm:$0xff]  ;;  %v2364_v5 = vld [vmem:[#allocation3 + $0x550] sm:$0xff] }
 0x6db   :  { %2981 = vmatprep.subr.bf16.mxu0 %v2722_v25  ;;  %3153 = vmatprep.subr.bf16.mxu1 %v2724_v32  ;;  %v4977_v25 = vmax.f32 %v4734_v12, %v4766_v30  ;;  %v4978_v32 = vmax.f32 %v4748_v11, %v4789_v19  ;;  %v2763_v9 = vunpack.c.l.s8.bf16 %v2362_v17  ;;  %v4980_v12 = vmax.f32 %v4760_v8, %v4800_v43 }
 0x6dc   :  { %v2770_v11 = vunpack.c.h.s8.bf16 %v2362_v17  ;;  %v2772_v19 = vunpack.c.h.s8.bf16 %v2364_v5  ;;  %v2787_v43 = vunpack.c.h.s8.bf16 %v2372_v23  ;;  %v2391_v17 = vld [vmem:[#allocation3 + $0x628] sm:$0xff] }
 0x6dd   :  { %v4876_v15 = vpack.c.bf16 %v4978_v32, %v4977_v25  ;;  %v4884_v30 = vpack.c.bf16 %v4980_v12, %v4979_v58  ;;  %v2827_v58 = vunpack.c.h.s8.bf16 %v2391_v17 }
 0x6de   :  { %2982 = vmatpush1.bf16.msra.mxu0 %v2721_v61  ;;  %3154 = vmatpush1.bf16.msra.mxu1 %v2723_v59  ;;  %v2765_v61 = vunpack.c.l.s8.bf16 %v2364_v5  ;;  %v2771_v59 = vunpack.c.h.s8.bf16 %v2363_v26  ;;  %v2383_v26 = vld [vmem:[#allocation3 + $0x5e8] sm:$0xff]  ;;  %v2393_v5 = vld [vmem:[#allocation3 + $0x638] sm:$0xff] }
 0x6df   :  { %2983 = vmatprep.subr.bf16.mxu0 %v2729_v50  ;;  %3155 = vmatprep.subr.bf16.mxu1 %v2731_v63  ;;  %v2773_v50 = vunpack.c.h.s8.bf16 %v2365_v6  ;;  %v2370_v63 = vld [vmem:[#allocation3 + $0x580] sm:$0xff]  ;;  %v2385_v6 = vld [vmem:[#allocation3 + $0x5f8] sm:$0xff]  ;;  %v2812_v25 = vunpack.c.h.s8.bf16 %v2383_v26  ;;  %v2829_v12 = vunpack.c.h.s8.bf16 %v2393_v5 }
 0x6e0   :  { %v2785_v16 = vunpack.c.h.s8.bf16 %v2370_v63  ;;  %v2814_v32 = vunpack.c.h.s8.bf16 %v2385_v6 }
 0x6e2   :  { %2984 = vmatpush1.bf16.msra.mxu0 %v2728_v33  ;;  %3156 = vmatpush1.bf16.msra.mxu1 %v2730_v62  ;;  %v2778_v33 = vunpack.c.l.s8.bf16 %v2370_v63  ;;  %v2780_v62 = vunpack.c.l.s8.bf16 %v2372_v23 }
 0x6e3   :  { %2985 = vmatprep.subr.bf16.mxu0 %v2736_v60  ;;  %3157 = vmatprep.subr.bf16.mxu1 %v2738_v14  ;;  %v2369_v60 = vld [vmem:[#allocation3 + $0x578] sm:$0xff]  ;;  %v2371_v14 = vld [vmem:[#allocation3 + $0x588] sm:$0xff] }
 0x6e4   :  { %v2777_v20 = vunpack.c.l.s8.bf16 %v2369_v60  ;;  %v2779_v8 = vunpack.c.l.s8.bf16 %v2371_v14 }
 0x6e6   :  { %2986 = vmatpush1.bf16.msra.mxu0 %v2735_v36  ;;  %3158 = vmatpush1.bf16.msra.mxu1 %v2737_v39  ;;  %v2784_v36 = vunpack.c.h.s8.bf16 %v2369_v60  ;;  %v2786_v39 = vunpack.c.h.s8.bf16 %v2371_v14 }
 0x6e7   :  { %2987 = vmatprep.subr.bf16.mxu0 %v2743_v31  ;;  %3159 = vmatprep.subr.bf16.mxu1 %v2745_v55  ;;  %v2792_v31 = vunpack.c.l.s8.bf16 %v2377_v37  ;;  %v2794_v55 = vunpack.c.l.s8.bf16 %v2379_v54 }
 0x6ea   :  { %2988 = vmatpush1.bf16.msra.mxu0 %v2742_v42  ;;  %3160 = vmatpush1.bf16.msra.mxu1 %v2744_v57  ;;  %v2791_v42 = vunpack.c.l.s8.bf16 %v2376_v40  ;;  %v2793_v57 = vunpack.c.l.s8.bf16 %v2378_v1 }
 0x6eb   :  { %2989 = vmatprep.subr.bf16.mxu0 %v2750_v29  ;;  %3161 = vmatprep.subr.bf16.mxu1 %v2752_v24  ;;  %v2799_v29 = vunpack.c.h.s8.bf16 %v2377_v37  ;;  %v2801_v24 = vunpack.c.h.s8.bf16 %v2379_v54 }
 0x6ee   :  { %2990 = vmatpush1.bf16.msra.mxu0 %v2749_v27  ;;  %3162 = vmatpush1.bf16.msra.mxu1 %v2751_v2  ;;  %v2798_v27 = vunpack.c.h.s8.bf16 %v2376_v40  ;;  %v2800_v2 = vunpack.c.h.s8.bf16 %v2378_v1 }
 0x6ef   :  { %2991 = vmatprep.subr.bf16.mxu0 %v2757_v28  ;;  %3163 = vmatprep.subr.bf16.mxu1 %v2759_v18  ;;  %v2806_v28 = vunpack.c.l.s8.bf16 %v2384_v34  ;;  %v2808_v18 = vunpack.c.l.s8.bf16 %v2386_v52 }
 0x6f2   :  { %2992 = vmatpush1.bf16.msra.mxu0 %v2756_v53  ;;  %3164 = vmatpush1.bf16.msra.mxu1 %v2758_v4  ;;  %v2805_v53 = vunpack.c.l.s8.bf16 %v2383_v26  ;;  %v2807_v4 = vunpack.c.l.s8.bf16 %v2385_v6 }
 0x6f3   :  { %3004 = vmatprep.subr.bf16.mxu0 %v2764_v13  ;;  %3176 = vmatprep.subr.bf16.mxu1 %v2766_v3  ;;  %v2813_v13 = vunpack.c.h.s8.bf16 %v2384_v34  ;;  %v2815_v3 = vunpack.c.h.s8.bf16 %v2386_v52 }
 0x6f5   :  { %2994 = vmatmul.mubr.bf16.vlgmr.msra.gmra.mrb[12].mxu0 %v4876_v15  ;;  %3166 = vmatmul.mubr.bf16.vlgmr.msra.gmra.mrb[20].mxu1 %v4876_v15 }
 0x6f6   :  { %3005 = vmatpush1.bf16.msra.mxu0 %v2763_v9  ;;  %3177 = vmatpush1.bf16.msra.mxu1 %v2765_v61  ;;  %v2820_v9 = vunpack.c.l.s8.bf16 %v2391_v17  ;;  %v2822_v61 = vunpack.c.l.s8.bf16 %v2393_v5 }
 0x6f7   :  { %3006 = vmatprep.subr.bf16.mxu0 %v2771_v59  ;;  %3178 = vmatprep.subr.bf16.mxu1 %v2773_v50  ;;  %v2390_v59 = vld [vmem:[#allocation3 + $0x620] sm:$0xff]  ;;  %v2392_v50 = vld [vmem:[#allocation3 + $0x630] sm:$0xff] }
 0x6f8   :  { %3036 = vmatprep.mubr.bf16.mxu0 %v4884_v30  ;;  %3208 = vmatprep.mubr.bf16.mxu1 %v4884_v30  ;;  %v2819_v63 = vunpack.c.l.s8.bf16 %v2390_v59  ;;  %v2821_v23 = vunpack.c.l.s8.bf16 %v2392_v50 }
 0x6fa   :  { %3007 = vmatpush1.bf16.msra.mxu0 %v2770_v11  ;;  %3179 = vmatpush1.bf16.msra.mxu1 %v2772_v19  ;;  %v2398_v11 = vld [vmem:[#allocation3 + $0x660] sm:$0xff]  ;;  %v2400_v19 = vld [vmem:[#allocation3 + $0x670] sm:$0xff] }
 0x6fb   :  { %3008 = vmatprep.subr.bf16.mxu0 %v2778_v33  ;;  %3180 = vmatprep.subr.bf16.mxu1 %v2780_v62  ;;  %v2826_v33 = vunpack.c.h.s8.bf16 %v2390_v59  ;;  %v2828_v62 = vunpack.c.h.s8.bf16 %v2392_v50  ;;  %v2834_v60 = vunpack.c.l.s8.bf16 %v2398_v11  ;;  %v2836_v14 = vunpack.c.l.s8.bf16 %v2400_v19  ;;  %v2198_v50 = vld [vmem:[#allocation3 + $0x20] sm:$0xff] }
 0x6fc   :  { %v2841_v37 = vunpack.c.h.s8.bf16 %v2398_v11  ;;  %v2843_v54 = vunpack.c.h.s8.bf16 %v2400_v19  ;;  %v2431_v19 = vunpack.c.l.s8.bf16 %v2198_v50 }
 0x6fe   :  { %3009 = vmatpush1.bf16.msra.mxu0 %v2777_v20  ;;  %3181 = vmatpush1.bf16.msra.mxu1 %v2779_v8  ;;  %v2397_v20 = vld [vmem:[#allocation3 + $0x658] sm:$0xff]  ;;  %v2399_v8 = vld [vmem:[#allocation3 + $0x668] sm:$0xff] }
 0x6ff   :  { %3010 = vmatprep.subr.bf16.mxu0 %v2785_v16  ;;  %3182 = vmatprep.subr.bf16.mxu1 %v2787_v43  ;;  %v2833_v16 = vunpack.c.l.s8.bf16 %v2397_v20  ;;  %v2835_v43 = vunpack.c.l.s8.bf16 %v2399_v8 }
 0x702   :  { %3011 = vmatpush1.bf16.msra.mxu0 %v2784_v36  ;;  %3183 = vmatpush1.bf16.msra.mxu1 %v2786_v39  ;;  %v2405_v36 = vld [vmem:[#allocation3 + $0x698] sm:$0xff]  ;;  %v2407_v39 = vld [vmem:[#allocation3 + $0x6a8] sm:$0xff] }
 0x703   :  { %3012 = vmatprep.subr.bf16.mxu0 %v2792_v31  ;;  %3184 = vmatprep.subr.bf16.mxu1 %v2794_v55  ;;  %v2840_v31 = vunpack.c.h.s8.bf16 %v2397_v20  ;;  %v2842_v55 = vunpack.c.h.s8.bf16 %v2399_v8  ;;  %v2848_v40 = vunpack.c.l.s8.bf16 %v2405_v36  ;;  %v2850_v1 = vunpack.c.l.s8.bf16 %v2407_v39  ;;  %v2235_v20 = vld [vmem:[#allocation3 + $0x148] sm:$0xff] }
 0x704   :  { %v2855_v34 = vunpack.c.h.s8.bf16 %v2405_v36  ;;  %v2857_v52 = vunpack.c.h.s8.bf16 %v2407_v39  ;;  %v2503_v8 = vunpack.c.l.s8.bf16 %v2235_v20  ;;  %v2510_v36 = vunpack.c.h.s8.bf16 %v2235_v20  ;;  %v2213_v39 = vld [vmem:[#allocation3 + $0x98] sm:$0xff] }
 0x706   :  { %3013 = vmatpush1.bf16.msra.mxu0 %v2791_v42  ;;  %3185 = vmatpush1.bf16.msra.mxu1 %v2793_v57  ;;  %v2404_v42 = vld [vmem:[#allocation3 + $0x690] sm:$0xff]  ;;  %v2406_v57 = vld [vmem:[#allocation3 + $0x6a0] sm:$0xff] }
 0x707   :  { %3014 = vmatprep.subr.bf16.mxu0 %v2799_v29  ;;  %3186 = vmatprep.subr.bf16.mxu1 %v2801_v24  ;;  %v2847_v29 = vunpack.c.l.s8.bf16 %v2404_v42  ;;  %v2849_v24 = vunpack.c.l.s8.bf16 %v2406_v57 }
 0x70a   :  { %3015 = vmatpush1.bf16.msra.mxu0 %v2798_v27  ;;  %3187 = vmatpush1.bf16.msra.mxu1 %v2800_v2  ;;  %v2412_v27 = vld [vmem:[#allocation3 + $0x6d0] sm:$0xff]  ;;  %v2414_v2 = vld [vmem:[#allocation3 + $0x6e0] sm:$0xff] }
 0x70b   :  { %3016 = vmatprep.subr.bf16.mxu0 %v2806_v28  ;;  %3188 = vmatprep.subr.bf16.mxu1 %v2808_v18  ;;  %v2854_v28 = vunpack.c.h.s8.bf16 %v2404_v42  ;;  %v2856_v18 = vunpack.c.h.s8.bf16 %v2406_v57  ;;  %v2862_v26 = vunpack.c.l.s8.bf16 %v2412_v27  ;;  %v2864_v6 = vunpack.c.l.s8.bf16 %v2414_v2  ;;  %v2212_v42 = vld [vmem:[#allocation3 + $0x90] sm:$0xff] }
 0x70c   :  { %v2869_v17 = vunpack.c.h.s8.bf16 %v2412_v27  ;;  %v2871_v5 = vunpack.c.h.s8.bf16 %v2414_v2  ;;  %v2220_v27 = vld [vmem:[#allocation3 + $0xd0] sm:$0xff]  ;;  %v2249_v2 = vld [vmem:[#allocation3 + $0x1b8] sm:$0xff] }
 0x70e   :  { %3017 = vmatpush1.bf16.msra.mxu0 %v2805_v53  ;;  %3189 = vmatpush1.bf16.msra.mxu1 %v2807_v4  ;;  %v2411_v53 = vld [vmem:[#allocation3 + $0x6c8] sm:$0xff]  ;;  %v2413_v4 = vld [vmem:[#allocation3 + $0x6d8] sm:$0xff] }
 0x70f   :  { %3018 = vmatprep.subr.bf16.mxu0 %v2813_v13  ;;  %3190 = vmatprep.subr.bf16.mxu1 %v2815_v3  ;;  %v2861_v13 = vunpack.c.l.s8.bf16 %v2411_v53  ;;  %v2863_v3 = vunpack.c.l.s8.bf16 %v2413_v4 }
 0x712   :  { %3019 = vmatpush1.bf16.msra.mxu0 %v2812_v25  ;;  %3191 = vmatpush1.bf16.msra.mxu1 %v2814_v32  ;;  %v2199_v25 = vld [vmem:[#allocation3 + $0x28] sm:$0xff]  ;;  %v2228_v32 = vld [vmem:[#allocation3 + $0x110] sm:$0xff] }
 0x713   :  { %3020 = vmatprep.subr.bf16.mxu0 %v2820_v9  ;;  %3192 = vmatprep.subr.bf16.mxu1 %v2822_v61  ;;  %v2868_v9 = vunpack.c.h.s8.bf16 %v2411_v53  ;;  %v2870_v61 = vunpack.c.h.s8.bf16 %v2413_v4  ;;  %v2432_v59 = vunpack.c.l.s8.bf16 %v2199_v25  ;;  %v2531_v53 = vunpack.c.l.s8.bf16 %v2249_v2  ;;  %v2221_v4 = vld [vmem:[#allocation3 + $0xd8] sm:$0xff] }
 0x716   :  { %3021 = vmatpush1.bf16.msra.mxu0 %v2819_v63  ;;  %3193 = vmatpush1.bf16.msra.mxu1 %v2821_v23  ;;  %v2489_v63 = vunpack.c.l.s8.bf16 %v2228_v32  ;;  %v2200_v23 = vld [vmem:[#allocation3 + $0x30] sm:$0xff] }
 0x717   :  { %3022 = vmatprep.subr.bf16.mxu0 %v2827_v58  ;;  %3194 = vmatprep.subr.bf16.mxu1 %v2829_v12  ;;  %v4981_v58 = vmax.f32 %v4738_v7, %v4772_v21  ;;  %v4982_v12 = vmax.f32 %v4752_v22, %v4795_v10  ;;  %v2438_v7 = vunpack.c.h.s8.bf16 %v2198_v50  ;;  %v2440_v22 = vunpack.c.h.s8.bf16 %v2200_v23  ;;  %v2205_v10 = vld [vmem:[#allocation3 + $0x58] sm:$0xff]  ;;  %v2226_v50 = vld [vmem:[#allocation3 + $0x100] sm:$0xff] }
 0x719   :  { %v4896_v11 = vpack.c.bf16 %v4982_v12, %v4981_v58  ;;  %v2487_v58 = vunpack.c.l.s8.bf16 %v2226_v50 }
 0x71a   :  { %3023 = vmatpush1.bf16.msra.mxu0 %v2826_v33  ;;  %3195 = vmatpush1.bf16.msra.mxu1 %v2828_v62  ;;  %v2433_v33 = vunpack.c.l.s8.bf16 %v2200_v23  ;;  %v2439_v62 = vunpack.c.h.s8.bf16 %v2199_v25  ;;  %v2227_v25 = vld [vmem:[#allocation3 + $0x108] sm:$0xff]  ;;  %v2256_v23 = vld [vmem:[#allocation3 + $0x1f0] sm:$0xff] }
 0x71b   :  { %3024 = vmatprep.subr.bf16.mxu0 %v2834_v60  ;;  %3196 = vmatprep.subr.bf16.mxu1 %v2836_v14  ;;  %v2496_v60 = vunpack.c.h.s8.bf16 %v2228_v32  ;;  %v2206_v14 = vld [vmem:[#allocation3 + $0x60] sm:$0xff]  ;;  %v2284_v32 = vld [vmem:[#allocation3 + $0x2d0] sm:$0xff]  ;;  %v2545_v12 = vunpack.c.l.s8.bf16 %v2256_v23  ;;  %v2552_v20 = vunpack.c.h.s8.bf16 %v2256_v23 }
 0x71c   :  { %v2446_v21 = vunpack.c.l.s8.bf16 %v2206_v14 }
 0x71e   :  { %3025 = vmatpush1.bf16.msra.mxu0 %v2833_v16  ;;  %3197 = vmatpush1.bf16.msra.mxu1 %v2835_v43  ;;  %v2207_v16 = vld [vmem:[#allocation3 + $0x68] sm:$0xff]  ;;  %v2445_v43 = vunpack.c.l.s8.bf16 %v2205_v10 }
 0x71f   :  { %3026 = vmatprep.subr.bf16.mxu0 %v2841_v37  ;;  %3198 = vmatprep.subr.bf16.mxu1 %v2843_v54  ;;  %v2447_v37 = vunpack.c.l.s8.bf16 %v2207_v16  ;;  %v2453_v54 = vunpack.c.h.s8.bf16 %v2206_v14  ;;  %v2494_v14 = vunpack.c.h.s8.bf16 %v2226_v50  ;;  %v2312_v50 = vld [vmem:[#allocation3 + $0x3b0] sm:$0xff] }
 0x720   :  { %v2657_v23 = vunpack.c.l.s8.bf16 %v2312_v50 }
 0x722   :  { %3027 = vmatpush1.bf16.msra.mxu0 %v2840_v31  ;;  %3199 = vmatpush1.bf16.msra.mxu1 %v2842_v55  ;;  %v2242_v31 = vld [vmem:[#allocation3 + $0x180] sm:$0xff]  ;;  %v2452_v55 = vunpack.c.h.s8.bf16 %v2205_v10  ;;  %v2263_v10 = vld [vmem:[#allocation3 + $0x228] sm:$0xff] }
 0x723   :  { %3028 = vmatprep.subr.bf16.mxu0 %v2848_v40  ;;  %3200 = vmatprep.subr.bf16.mxu1 %v2850_v1  ;;  %v2454_v40 = vunpack.c.h.s8.bf16 %v2207_v16  ;;  %v2460_v1 = vunpack.c.l.s8.bf16 %v2213_v39  ;;  %v2517_v57 = vunpack.c.l.s8.bf16 %v2242_v31  ;;  %v2559_v16 = vunpack.c.l.s8.bf16 %v2263_v10 }
 0x726   :  { %3029 = vmatpush1.bf16.msra.mxu0 %v2847_v29  ;;  %3201 = vmatpush1.bf16.msra.mxu1 %v2849_v24  ;;  %v2459_v29 = vunpack.c.l.s8.bf16 %v2212_v42 }
 0x727   :  { %3030 = vmatprep.subr.bf16.mxu0 %v2855_v34  ;;  %3202 = vmatprep.subr.bf16.mxu1 %v2857_v52  ;;  %v2467_v34 = vunpack.c.h.s8.bf16 %v2213_v39  ;;  %v2524_v52 = vunpack.c.h.s8.bf16 %v2242_v31  ;;  %v2566_v31 = vunpack.c.h.s8.bf16 %v2263_v10 }
 0x72a   :  { %3031 = vmatpush1.bf16.msra.mxu0 %v2854_v28  ;;  %3203 = vmatpush1.bf16.msra.mxu1 %v2856_v18  ;;  %v2466_v28 = vunpack.c.h.s8.bf16 %v2212_v42  ;;  %v2270_v42 = vld [vmem:[#allocation3 + $0x260] sm:$0xff] }
 0x72b   :  { %3032 = vmatprep.subr.bf16.mxu0 %v2862_v26  ;;  %3204 = vmatprep.subr.bf16.mxu1 %v2864_v6  ;;  %v2474_v26 = vunpack.c.l.s8.bf16 %v2220_v27  ;;  %v2219_v6 = vld [vmem:[#allocation3 + $0xc8] sm:$0xff] }
 0x72e   :  { %3033 = vmatpush1.bf16.msra.mxu0 %v2861_v13  ;;  %3205 = vmatpush1.bf16.msra.mxu1 %v2863_v3  ;;  %v2473_v13 = vunpack.c.l.s8.bf16 %v2219_v6  ;;  %v2475_v3 = vunpack.c.l.s8.bf16 %v2221_v4 }
 0x72f   :  { %3034 = vmatprep.subr.bf16.mxu0 %v2869_v17  ;;  %3206 = vmatprep.subr.bf16.mxu1 %v2871_v5  ;;  %v2481_v17 = vunpack.c.h.s8.bf16 %v2220_v27  ;;  %v2538_v5 = vunpack.c.h.s8.bf16 %v2249_v2  ;;  %v2580_v2 = vunpack.c.h.s8.bf16 %v2270_v42 }
 0x732   :  { %3035 = vmatpush1.bf16.msra.mxu0 %v2868_v9  ;;  %3207 = vmatpush1.bf16.msra.mxu1 %v2870_v61  ;;  %v2480_v9 = vunpack.c.h.s8.bf16 %v2219_v6  ;;  %v2482_v61 = vunpack.c.h.s8.bf16 %v2221_v4  ;;  %v2277_v6 = vld [vmem:[#allocation3 + $0x298] sm:$0xff] }
 0x733   :  { %3219 = vmatprep.subr.bf16.mxu0 %v2432_v59  ;;  %3729 = vmatprep.subr.bf16.mxu1 %v2489_v63  ;;  %v2488_v59 = vunpack.c.l.s8.bf16 %v2227_v25  ;;  %v2601_v63 = vunpack.c.l.s8.bf16 %v2284_v32  ;;  %v2587_v4 = vunpack.c.l.s8.bf16 %v2277_v6 }
 0x735   :  { %3037 = vmatmul.mubr.bf16.vlgmr.msra.gmra.mrb[12].mxu0 %v4896_v11  ;;  %3209 = vmatmul.mubr.bf16.vlgmr.msra.gmra.mrb[20].mxu1 %v4896_v11 }
 0x736   :  { %3220 = vmatpush1.bf16.msra.mxu0 %v2431_v19  ;;  %3730 = vmatpush3.bf16.msra.mxu1 %v2433_v33  ;;  %v2495_v19 = vunpack.c.h.s8.bf16 %v2227_v25  ;;  %v2608_v33 = vunpack.c.h.s8.bf16 %v2284_v32  ;;  %v2594_v32 = vunpack.c.h.s8.bf16 %v2277_v6 }
 0x737   :  { %3221 = vmatprep.subr.bf16.mxu0 %v2439_v62  ;;  %3731 = vmatprep.subr.bf16.mxu1 %v2496_v60  ;;  %v2234_v62 = vld [vmem:[#allocation3 + $0x140] sm:$0xff]  ;;  %v2291_v60 = vld [vmem:[#allocation3 + $0x308] sm:$0xff] }
 0x738   :  { %3423 = vmatprep.mubr.bf16.mxu1 %v4826_v56  ;;  %3251 = vmatprep.mubr.bf16.mxu0 %v4826_v56  ;;  %v2214_v56 = vld [vmem:[#allocation3 + $0xa0] sm:$0xff] }
 0x739   :  { %v2461_v24 = vunpack.c.l.s8.bf16 %v2214_v56  ;;  %v2468_v18 = vunpack.c.h.s8.bf16 %v2214_v56  ;;  %v2573_v56 = vunpack.c.l.s8.bf16 %v2270_v42 }
 0x73a   :  { %3222 = vmatpush1.bf16.msra.mxu0 %v2438_v7  ;;  %3732 = vmatpush3.bf16.msra.mxu1 %v2440_v22  ;;  %v2502_v7 = vunpack.c.l.s8.bf16 %v2234_v62  ;;  %v2233_v22 = vld [vmem:[#allocation3 + $0x138] sm:$0xff] }
 0x73b   :  { %3223 = vmatprep.subr.bf16.mxu0 %v2446_v21  ;;  %3733 = vmatprep.subr.bf16.mxu1 %v2503_v8  ;;  %v2615_v21 = vunpack.c.l.s8.bf16 %v2291_v60  ;;  %v2501_v8 = vunpack.c.l.s8.bf16 %v2233_v22  ;;  %v2508_v39 = vunpack.c.h.s8.bf16 %v2233_v22  ;;  %v2319_v22 = vld [vmem:[#allocation3 + $0x3e8] sm:$0xff] }
 0x73e   :  { %3224 = vmatpush1.bf16.msra.mxu0 %v2445_v43  ;;  %3734 = vmatpush3.bf16.msra.mxu1 %v2447_v37  ;;  %v2509_v43 = vunpack.c.h.s8.bf16 %v2234_v62  ;;  %v2622_v37 = vunpack.c.h.s8.bf16 %v2291_v60  ;;  %v2664_v60 = vunpack.c.h.s8.bf16 %v2312_v50 }
 0x73f   :  { %3225 = vmatprep.subr.bf16.mxu0 %v2453_v54  ;;  %3735 = vmatprep.subr.bf16.mxu1 %v2510_v36  ;;  %v2241_v54 = vld [vmem:[#allocation3 + $0x178] sm:$0xff]  ;;  %v2298_v36 = vld [vmem:[#allocation3 + $0x340] sm:$0xff] }
 0x742   :  { %3226 = vmatpush1.bf16.msra.mxu0 %v2452_v55  ;;  %3736 = vmatpush3.bf16.msra.mxu1 %v2454_v40  ;;  %v2516_v55 = vunpack.c.l.s8.bf16 %v2241_v54  ;;  %v2240_v40 = vld [vmem:[#allocation3 + $0x170] sm:$0xff] }
 0x743   :  { %3227 = vmatprep.subr.bf16.mxu0 %v2460_v1  ;;  %3737 = vmatprep.subr.bf16.mxu1 %v2517_v57  ;;  %v2629_v1 = vunpack.c.l.s8.bf16 %v2298_v36  ;;  %v2515_v57 = vunpack.c.l.s8.bf16 %v2240_v40  ;;  %v2522_v27 = vunpack.c.h.s8.bf16 %v2240_v40 }
 0x746   :  { %3228 = vmatpush1.bf16.msra.mxu0 %v2459_v29  ;;  %3738 = vmatpush3.bf16.msra.mxu1 %v2461_v24  ;;  %v2523_v29 = vunpack.c.h.s8.bf16 %v2241_v54  ;;  %v2636_v24 = vunpack.c.h.s8.bf16 %v2298_v36  ;;  %v2678_v54 = vunpack.c.h.s8.bf16 %v2319_v22 }
 0x747   :  { %3229 = vmatprep.subr.bf16.mxu0 %v2467_v34  ;;  %3739 = vmatprep.subr.bf16.mxu1 %v2524_v52  ;;  %v2248_v34 = vld [vmem:[#allocation3 + $0x1b0] sm:$0xff]  ;;  %v2305_v52 = vld [vmem:[#allocation3 + $0x378] sm:$0xff] }
 0x74a   :  { %3230 = vmatpush1.bf16.msra.mxu0 %v2466_v28  ;;  %3740 = vmatpush3.bf16.msra.mxu1 %v2468_v18  ;;  %v2530_v28 = vunpack.c.l.s8.bf16 %v2248_v34  ;;  %v2247_v18 = vld [vmem:[#allocation3 + $0x1a8] sm:$0xff] }
 0x74b   :  { %3231 = vmatprep.subr.bf16.mxu0 %v2474_v26  ;;  %3741 = vmatprep.subr.bf16.mxu1 %v2531_v53  ;;  %v2643_v26 = vunpack.c.l.s8.bf16 %v2305_v52  ;;  %v2529_v53 = vunpack.c.l.s8.bf16 %v2247_v18  ;;  %v2536_v25 = vunpack.c.h.s8.bf16 %v2247_v18 }
 0x74e   :  { %3232 = vmatpush1.bf16.msra.mxu0 %v2473_v13  ;;  %3742 = vmatpush3.bf16.msra.mxu1 %v2475_v3  ;;  %v2537_v13 = vunpack.c.h.s8.bf16 %v2248_v34  ;;  %v2650_v3 = vunpack.c.h.s8.bf16 %v2305_v52  ;;  %v2275_v52 = vld [vmem:[#allocation3 + $0x288] sm:$0xff] }
 0x74f   :  { %3233 = vmatprep.subr.bf16.mxu0 %v2481_v17  ;;  %3743 = vmatprep.subr.bf16.mxu1 %v2538_v5  ;;  %v2255_v17 = vld [vmem:[#allocation3 + $0x1e8] sm:$0xff]  ;;  %v2340_v5 = vld [vmem:[#allocation3 + $0x490] sm:$0xff] }
 0x752   :  { %3234 = vmatpush1.bf16.msra.mxu0 %v2480_v9  ;;  %3744 = vmatpush3.bf16.msra.mxu1 %v2482_v61  ;;  %v2544_v9 = vunpack.c.l.s8.bf16 %v2255_v17  ;;  %v2254_v61 = vld [vmem:[#allocation3 + $0x1e0] sm:$0xff] }
 0x753   :  { %3235 = vmatprep.subr.bf16.mxu0 %v2488_v59  ;;  %3751 = vmatprep.subr.bf16.mxu1 %v2601_v63  ;;  %v2713_v59 = vunpack.c.l.s8.bf16 %v2340_v5  ;;  %v2543_v63 = vunpack.c.l.s8.bf16 %v2254_v61  ;;  %v2550_v62 = vunpack.c.h.s8.bf16 %v2254_v61 }
 0x755   :  { %3424 = vmatmul.mubr.bf16.vlgmr.msra.gmra.mrb[24].mxu1 %v4836_v38 }
 0x756   :  { %3236 = vmatpush1.bf16.msra.mxu0 %v2487_v58  ;;  %3752 = vmatpush3.bf16.msra.mxu1 %v2545_v12  ;;  %v2551_v58 = vunpack.c.h.s8.bf16 %v2255_v17  ;;  %v2720_v12 = vunpack.c.h.s8.bf16 %v2340_v5  ;;  %v2282_v5 = vld [vmem:[#allocation3 + $0x2c0] sm:$0xff] }
 0x757   :  { %3237 = vmatprep.subr.bf16.mxu0 %v2495_v19  ;;  %3753 = vmatprep.subr.bf16.mxu1 %v2608_v33  ;;  %v2262_v19 = vld [vmem:[#allocation3 + $0x220] sm:$0xff]  ;;  %v2347_v33 = vld [vmem:[#allocation3 + $0x4c8] sm:$0xff] }
 0x758   :  { %3464 = vmatprep.mubr.bf16.mxu1 %v4844_v0  ;;  %v2565_v10 = vunpack.c.h.s8.bf16 %v2262_v19 }
 0x75a   :  { %3238 = vmatpush1.bf16.msra.mxu0 %v2494_v14  ;;  %3754 = vmatpush3.bf16.msra.mxu1 %v2552_v20  ;;  %v2558_v14 = vunpack.c.l.s8.bf16 %v2262_v19  ;;  %v2261_v20 = vld [vmem:[#allocation3 + $0x218] sm:$0xff] }
 0x75b   :  { %3239 = vmatprep.subr.bf16.mxu0 %v2502_v7  ;;  %3755 = vmatprep.subr.bf16.mxu1 %v2615_v21  ;;  %v2727_v7 = vunpack.c.l.s8.bf16 %v2347_v33  ;;  %v2557_v21 = vunpack.c.l.s8.bf16 %v2261_v20 }
 0x75e   :  { %3240 = vmatpush1.bf16.msra.mxu0 %v2501_v8  ;;  %3756 = vmatpush3.bf16.msra.mxu1 %v2559_v16  ;;  %v2734_v8 = vunpack.c.h.s8.bf16 %v2347_v33  ;;  %v2269_v16 = vld [vmem:[#allocation3 + $0x258] sm:$0xff] }
 0x75f   :  { %3241 = vmatprep.subr.bf16.mxu0 %v2509_v43  ;;  %3757 = vmatprep.subr.bf16.mxu1 %v2622_v37  ;;  %v2354_v43 = vld [vmem:[#allocation3 + $0x500] sm:$0xff]  ;;  %v2564_v37 = vunpack.c.h.s8.bf16 %v2261_v20  ;;  %v2572_v36 = vunpack.c.l.s8.bf16 %v2269_v16  ;;  %v2289_v33 = vld [vmem:[#allocation3 + $0x2f8] sm:$0xff] }
 0x760   :  { %v2748_v42 = vunpack.c.h.s8.bf16 %v2354_v43 }
 0x762   :  { %3242 = vmatpush1.bf16.msra.mxu0 %v2508_v39  ;;  %3758 = vmatpush3.bf16.msra.mxu1 %v2566_v31  ;;  %v2268_v39 = vld [vmem:[#allocation3 + $0x250] sm:$0xff]  ;;  %v2741_v31 = vunpack.c.l.s8.bf16 %v2354_v43 }
 0x763   :  { %3243 = vmatprep.subr.bf16.mxu0 %v2516_v55  ;;  %3759 = vmatprep.subr.bf16.mxu1 %v2629_v1  ;;  %v2571_v55 = vunpack.c.l.s8.bf16 %v2268_v39  ;;  %v2579_v1 = vunpack.c.h.s8.bf16 %v2269_v16  ;;  %v2296_v43 = vld [vmem:[#allocation3 + $0x330] sm:$0xff] }
 0x766   :  { %3244 = vmatpush1.bf16.msra.mxu0 %v2515_v57  ;;  %3760 = vmatpush3.bf16.msra.mxu1 %v2573_v56  ;;  %v2276_v57 = vld [vmem:[#allocation3 + $0x290] sm:$0xff]  ;;  %v2361_v56 = vld [vmem:[#allocation3 + $0x538] sm:$0xff] }
 0x767   :  { %3245 = vmatprep.subr.bf16.mxu0 %v2523_v29  ;;  %3761 = vmatprep.subr.bf16.mxu1 %v2636_v24  ;;  %v2578_v29 = vunpack.c.h.s8.bf16 %v2268_v39  ;;  %v2586_v34 = vunpack.c.l.s8.bf16 %v2276_v57  ;;  %v2762_v6 = vunpack.c.h.s8.bf16 %v2361_v56 }
 0x76a   :  { %3246 = vmatpush1.bf16.msra.mxu0 %v2522_v27  ;;  %3762 = vmatpush3.bf16.msra.mxu1 %v2580_v2  ;;  %v2755_v27 = vunpack.c.l.s8.bf16 %v2361_v56  ;;  %v2333_v2 = vld [vmem:[#allocation3 + $0x458] sm:$0xff]  ;;  %v2303_v56 = vld [vmem:[#allocation3 + $0x368] sm:$0xff] }
 0x76b   :  { %3247 = vmatprep.subr.bf16.mxu0 %v2530_v28  ;;  %3763 = vmatprep.subr.bf16.mxu1 %v2643_v26  ;;  %v2585_v28 = vunpack.c.l.s8.bf16 %v2275_v52  ;;  %v2699_v18 = vunpack.c.l.s8.bf16 %v2333_v2  ;;  %v2593_v26 = vunpack.c.h.s8.bf16 %v2276_v57 }
 0x76e   :  { %3248 = vmatpush1.bf16.msra.mxu0 %v2529_v53  ;;  %3764 = vmatpush3.bf16.msra.mxu1 %v2587_v4  ;;  %v2283_v53 = vld [vmem:[#allocation3 + $0x2c8] sm:$0xff]  ;;  %v2396_v4 = vld [vmem:[#allocation3 + $0x650] sm:$0xff] }
 0x76f   :  { %3249 = vmatprep.subr.bf16.mxu0 %v2537_v13  ;;  %3765 = vmatprep.subr.bf16.mxu1 %v2650_v3  ;;  %v2592_v13 = vunpack.c.h.s8.bf16 %v2275_v52  ;;  %v2706_v3 = vunpack.c.h.s8.bf16 %v2333_v2  ;;  %v2600_v17 = vunpack.c.l.s8.bf16 %v2283_v53  ;;  %v2832_v50 = vunpack.c.h.s8.bf16 %v2396_v4 }
 0x772   :  { %3250 = vmatpush1.bf16.msra.mxu0 %v2536_v25  ;;  %3766 = vmatpush3.bf16.msra.mxu1 %v2594_v32  ;;  %v2825_v25 = vunpack.c.l.s8.bf16 %v2396_v4  ;;  %v2368_v32 = vld [vmem:[#allocation3 + $0x570] sm:$0xff] }
 0x773   :  { %3262 = vmatprep.subr.bf16.mxu0 %v2544_v9  ;;  %3773 = vmatprep.subr.bf16.mxu1 %v2713_v59  ;;  %v2599_v9 = vunpack.c.l.s8.bf16 %v2282_v5  ;;  %v2769_v61 = vunpack.c.l.s8.bf16 %v2368_v32  ;;  %v2607_v59 = vunpack.c.h.s8.bf16 %v2283_v53  ;;  %v2310_v53 = vld [vmem:[#allocation3 + $0x3a0] sm:$0xff] }
 0x774   :  { %v2655_v4 = vunpack.c.l.s8.bf16 %v2310_v53 }
 0x775   :  { %3252 = vmatmul.mubr.bf16.vlgmr.msra.gmra.mrb[16].mxu0 %v4836_v38  ;;  %3465 = vmatmul.mubr.bf16.vlgmr.msra.gmra.mrb[28].mxu1 %v4856_v51  ;;  %v2671_v38 = vunpack.c.l.s8.bf16 %v2319_v22 }
 0x776   :  { %3263 = vmatpush1.bf16.msra.mxu0 %v2543_v63  ;;  %3774 = vmatpush3.bf16.msra.mxu1 %v2657_v23  ;;  %v2290_v63 = vld [vmem:[#allocation3 + $0x300] sm:$0xff]  ;;  %v2403_v23 = vld [vmem:[#allocation3 + $0x688] sm:$0xff] }
 0x777   :  { %3264 = vmatprep.subr.bf16.mxu0 %v2551_v58  ;;  %3775 = vmatprep.subr.bf16.mxu1 %v2720_v12  ;;  %v2606_v58 = vunpack.c.h.s8.bf16 %v2282_v5  ;;  %v2776_v12 = vunpack.c.h.s8.bf16 %v2368_v32  ;;  %v2614_v19 = vunpack.c.l.s8.bf16 %v2290_v63  ;;  %v2846_v22 = vunpack.c.h.s8.bf16 %v2403_v23 }
 0x778   :  { %3505 = vmatprep.mubr.bf16.mxu1 %v4864_v35  ;;  %3294 = vmatprep.mubr.bf16.mxu0 %v4844_v0  ;;  %v2326_v0 = vld [vmem:[#allocation3 + $0x420] sm:$0xff] }
 0x779   :  { %v2685_v40 = vunpack.c.l.s8.bf16 %v2326_v0  ;;  %v2692_v24 = vunpack.c.h.s8.bf16 %v2326_v0 }
 0x77a   :  { %3265 = vmatpush1.bf16.msra.mxu0 %v2550_v62  ;;  %3776 = vmatpush3.bf16.msra.mxu1 %v2664_v60  ;;  %v2839_v62 = vunpack.c.l.s8.bf16 %v2403_v23  ;;  %v2375_v60 = vld [vmem:[#allocation3 + $0x5a8] sm:$0xff] }
 0x77b   :  { %3266 = vmatprep.subr.bf16.mxu0 %v2558_v14  ;;  %3777 = vmatprep.subr.bf16.mxu1 %v2727_v7  ;;  %v2613_v14 = vunpack.c.l.s8.bf16 %v2289_v33  ;;  %v2783_v20 = vunpack.c.l.s8.bf16 %v2375_v60  ;;  %v2621_v7 = vunpack.c.h.s8.bf16 %v2290_v63  ;;  %v2324_v63 = vld [vmem:[#allocation3 + $0x410] sm:$0xff] }
 0x77e   :  { %3267 = vmatpush1.bf16.msra.mxu0 %v2557_v21  ;;  %3778 = vmatpush3.bf16.msra.mxu1 %v2671_v38  ;;  %v2297_v21 = vld [vmem:[#allocation3 + $0x338] sm:$0xff]  ;;  %v2410_v38 = vld [vmem:[#allocation3 + $0x6c0] sm:$0xff] }
 0x77f   :  { %3268 = vmatprep.subr.bf16.mxu0 %v2565_v10  ;;  %3779 = vmatprep.subr.bf16.mxu1 %v2734_v8  ;;  %v2620_v10 = vunpack.c.h.s8.bf16 %v2289_v33  ;;  %v2790_v8 = vunpack.c.h.s8.bf16 %v2375_v60  ;;  %v2628_v16 = vunpack.c.l.s8.bf16 %v2297_v21  ;;  %v2860_v0 = vunpack.c.h.s8.bf16 %v2410_v38  ;;  %v2339_v60 = vld [vmem:[#allocation3 + $0x488] sm:$0xff] }
 0x782   :  { %3269 = vmatpush1.bf16.msra.mxu0 %v2564_v37  ;;  %3780 = vmatpush3.bf16.msra.mxu1 %v2678_v54  ;;  %v2853_v37 = vunpack.c.l.s8.bf16 %v2410_v38  ;;  %v2382_v54 = vld [vmem:[#allocation3 + $0x5e0] sm:$0xff] }
 0x783   :  { %3270 = vmatprep.subr.bf16.mxu0 %v2572_v36  ;;  %3781 = vmatprep.subr.bf16.mxu1 %v2741_v31  ;;  %v2627_v36 = vunpack.c.l.s8.bf16 %v2296_v43  ;;  %v2797_v39 = vunpack.c.l.s8.bf16 %v2382_v54  ;;  %v2635_v31 = vunpack.c.h.s8.bf16 %v2297_v21  ;;  %v2719_v21 = vunpack.c.h.s8.bf16 %v2339_v60  ;;  %v2346_v38 = vld [vmem:[#allocation3 + $0x4c0] sm:$0xff] }
 0x786   :  { %3271 = vmatpush1.bf16.msra.mxu0 %v2571_v55  ;;  %3782 = vmatpush3.bf16.msra.mxu1 %v2685_v40  ;;  %v2304_v55 = vld [vmem:[#allocation3 + $0x370] sm:$0xff]  ;;  %v2417_v40 = vld [vmem:[#allocation3 + $0x6f8] sm:$0xff] }
 0x787   :  { %3272 = vmatprep.subr.bf16.mxu0 %v2579_v1  ;;  %3783 = vmatprep.subr.bf16.mxu1 %v2748_v42  ;;  %v2634_v1 = vunpack.c.h.s8.bf16 %v2296_v43  ;;  %v2804_v42 = vunpack.c.h.s8.bf16 %v2382_v54  ;;  %v2642_v57 = vunpack.c.l.s8.bf16 %v2304_v55  ;;  %v2874_v2 = vunpack.c.h.s8.bf16 %v2417_v40  ;;  %v2353_v54 = vld [vmem:[#allocation3 + $0x4f8] sm:$0xff] }
 0x78a   :  { %3273 = vmatpush1.bf16.msra.mxu0 %v2578_v29  ;;  %3784 = vmatpush3.bf16.msra.mxu1 %v2692_v24  ;;  %v2867_v29 = vunpack.c.l.s8.bf16 %v2417_v40  ;;  %v2389_v24 = vld [vmem:[#allocation3 + $0x618] sm:$0xff]  ;;  %v2360_v40 = vld [vmem:[#allocation3 + $0x530] sm:$0xff] }
 0x78b   :  { %3274 = vmatprep.subr.bf16.mxu0 %v2586_v34  ;;  %3785 = vmatprep.subr.bf16.mxu1 %v2755_v27  ;;  %v2641_v34 = vunpack.c.l.s8.bf16 %v2303_v56  ;;  %v2811_v52 = vunpack.c.l.s8.bf16 %v2389_v24  ;;  %v2649_v27 = vunpack.c.h.s8.bf16 %v2304_v55  ;;  %v2747_v55 = vunpack.c.h.s8.bf16 %v2353_v54 }
 0x78e   :  { %3275 = vmatpush1.bf16.msra.mxu0 %v2585_v28  ;;  %3786 = vmatpush3.bf16.msra.mxu1 %v2699_v18  ;;  %v2311_v28 = vld [vmem:[#allocation3 + $0x3a8] sm:$0xff]  ;;  %v2648_v18 = vunpack.c.h.s8.bf16 %v2303_v56 }
 0x78f   :  { %3276 = vmatprep.subr.bf16.mxu0 %v2593_v26  ;;  %3787 = vmatprep.subr.bf16.mxu1 %v2762_v6  ;;  %v2818_v26 = vunpack.c.h.s8.bf16 %v2389_v24  ;;  %v2656_v6 = vunpack.c.l.s8.bf16 %v2311_v28  ;;  %v2367_v24 = vld [vmem:[#allocation3 + $0x568] sm:$0xff] }
 0x792   :  { %3277 = vmatpush1.bf16.msra.mxu0 %v2592_v13  ;;  %3788 = vmatpush3.bf16.msra.mxu1 %v2706_v3  ;;  %v2663_v13 = vunpack.c.h.s8.bf16 %v2311_v28  ;;  %v2318_v3 = vld [vmem:[#allocation3 + $0x3e0] sm:$0xff]  ;;  %v2775_v28 = vunpack.c.h.s8.bf16 %v2367_v24 }
 0x793   :  { %3278 = vmatprep.subr.bf16.mxu0 %v2600_v17  ;;  %3795 = vmatprep.subr.bf16.mxu1 %v2825_v25  ;;  %v2662_v17 = vunpack.c.h.s8.bf16 %v2310_v53  ;;  %v2670_v5 = vunpack.c.l.s8.bf16 %v2318_v3  ;;  %v2317_v25 = vld [vmem:[#allocation3 + $0x3d8] sm:$0xff] }
 0x794   :  { %v2669_v32 = vunpack.c.l.s8.bf16 %v2317_v25  ;;  %v2373_v53 = vld [vmem:[#allocation3 + $0x598] sm:$0xff] }
 0x795   :  { %3506 = vmatmul.mubr.bf16.vlgmr.msra.gmra.mrb[32].mxu1 %v4876_v15 }
 0x796   :  { %3279 = vmatpush1.bf16.msra.mxu0 %v2599_v9  ;;  %3796 = vmatpush3.bf16.msra.mxu1 %v2769_v61  ;;  %v2677_v9 = vunpack.c.h.s8.bf16 %v2318_v3  ;;  %v2325_v61 = vld [vmem:[#allocation3 + $0x418] sm:$0xff] }
 0x797   :  { %3280 = vmatprep.subr.bf16.mxu0 %v2607_v59  ;;  %3797 = vmatprep.subr.bf16.mxu1 %v2832_v50  ;;  %v2676_v59 = vunpack.c.h.s8.bf16 %v2317_v25  ;;  %v2684_v50 = vunpack.c.l.s8.bf16 %v2325_v61  ;;  %v2691_v23 = vunpack.c.h.s8.bf16 %v2325_v61  ;;  %v2381_v3 = vld [vmem:[#allocation3 + $0x5d8] sm:$0xff]  ;;  %v2380_v25 = vld [vmem:[#allocation3 + $0x5d0] sm:$0xff] }
 0x798   :  { %3546 = vmatprep.mubr.bf16.mxu1 %v4884_v30  ;;  %v2388_v61 = vld [vmem:[#allocation3 + $0x610] sm:$0xff] }
 0x79a   :  { %3281 = vmatpush1.bf16.msra.mxu0 %v2606_v58  ;;  %3798 = vmatpush3.bf16.msra.mxu1 %v2776_v12  ;;  %v2332_v58 = vld [vmem:[#allocation3 + $0x450] sm:$0xff] }
 0x79b   :  { %3282 = vmatprep.subr.bf16.mxu0 %v2614_v19  ;;  %3799 = vmatprep.subr.bf16.mxu1 %v2839_v62  ;;  %v2698_v12 = vunpack.c.l.s8.bf16 %v2332_v58  ;;  %v2331_v19 = vld [vmem:[#allocation3 + $0x448] sm:$0xff]  ;;  %v2705_v62 = vunpack.c.h.s8.bf16 %v2332_v58 }
 0x79c   :  { %v2697_v33 = vunpack.c.l.s8.bf16 %v2331_v19 }
 0x79e   :  { %3283 = vmatpush1.bf16.msra.mxu0 %v2613_v14  ;;  %3800 = vmatpush3.bf16.msra.mxu1 %v2783_v20  ;;  %v2704_v14 = vunpack.c.h.s8.bf16 %v2331_v19  ;;  %v2712_v20 = vunpack.c.l.s8.bf16 %v2339_v60  ;;  %v2387_v19 = vld [vmem:[#allocation3 + $0x608] sm:$0xff] }
 0x79f   :  { %3284 = vmatprep.subr.bf16.mxu0 %v2621_v7  ;;  %3801 = vmatprep.subr.bf16.mxu1 %v2846_v22  ;;  %v2338_v7 = vld [vmem:[#allocation3 + $0x480] sm:$0xff] }
 0x7a0   :  { %v2711_v22 = vunpack.c.l.s8.bf16 %v2338_v7 }
 0x7a2   :  { %3285 = vmatpush1.bf16.msra.mxu0 %v2620_v10  ;;  %3802 = vmatpush3.bf16.msra.mxu1 %v2790_v8  ;;  %v2718_v10 = vunpack.c.h.s8.bf16 %v2338_v7  ;;  %v2726_v8 = vunpack.c.l.s8.bf16 %v2346_v38 }
 0x7a3   :  { %3286 = vmatprep.subr.bf16.mxu0 %v2628_v16  ;;  %3803 = vmatprep.subr.bf16.mxu1 %v2853_v37  ;;  %v2345_v16 = vld [vmem:[#allocation3 + $0x4b8] sm:$0xff]  ;;  %v2733_v37 = vunpack.c.h.s8.bf16 %v2346_v38 }
 0x7a4   :  { %v2725_v43 = vunpack.c.l.s8.bf16 %v2345_v16 }
 0x7a6   :  { %3287 = vmatpush1.bf16.msra.mxu0 %v2627_v36  ;;  %3804 = vmatpush3.bf16.msra.mxu1 %v2797_v39  ;;  %v2732_v36 = vunpack.c.h.s8.bf16 %v2345_v16  ;;  %v2740_v39 = vunpack.c.l.s8.bf16 %v2353_v54  ;;  %v2817_v16 = vunpack.c.h.s8.bf16 %v2388_v61 }
 0x7a7   :  { %3288 = vmatprep.subr.bf16.mxu0 %v2635_v31  ;;  %3805 = vmatprep.subr.bf16.mxu1 %v2860_v0  ;;  %v2352_v31 = vld [vmem:[#allocation3 + $0x4f0] sm:$0xff] }
 0x7a8   :  { %v2739_v0 = vunpack.c.l.s8.bf16 %v2352_v31 }
 0x7aa   :  { %3289 = vmatpush1.bf16.msra.mxu0 %v2634_v1  ;;  %3806 = vmatpush3.bf16.msra.mxu1 %v2804_v42  ;;  %v2746_v1 = vunpack.c.h.s8.bf16 %v2352_v31  ;;  %v2754_v42 = vunpack.c.l.s8.bf16 %v2360_v40 }
 0x7ab   :  { %3290 = vmatprep.subr.bf16.mxu0 %v2642_v57  ;;  %3807 = vmatprep.subr.bf16.mxu1 %v2867_v29  ;;  %v2359_v57 = vld [vmem:[#allocation3 + $0x528] sm:$0xff]  ;;  %v2761_v29 = vunpack.c.h.s8.bf16 %v2360_v40 }
 0x7ac   :  { %v2753_v56 = vunpack.c.l.s8.bf16 %v2359_v57  ;;  %v2395_v40 = vld [vmem:[#allocation3 + $0x648] sm:$0xff] }
 0x7ae   :  { %3291 = vmatpush1.bf16.msra.mxu0 %v2641_v34  ;;  %3808 = vmatpush3.bf16.msra.mxu1 %v2811_v52  ;;  %v2760_v34 = vunpack.c.h.s8.bf16 %v2359_v57  ;;  %v2768_v52 = vunpack.c.l.s8.bf16 %v2367_v24  ;;  %v2816_v57 = vunpack.c.h.s8.bf16 %v2387_v19  ;;  %v2394_v24 = vld [vmem:[#allocation3 + $0x640] sm:$0xff] }
 0x7af   :  { %3292 = vmatprep.subr.bf16.mxu0 %v2649_v27  ;;  %3809 = vmatprep.subr.bf16.mxu1 %v2874_v2  ;;  %v2366_v27 = vld [vmem:[#allocation3 + $0x560] sm:$0xff] }
 0x7b0   :  { %v2767_v2 = vunpack.c.l.s8.bf16 %v2366_v27 }
 0x7b2   :  { %3293 = vmatpush1.bf16.msra.mxu0 %v2648_v18  ;;  %3810 = vmatpush3.bf16.msra.mxu1 %v2818_v26  ;;  %v2374_v18 = vld [vmem:[#allocation3 + $0x5a0] sm:$0xff]  ;;  %v2774_v26 = vunpack.c.h.s8.bf16 %v2366_v27  ;;  %v2831_v27 = vunpack.c.h.s8.bf16 %v2395_v40 }
 0x7b3   :  { %3305 = vmatprep.subr.bf16.mxu0 %v2656_v6  ;;  %v2782_v6 = vunpack.c.l.s8.bf16 %v2374_v18 }
 0x7b5   :  { %3295 = vmatmul.mubr.bf16.vlgmr.msra.gmra.mrb[16].mxu0 %v4856_v51  ;;  %3547 = vmatmul.mubr.bf16.vlgmr.msra.gmra.mrb[36].mxu1 %v4896_v11  ;;  %v2683_v51 = vunpack.c.l.s8.bf16 %v2324_v63 }
 0x7b6   :  { %3306 = vmatpush1.bf16.msra.mxu0 %v2655_v4  ;;  %3337 = vmatprep.mubr.bf16.mxu0 %v4864_v35  ;;  %v2690_v35 = vunpack.c.h.s8.bf16 %v2324_v63  ;;  %v2781_v4 = vunpack.c.l.s8.bf16 %v2373_v53 }
 0x7b7   :  { %3307 = vmatprep.subr.bf16.mxu0 %v2663_v13  ;;  %v2789_v13 = vunpack.c.h.s8.bf16 %v2374_v18 }
 0x7ba   :  { %3308 = vmatpush1.bf16.msra.mxu0 %v2662_v17  ;;  %v2788_v17 = vunpack.c.h.s8.bf16 %v2373_v53 }
 0x7bb   :  { %3309 = vmatprep.subr.bf16.mxu0 %v2670_v5  ;;  %v2796_v5 = vunpack.c.l.s8.bf16 %v2381_v3 }
 0x7be   :  { %3310 = vmatpush1.bf16.msra.mxu0 %v2669_v32  ;;  %v2795_v32 = vunpack.c.l.s8.bf16 %v2380_v25 }
 0x7bf   :  { %3311 = vmatprep.subr.bf16.mxu0 %v2677_v9  ;;  %v2803_v9 = vunpack.c.h.s8.bf16 %v2381_v3 }
 0x7c2   :  { %3312 = vmatpush1.bf16.msra.mxu0 %v2676_v59 }
 0x7c3   :  { %3313 = vmatprep.subr.bf16.mxu0 %v2684_v50 }
 0x7c6   :  { %3314 = vmatpush1.bf16.msra.mxu0 %v2683_v51 }
 0x7c7   :  { %3315 = vmatprep.subr.bf16.mxu0 %v2691_v23  ;;  %v2802_v23 = vunpack.c.h.s8.bf16 %v2380_v25 }
 0x7ca   :  { %3316 = vmatpush1.bf16.msra.mxu0 %v2690_v35 }
 0x7cb   :  { %3317 = vmatprep.subr.bf16.mxu0 %v2698_v12  ;;  %v2810_v12 = vunpack.c.l.s8.bf16 %v2388_v61 }
 0x7ce   :  { %3318 = vmatpush1.bf16.msra.mxu0 %v2697_v33 }
 0x7cf   :  { %3319 = vmatprep.subr.bf16.mxu0 %v2705_v62 }
 0x7d2   :  { %3320 = vmatpush1.bf16.msra.mxu0 %v2704_v14 }
 0x7d3   :  { %3321 = vmatprep.subr.bf16.mxu0 %v2712_v20 }
 0x7d6   :  { %3322 = vmatpush1.bf16.msra.mxu0 %v2711_v22 }
 0x7d7   :  { %3323 = vmatprep.subr.bf16.mxu0 %v2719_v21 }
 0x7da   :  { %3324 = vmatpush1.bf16.msra.mxu0 %v2718_v10 }
 0x7db   :  { %3325 = vmatprep.subr.bf16.mxu0 %v2726_v8 }
 0x7de   :  { %3326 = vmatpush1.bf16.msra.mxu0 %v2725_v43 }
 0x7df   :  { %3327 = vmatprep.subr.bf16.mxu0 %v2733_v37 }
 0x7e2   :  { %3328 = vmatpush1.bf16.msra.mxu0 %v2732_v36 }
 0x7e3   :  { %3329 = vmatprep.subr.bf16.mxu0 %v2740_v39 }
 0x7e6   :  { %3330 = vmatpush1.bf16.msra.mxu0 %v2739_v0 }
 0x7e7   :  { %3331 = vmatprep.subr.bf16.mxu0 %v2747_v55 }
 0x7ea   :  { %3332 = vmatpush1.bf16.msra.mxu0 %v2746_v1 }
 0x7eb   :  { %3333 = vmatprep.subr.bf16.mxu0 %v2754_v42 }
 0x7ee   :  { %3334 = vmatpush1.bf16.msra.mxu0 %v2753_v56 }
 0x7ef   :  { %3335 = vmatprep.subr.bf16.mxu0 %v2761_v29  ;;  %v2824_v29 = vunpack.c.l.s8.bf16 %v2395_v40 }
 0x7f2   :  { %3336 = vmatpush1.bf16.msra.mxu0 %v2760_v34 }
 0x7f3   :  { %3348 = vmatprep.subr.bf16.mxu0 %v2768_v52  ;;  %v2823_v52 = vunpack.c.l.s8.bf16 %v2394_v24 }
 0x7f5   :  { %3338 = vmatmul.mubr.bf16.vlgmr.msra.gmra.mrb[16].mxu0 %v4876_v15  ;;  %v4915_v15 = vld [vmem:[#allocation13 + $0x41] sm:$0xff] }
 0x7f6   :  { %3349 = vmatpush1.bf16.msra.mxu0 %v2767_v2  ;;  %3380 = vmatprep.mubr.bf16.mxu0 %v4884_v30  ;;  %v4917_v30 = vld [vmem:[#allocation13 + $0x2b] sm:$0xff]  ;;  %v3559_v59 = vrot.slane %v4915_v15, %v4299_v44  ;;  %v3567_v50 = vrot.slane %v4915_v15, %v4385_v41  ;;  %v3563_v63 = vrot.slane %v4915_v15, %v4302_v46 }
 0x7f7   :  { %3350 = vmatprep.subr.bf16.mxu0 %v2775_v28  ;;  %v3571_v51 = vrot.slane %v4915_v15, %v4390_v45  ;;  %v3610_v58 = vrot.slane %v4917_v30, %v4299_v44  ;;  %v3618_v35 = vrot.slane %v4917_v30, %v4385_v41  ;;  %v3614_v60 = vrot.slane %v4917_v30, %v4302_v46  ;;  %v2402_v2 = vld [vmem:[#allocation3 + $0x680] sm:$0xff] }
 0x7f8   :  { %v3622_v14 = vrot.slane %v4917_v30, %v4390_v45  ;;  %v2809_v41 = vunpack.c.l.s8.bf16 %v2387_v19  ;;  %v2830_v28 = vunpack.c.h.s8.bf16 %v2394_v24  ;;  %v2415_v19 = vld [vmem:[#allocation3 + $0x6e8] sm:$0xff] }
 0x7fa   :  { %3351 = vmatpush1.bf16.msra.mxu0 %v2774_v26  ;;  %v2838_v26 = vunpack.c.l.s8.bf16 %v2402_v2 }
 0x7fb   :  { %3352 = vmatprep.subr.bf16.mxu0 %v2782_v6  ;;  %v2401_v6 = vld [vmem:[#allocation3 + $0x678] sm:$0xff] }
 0x7fc   :  { %v2837_v3 = vunpack.c.l.s8.bf16 %v2401_v6 }
 0x7fe   :  { %3353 = vmatpush1.bf16.msra.mxu0 %v2781_v4 }
 0x7ff   :  { %3354 = vmatprep.subr.bf16.mxu0 %v2789_v13 }
 0x802   :  { %3355 = vmatpush1.bf16.msra.mxu0 %v2788_v17 }
 0x803   :  { %3356 = vmatprep.subr.bf16.mxu0 %v2796_v5  ;;  %v2845_v5 = vunpack.c.h.s8.bf16 %v2402_v2 }
 0x806   :  { %3357 = vmatpush1.bf16.msra.mxu0 %v2795_v32  ;;  %v2409_v32 = vld [vmem:[#allocation3 + $0x6b8] sm:$0xff] }
 0x807   :  { %3358 = vmatprep.subr.bf16.mxu0 %v2803_v9 }
 0x808   :  { %v3038_v33 = vpop.f32.mrb[12].mxu0  ;;  %v3210_v62 = vpop.f32.mrb[20].mxu1 }
 0x809   :  { %v3591_v20 = vmul.f32 %v3559_v59, %v3038_v33  ;;  %v3593_v7 = vmul.f32 %v3567_v50, %v3210_v62  ;;  %v3040_v22 = vpop.f32.mrb[13].mxu0  ;;  %v3212_v21 = vpop.f32.mrb[21].mxu1 }
 0x80a   :  { %v3592_v38 = vmul.f32 %v3563_v63, %v3040_v22  ;;  %v3594_v44 = vmul.f32 %v3571_v51, %v3212_v21  ;;  %v3042_v10 = vpop.f32.mrb[14].mxu0  ;;  %v3214_v8 = vpop.f32.mrb[22].mxu1  ;;  %3359 = vmatpush1.bf16.msra.mxu0 %v2802_v23  ;;  %v2859_v23 = vunpack.c.h.s8.bf16 %v2409_v32 }
 0x80b   :  { %v3642_v43 = vadd.f32 %v3610_v58, %v3591_v20  ;;  %v3644_v37 = vadd.f32 %v3618_v35, %v3593_v7  ;;  %v3598_v54 = vmul.f32 %v3559_v59, %v3042_v10  ;;  %v3600_v36 = vmul.f32 %v3567_v50, %v3214_v8  ;;  %v3044_v39 = vpop.f32.mrb[15].mxu0  ;;  %v3216_v46 = vpop.f32.mrb[23].mxu1  ;;  %3360 = vmatprep.subr.bf16.mxu0 %v2810_v12 }
 0x80c   :  { %v3643_v31 = vadd.f32 %v3614_v60, %v3592_v38  ;;  %v3645_v45 = vadd.f32 %v3622_v14, %v3594_v44  ;;  %v3599_v0 = vmul.f32 %v3563_v63, %v3044_v39  ;;  %v3601_v55 = vmul.f32 %v3571_v51, %v3216_v46  ;;  %v2408_v63 = vld [vmem:[#allocation3 + $0x6b0] sm:$0xff] }
 0x80d   :  { %3937 = vtanh.f32 %v3642_v43  ;;  %v3649_v1 = vadd.f32 %v3610_v58, %v3598_v54  ;;  %v3651_v42 = vadd.f32 %v3618_v35, %v3600_v36  ;;  %v2844_v59 = vunpack.c.h.s8.bf16 %v2401_v6  ;;  %v2416_v58 = vld [vmem:[#allocation3 + $0x6f0] sm:$0xff] }
 0x80e   :  { %3939 = vtanh.f32 %v3644_v37  ;;  %3361 = vmatpush1.bf16.msra.mxu0 %v2809_v41  ;;  %v3650_v56 = vadd.f32 %v3614_v60, %v3599_v0  ;;  %v3652_v34 = vadd.f32 %v3622_v14, %v3601_v55  ;;  %v2852_v50 = vunpack.c.l.s8.bf16 %v2409_v32 }
 0x80f   :  { %3941 = vtanh.f32 %v3643_v31  ;;  %3362 = vmatprep.subr.bf16.mxu0 %v2817_v16  ;;  %v2851_v51 = vunpack.c.l.s8.bf16 %v2408_v63  ;;  %v2858_v35 = vunpack.c.h.s8.bf16 %v2408_v63  ;;  %v2866_v12 = vunpack.c.l.s8.bf16 %v2416_v58 }
 0x810   :  { %3943 = vtanh.f32 %v3645_v45  ;;  %v2865_v60 = vunpack.c.l.s8.bf16 %v2415_v19  ;;  %v2873_v7 = vunpack.c.h.s8.bf16 %v2416_v58  ;;  %v2872_v38 = vunpack.c.h.s8.bf16 %v2415_v19 }
 0x811   :  { %3945 = vtanh.f32 %v3649_v1 }
 0x812   :  { %3947 = vtanh.f32 %v3651_v42  ;;  %3363 = vmatpush1.bf16.msra.mxu0 %v2816_v57 }
 0x813   :  { %3949 = vtanh.f32 %v3650_v56  ;;  %3364 = vmatprep.subr.bf16.mxu0 %v2824_v29 }
 0x814   :  { %3951 = vtanh.f32 %v3652_v34  ;;  %v3634_v34 = vrot.slane %v4917_v30, %v4604_v48 }
 0x816   :  { %3365 = vmatpush1.bf16.msra.mxu0 %v2823_v52 }
 0x817   :  { %v3938_v18 = vpop.eup %3937  ;;  %3366 = vmatprep.subr.bf16.mxu0 %v2831_v27 }
 0x818   :  { %v3940_v53 = vpop.eup %3939  ;;  %3670 = vst [vmem:[#allocation14] sm:$0xff] %v3938_v18 }
 0x819   :  { %v3942_v4 = vpop.eup %3941  ;;  %3672 = vst [vmem:[#allocation14 + $0x10] sm:$0xff] %v3940_v53 }
 0x81a   :  { %v3944_v13 = vpop.eup %3943  ;;  %3671 = vst [vmem:[#allocation14 + $0x8] sm:$0xff] %v3942_v4  ;;  %3367 = vmatpush1.bf16.msra.mxu0 %v2830_v28  ;;  %v3575_v4 = vrot.slane %v4915_v15, %v4601_v47 }
 0x81b   :  { %v3946_v17 = vpop.eup %3945  ;;  %3673 = vst [vmem:[#allocation14 + $0x18] sm:$0xff] %v3944_v13  ;;  %3368 = vmatprep.subr.bf16.mxu0 %v2838_v26  ;;  %v3579_v13 = vrot.slane %v4915_v15, %v4607_v49 }
 0x81c   :  { %v3948_v25 = vpop.eup %3947  ;;  %3677 = vst [vmem:[#allocation14 + $0x38] sm:$0xff] %v3946_v17  ;;  %v3630_v17 = vrot.slane %v4917_v30, %v4607_v49 }
 0x81d   :  { %v3950_v9 = vpop.eup %3949  ;;  %3679 = vst [vmem:[#allocation14 + $0x48] sm:$0xff] %v3948_v25 }
 0x81e   :  { %v3952_v61 = vpop.eup %3951  ;;  %3678 = vst [vmem:[#allocation14 + $0x40] sm:$0xff] %v3950_v9  ;;  %3369 = vmatpush1.bf16.msra.mxu0 %v2837_v3 }
 0x81f   :  { %3680 = vst [vmem:[#allocation14 + $0x50] sm:$0xff] %v3952_v61  ;;  %3370 = vmatprep.subr.bf16.mxu0 %v2845_v5 }
 0x822   :  { %3371 = vmatpush1.bf16.msra.mxu0 %v2844_v59 }
 0x823   :  { %3372 = vmatprep.subr.bf16.mxu0 %v2852_v50 }
 0x826   :  { %3373 = vmatpush1.bf16.msra.mxu0 %v2851_v51 }
 0x827   :  { %3374 = vmatprep.subr.bf16.mxu0 %v2859_v23 }
 0x828   :  { %v3745_v33 = vpop.f32.mrb[24].mxu1 }
 0x829   :  { %v3746_v62 = vpop.f32.mrb[25].mxu1 }
 0x82a   :  { %3375 = vmatpush1.bf16.msra.mxu0 %v2858_v35  ;;  %v3747_v14 = vadd.f32 %v3746_v62, %v3745_v33  ;;  %v3748_v20 = vpop.f32.mrb[26].mxu1 }
 0x82b   :  { %3376 = vmatprep.subr.bf16.mxu0 %v2866_v12  ;;  %v3749_v22 = vpop.f32.mrb[27].mxu1 }
 0x82c   :  { %v3750_v21 = vadd.f32 %v3749_v22, %v3748_v20 }
 0x82e   :  { %3377 = vmatpush1.bf16.msra.mxu0 %v2865_v60 }
 0x82f   :  { %3378 = vmatprep.subr.bf16.mxu0 %v2873_v7 }
 0x832   :  { %3379 = vmatpush1.bf16.msra.mxu0 %v2872_v38 }
 0x835   :  { %3381 = vmatmul.mubr.bf16.vlgmr.msra.gmra.mrb[16].mxu0 %v4896_v11  ;;  %v3583_v11 = vrot.slane %v4915_v15, %v4604_v48  ;;  %v3626_v48 = vrot.slane %v4917_v30, %v4601_v47 }
 0x848   :  { %v3767_v44 = vpop.f32.mrb[28].mxu1 }
 0x849   :  { %v3768_v10 = vpop.f32.mrb[29].mxu1 }
 0x84a   :  { %v3769_v8 = vadd.f32 %v3768_v10, %v3767_v44  ;;  %v3770_v41 = vpop.f32.mrb[30].mxu1 }
 0x84b   :  { %v3771_v16 = vpop.f32.mrb[31].mxu1 }
 0x84c   :  { %v3467_v43 = vadd.f32 %v3769_v8, %v3747_v14  ;;  %v3772_v37 = vadd.f32 %v3771_v16, %v3770_v41 }
 0x84e   :  { %v3470_v54 = vadd.f32 %v3772_v37, %v3750_v21 }
 0x868   :  { %v3789_v36 = vpop.f32.mrb[32].mxu1 }
 0x869   :  { %v3790_v39 = vpop.f32.mrb[33].mxu1 }
 0x86a   :  { %v3791_v46 = vadd.f32 %v3790_v39, %v3789_v36  ;;  %v3792_v31 = vpop.f32.mrb[34].mxu1 }
 0x86b   :  { %v3793_v45 = vpop.f32.mrb[35].mxu1 }
 0x86c   :  { %v3508_v0 = vadd.f32 %v3791_v46, %v3467_v43  ;;  %v3794_v55 = vadd.f32 %v3793_v45, %v3792_v31 }
 0x86e   :  { %v3511_v40 = vadd.f32 %v3794_v55, %v3470_v54 }
 0x888   :  { %v3811_v1 = vpop.f32.mrb[36].mxu1 }
 0x889   :  { %v3812_v42 = vpop.f32.mrb[37].mxu1 }
 0x88a   :  { %v3813_v57 = vadd.f32 %v3812_v42, %v3811_v1  ;;  %v3814_v56 = vpop.f32.mrb[38].mxu1 }
 0x88b   :  { %v3815_v29 = vpop.f32.mrb[39].mxu1 }
 0x88c   :  { %v3549_v24 = vadd.f32 %v3813_v57, %v3508_v0  ;;  %v3816_v52 = vadd.f32 %v3815_v29, %v3814_v56 }
 0x88e   :  { %v3597_v27 = vmul.f32 %v3583_v11, %v3549_v24  ;;  %v3552_v2 = vadd.f32 %v3816_v52, %v3511_v40 }
 0x890   :  { %v3648_v28 = vadd.f32 %v3634_v34, %v3597_v27  ;;  %v3604_v18 = vmul.f32 %v3583_v11, %v3552_v2 }
 0x892   :  { %3953 = vtanh.f32 %v3648_v28  ;;  %v3655_v26 = vadd.f32 %v3634_v34, %v3604_v18 }
 0x894   :  { %3955 = vtanh.f32 %v3655_v26 }
 0x89c   :  { %v3954_v6 = vpop.eup %3953 }
 0x89d   :  { %3676 = vst [vmem:[#allocation14 + $0x30] sm:$0xff] %v3954_v6 }
 0x89e   :  { %v3956_v53 = vpop.eup %3955 }
 0x89f   :  { %3683 = vst [vmem:[#allocation14 + $0x68] sm:$0xff] %v3956_v53 }
 0x908   :  { %v3382_v3 = vpop.f32.mrb[16].mxu0 }
 0x909   :  { %v3595_v5 = vmul.f32 %v3575_v4, %v3382_v3  ;;  %v3384_v25 = vpop.f32.mrb[17].mxu0 }
 0x90a   :  { %v3596_v32 = vmul.f32 %v3579_v13, %v3384_v25  ;;  %v3386_v9 = vpop.f32.mrb[18].mxu0 }
 0x90b   :  { %v3646_v61 = vadd.f32 %v3626_v48, %v3595_v5  ;;  %v3602_v59 = vmul.f32 %v3575_v4, %v3386_v9  ;;  %v3388_v50 = vpop.f32.mrb[19].mxu0 }
 0x90c   :  { %v3647_v63 = vadd.f32 %v3630_v17, %v3596_v32  ;;  %v3603_v51 = vmul.f32 %v3579_v13, %v3388_v50 }
 0x90d   :  { %3957 = vtanh.f32 %v3646_v61  ;;  %v3653_v23 = vadd.f32 %v3626_v48, %v3602_v59 }
 0x90e   :  { %3959 = vtanh.f32 %v3647_v63  ;;  %v3654_v15 = vadd.f32 %v3630_v17, %v3603_v51 }
 0x90f   :  { %3961 = vtanh.f32 %v3653_v23 }
 0x910   :  { %3963 = vtanh.f32 %v3654_v15 }
 0x917   :  { %v3958_v47 = vpop.eup %3957 }
 0x918   :  { %v3960_v58 = vpop.eup %3959  ;;  %3674 = vst [vmem:[#allocation14 + $0x20] sm:$0xff] %v3958_v47 }
 0x919   :  { %v3962_v49 = vpop.eup %3961  ;;  %3675 = vst [vmem:[#allocation14 + $0x28] sm:$0xff] %v3960_v58 }
 0x91a   :  { %v3964_v30 = vpop.eup %3963  ;;  %3681 = vst [vmem:[#allocation14 + $0x58] sm:$0xff] %v3962_v49 }
 0x91b   :  { %3682 = vst [vmem:[#allocation14 + $0x60] sm:$0xff] %v3964_v30 }
 0x91c   :  { %4130 = shalt.err (!%p4127_p4)
}
 0x91d   :  { %s4131_s9 = scalar_lea.hbm %s4967_s7, 1792 }
 0x91e   :  { %p4132_p5 = scmp.ne.s32.totalorder %s4967_s7, %s4131_s9  ;;  %p4135_p6 = scmp.lt.u32.totalorder %s4131_s9, %s4967_s7 }
 0x920   :  { %p4137_p7 = pnand %p4135_p6, %p4132_p5 }
 0x922   :  { %4140 = shalt.err (!%p4137_p7)
}
 0x923   :  { %s4171_s20 = smov 896   ;;  %s4172_s21 = smov 56  }
 0x924   :  { %3695 = dma.vmem_to_hbm [thread:$0]  %s3690_s16, 1792, %s4967_s7, [#allocation7], %s4171_s20, %s4171_s20, %s4172_s21  }
 0x925   :  { %4151 = dma.done.wait [#allocation7], 1792  }
 0x926   :  { %4152 = vsyncadd [#allocation7], 4294965504 }
 0x927   :  { %3699 = vsyncpa [#allocation6], 1 }
 0x928   :  { %3700 = vsyncpa [#allocation9], 1 }
 0x929   :  { %3701 = vsyncpa [#allocation12], 1 }
 0x92a   :  { %3702 = vsyncpa [#allocation7], 1 }
 0x92b   :  { %3703 = vsyncmov [#allocation4] }
 0x92e   :  { %s3704_s24 = vpop.sfrf %3703 }
 0x92f   :  { %p3718_p8 = scmp.ne.s32.totalorder %s3704_s24, 0 }
 0x931   :  { %3708 = shalt.err (%p3718_p8)  }
 0x932   :  { %3710 = vsyncmov [#allocation4 + $0x1] }
 0x935   :  { %s3711_s1 = vpop.sfrf %3710 }
 0x936   :  { %p3719_p9 = scmp.ne.s32.totalorder %s3711_s1, 0 }
 0x938   :  { %3715 = shalt.err (%p3719_p9)  }

</bundles_post_ra>
